<compile_context>
chip_gen: v6e
topology: v6e:2x2x1
jax: 0.10.0
libtpu: 0.0.40
codegen_flags: <defaults>
</compile_context>

<pallas_src>
import jax
import jax.numpy as jnp
from jax.experimental import pallas as pl
from jax.experimental.pallas import tpu as pltpu

# Use exact f32 matmuls everywhere (kernel, host folds, reference) so the
# folded kernel and the unfolded reference agree tightly.
jax.config.update("jax_default_matmul_precision", "highest")

# ----- config (small, consistent with the module) -----
BATCH = 2            # configs.batch_size
SEQ_LEN = 16         # configs.seq_len (input_window_size)
ENC_IN = 16          # configs.enc_in
PRED_LEN = 12        # configs.label_len (pred_len)
INPUT_SIZE = SEQ_LEN * ENC_IN        # 256
BN_EPS = 1e-5
LANES = 128                          # lane-dense padded width for all layers
M_PAD = 8                            # batch padded to a full sublane group
DIMS = [INPUT_SIZE, INPUT_SIZE // 4, INPUT_SIZE // 8, INPUT_SIZE // 16,
        INPUT_SIZE // 32, INPUT_SIZE // 64, INPUT_SIZE // 128, 64]
# -> 256, 64, 32, 16, 8, 4, 2, 64

# ----- slab layout (row offsets; each block 128 lanes wide, 8-row aligned) ---
OFF_DENSE = [0, 256, 384, 512, 640, 768, 896]   # dense1 (256 rows), dense2..7 (128 rows each)
OFF_WO = 1024                                    # output layer (128 rows)
OFF_B = 1152                                     # 8 bias rows
SLAB_ROWS = 1160


# ---------------------------------------------------------------------------
# Fused kernel: whole MLP, everything VMEM-resident, single invocation.
#   x_ref:    (8, 256)      batch-padded flattened inputs
#   slab_ref: (1160, 128)   packed folded weights + biases (see layout above)
#   out_ref:  (8, 128)      lane-dense padded output (cols >= PRED_LEN are 0)
# ---------------------------------------------------------------------------
def fused_mffn_kernel(x_ref, slab_ref, out_ref):
    x = x_ref[...]                                   # (8, 256)
    b = slab_ref[OFF_B:OFF_B + 8, :]                 # (8, 128) packed biases

    # dense1 (A-folded, BN-folded, conv-constant in bias) + ReLU
    h = jnp.dot(x, slab_ref[OFF_DENSE[0]:OFF_DENSE[0] + INPUT_SIZE, :],
                preferred_element_type=jnp.float32)
    h = jnp.maximum(h + b[0:1, :], 0.0)

    # dense2..dense7 (+ eval BN fold on dense2) + ReLU, all lane-padded to 128
    for i in range(1, 7):
        off = OFF_DENSE[i]
        h = jnp.dot(h, slab_ref[off:off + LANES, :],
                    preferred_element_type=jnp.float32)
        h = jnp.maximum(h + b[i:i + 1, :], 0.0)

    # output layer (no activation); padded cols stay exactly zero
    out_ref[...] = (jnp.dot(h, slab_ref[OFF_WO:OFF_WO + LANES, :],
                            preferred_element_type=jnp.float32)
                    + b[7:8, :])


# ---------------------------------------------------------------------------
# Raw parameter init (shapes follow the module's __init__; deterministic)
# ---------------------------------------------------------------------------
def init_params(key):
    keys = jax.random.split(key, 24)
    ki = iter(keys)
    p = {}
    # projection: nn.Linear(enc_in, 1)
    p["proj_w"] = jax.random.normal(next(ki), (ENC_IN,), jnp.float32) * 0.1
    p["proj_b"] = jnp.float32(0.01)
    # conv3d: weight (1,1,2,1,1) -> two scalars (applied to [inputs, projected]), bias
    p["conv_w"] = jnp.array([0.7, 0.3], jnp.float32)
    p["conv_b"] = jnp.float32(0.02)
    # dense1..dense7 (stored as (in, out) so the kernel does h @ W + b)
    dense = []
    for i in range(7):
        din, dout = DIMS[i], DIMS[i + 1]
        w = jax.random.normal(next(ki), (din, dout), jnp.float32) / jnp.sqrt(float(din))
        b = jax.random.normal(next(ki), (dout,), jnp.float32) * 0.01
        dense.append((w, b))
    p["dense"] = dense

    # BatchNorm params with non-trivial running stats (exercise the fold)
    def bn_init(k, n):
        k1, k2, k3, k4 = jax.random.split(k, 4)
        gamma = 1.0 + 0.2 * jax.random.normal(k1, (n,), jnp.float32)
        beta = 0.1 * jax.random.normal(k2, (n,), jnp.float32)
        rmean = 0.1 * jax.random.normal(k3, (n,), jnp.float32)
        rvar = 0.5 + jax.random.uniform(k4, (n,), jnp.float32)
        return gamma, beta, rmean, rvar

    p["bn1"] = bn_init(next(ki), DIMS[1])
    p["bn2"] = bn_init(next(ki), DIMS[2])
    # output_layer: 64 -> pred_len
    p["out_w"] = jax.random.normal(next(ki), (64, PRED_LEN), jnp.float32) / 8.0
    p["out_b"] = jax.random.normal(next(ki), (PRED_LEN,), jnp.float32) * 0.01
    return p


# ---------------------------------------------------------------------------
# Host-side (once per model) parameter folding / packing into ONE weight slab
# ---------------------------------------------------------------------------
def fold_params(p):
    # --- masked projection + conv3d combine folded into a linear operator ---
    w = p["proj_w"]                                   # (E,)
    cw0, cw1 = p["conv_w"][0], p["conv_w"][1]
    # z[t,i] = cw0*x[t,i] + cw1*(sum_j w_j x[t,j] - w_i x[t,i] + proj_b) + conv_b
    #        = sum_j x[t,j] * M[j,i] + c
    a_diag = cw0 - cw1 * w                            # (E,)
    w_sum = cw1 * w                                   # (E,)
    c = cw1 * p["proj_b"] + p["conv_b"]               # scalar
    m_blk = jnp.broadcast_to(w_sum[:, None], (ENC_IN, ENC_IN)) + jnp.diag(a_diag)
    a_op = jnp.kron(jnp.eye(SEQ_LEN, dtype=jnp.float32), m_blk)   # (256, 256)

    # --- fold eval-mode BN into dense1 / dense2 ---
    def fold_bn(wmat, bvec, bn):
        g, be, m, v = bn
        s = g * jax.lax.rsqrt(v + BN_EPS)
        return wmat * s[None, :], (bvec - m) * s + be

    (w1, b1), (w2, b2) = p["dense"][0], p["dense"][1]
    w1f, b1f = fold_bn(w1, b1, p["bn1"])
    w2f, b2f = fold_bn(w2, b2, p["bn2"])
    # conv constant c (added uniformly to z) folds into dense1's bias
    b1f = b1f + c * jnp.sum(w1f, axis=0)
    # fold the A operator into dense1 (f32, exact precision) -> (256, 64)
    w1ff = jnp.dot(a_op, w1f, precision=jax.lax.Precision.HIGHEST)

    dense_w = [w1ff, w2f] + [wm for (wm, _) in p["dense"][2:]]
    dense_b = [b1f, b2f] + [bv for (_, bv) in p["dense"][2:]]

    # --- pack everything into one lane-dense (SLAB_ROWS, 128) slab ---
    slab = jnp.zeros((SLAB_ROWS, LANES), jnp.float32)
    for i, wm in enumerate(dense_w):
        off = OFF_DENSE[i]
        slab = slab.at[off:off + wm.shape[0], :wm.shape[1]].set(wm)
    slab = slab.at[OFF_WO:OFF_WO + 64, :PRED_LEN].set(p["out_w"])

    bo_pad = jnp.zeros((LANES,), jnp.float32).at[:PRED_LEN].set(p["out_b"])
    biases = dense_b + [bo_pad]                       # 8 rows
    for i, bv in enumerate(biases):
        slab = slab.at[OFF_B + i, :bv.shape[0]].set(bv)
    return slab


# ---------------------------------------------------------------------------
# Forward wrapper: one fused grid-free pallas_call, lane-dense padded output
# ---------------------------------------------------------------------------
@jax.jit
def forward(x, slab):
    B = x.shape[0]
    x_flat = x.reshape(B, INPUT_SIZE)
    # pad batch to a full 8-sublane group -> unmasked loads/stores in-kernel
    x_pad = jnp.zeros((M_PAD, INPUT_SIZE), jnp.float32).at[:B].set(x_flat)
    out_pad = pl.pallas_call(
        fused_mffn_kernel,
        out_shape=jax.ShapeDtypeStruct((M_PAD, LANES), jnp.float32),
        in_specs=[pl.BlockSpec(memory_space=pltpu.MemorySpace.VMEM),
                  pl.BlockSpec(memory_space=pltpu.MemorySpace.VMEM)],
        out_specs=pl.BlockSpec(memory_space=pltpu.MemorySpace.VMEM),
    )(x_pad, slab)
    return out_pad[:B, :PRED_LEN].reshape(B, 1, PRED_LEN)


# ---------------------------------------------------------------------------
# Pure-JAX reference mirroring the PyTorch forward (eval mode), unfolded
# ---------------------------------------------------------------------------
def reference(x, p):
    B, S, E = x.shape
    T = B * S
    x2 = x.reshape(T, E)
    mask = jnp.eye(E, dtype=bool)
    xr = jnp.broadcast_to(x2[:, None, :], (T, E, E))
    masked = jnp.where(mask[None, :, :], 0.0, xr).reshape(T * E, E)
    projected = (masked @ p["proj_w"].reshape(E, 1) + p["proj_b"]).reshape(T, E)
    # conv3d kernel (2,1,1): w0 * inputs-slice + w1 * projected-slice + bias
    z = p["conv_w"][0] * x2 + p["conv_w"][1] * projected + p["conv_b"]
    h = z.reshape(B, S * E)

    def bn(h, bnp):
        g, be, m, v = bnp
        return g * (h - m) / jnp.sqrt(v + BN_EPS) + be

    (w1, b1), (w2, b2) = p["dense"][0], p["dense"][1]
    h = jnp.maximum(bn(h @ w1 + b1, p["bn1"]), 0.0)
    h = jnp.maximum(bn(h @ w2 + b2, p["bn2"]), 0.0)
    for w, b in p["dense"][2:]:
        h = jnp.maximum(h @ w + b, 0.0)
    out = h @ p["out_w"] + p["out_b"]
    return out.reshape(B, 1, PRED_LEN)


if __name__ == "__main__":
    key = jax.random.PRNGKey(0)
    k_x, k_p = jax.random.split(key)
    x = jax.random.normal(k_x, (BATCH, SEQ_LEN, ENC_IN), jnp.float32)
    raw = init_params(k_p)
    slab = fold_params(raw)

    out = forward(x, slab)
    out = jax.block_until_ready(out)
    assert out.shape == (BATCH, 1, PRED_LEN), out.shape

    ref = reference(x, raw)
    err = float(jnp.max(jnp.abs(out - ref)))
    assert jnp.allclose(out, ref, atol=2e-3, rtol=2e-3), f"max abs err {err}"

    print("KERNEL_OK")
</pallas_src>

<mosaic_0001>
module attributes {stable_mosaic.version = 11 : i64} {
  func.func @fused_mffn_kernel(%arg0: memref<8x256xf32, #tpu.memory_space<vmem>>, %arg1: memref<1160x128xf32, #tpu.memory_space<vmem>>, %arg2: memref<8x128xf32, #tpu.memory_space<vmem>>) attributes {dimension_semantics = [], scalar_prefetch = 0 : i64, scratch_operands = 0 : i64, tpu.core_type = #tpu.core_type<tc>} {
    %c0 = arith.constant 0 : index
    %c0_0 = arith.constant 0 : index
    %0 = vector.load %arg0[%c0, %c0_0] : memref<8x256xf32, #tpu.memory_space<vmem>>, vector<8x256xf32>
    %c1152 = arith.constant 1152 : index
    %c0_1 = arith.constant 0 : index
    %1 = vector.load %arg1[%c1152, %c0_1] : memref<1160x128xf32, #tpu.memory_space<vmem>>, vector<8x128xf32>
    %c0_2 = arith.constant 0 : index
    %c0_3 = arith.constant 0 : index
    %2 = vector.load %arg1[%c0_2, %c0_3] : memref<1160x128xf32, #tpu.memory_space<vmem>>, vector<256x128xf32>
    %cst = arith.constant dense<0.000000e+00> : vector<8x128xf32>
    %3 = tpu.matmul %0, %2, %cst {dimension_numbers = #tpu.dot_dimension_numbers<[1], [0], [0], [1], [0, 0, 1, 1], [], []>, precision = #tpu.contract_precision<fp32>} : vector<8x256xf32>, vector<256x128xf32>, vector<8x128xf32> -> vector<8x128xf32>
    %4 = vector.extract_strided_slice %1 {offsets = [0, 0], sizes = [1, 128], strides = [1, 1]} : vector<8x128xf32> to vector<1x128xf32>
    %5 = vector.broadcast %4 : vector<1x128xf32> to vector<8x128xf32>
    %6 = arith.addf %3, %5 : vector<8x128xf32>
    %cst_4 = arith.constant 0.000000e+00 : f32
    %7 = vector.broadcast %cst_4 : f32 to vector<8x128xf32>
    %8 = arith.maximumf %6, %7 : vector<8x128xf32>
    %c256 = arith.constant 256 : index
    %c0_5 = arith.constant 0 : index
    %9 = vector.load %arg1[%c256, %c0_5] : memref<1160x128xf32, #tpu.memory_space<vmem>>, vector<128x128xf32>
    %cst_6 = arith.constant dense<0.000000e+00> : vector<8x128xf32>
    %10 = tpu.matmul %8, %9, %cst_6 {dimension_numbers = #tpu.dot_dimension_numbers<[1], [0], [0], [1], [0, 0, 1, 1], [], []>, precision = #tpu.contract_precision<fp32>} : vector<8x128xf32>, vector<128x128xf32>, vector<8x128xf32> -> vector<8x128xf32>
    %11 = vector.extract_strided_slice %1 {offsets = [1, 0], sizes = [1, 128], strides = [1, 1]} : vector<8x128xf32> to vector<1x128xf32>
    %12 = vector.broadcast %11 : vector<1x128xf32> to vector<8x128xf32>
    %13 = arith.addf %10, %12 : vector<8x128xf32>
    %cst_7 = arith.constant 0.000000e+00 : f32
    %14 = vector.broadcast %cst_7 : f32 to vector<8x128xf32>
    %15 = arith.maximumf %13, %14 : vector<8x128xf32>
    %c384 = arith.constant 384 : index
    %c0_8 = arith.constant 0 : index
    %16 = vector.load %arg1[%c384, %c0_8] : memref<1160x128xf32, #tpu.memory_space<vmem>>, vector<128x128xf32>
    %cst_9 = arith.constant dense<0.000000e+00> : vector<8x128xf32>
    %17 = tpu.matmul %15, %16, %cst_9 {dimension_numbers = #tpu.dot_dimension_numbers<[1], [0], [0], [1], [0, 0, 1, 1], [], []>, precision = #tpu.contract_precision<fp32>} : vector<8x128xf32>, vector<128x128xf32>, vector<8x128xf32> -> vector<8x128xf32>
    %18 = vector.extract_strided_slice %1 {offsets = [2, 0], sizes = [1, 128], strides = [1, 1]} : vector<8x128xf32> to vector<1x128xf32>
    %19 = vector.broadcast %18 : vector<1x128xf32> to vector<8x128xf32>
    %20 = arith.addf %17, %19 : vector<8x128xf32>
    %cst_10 = arith.constant 0.000000e+00 : f32
    %21 = vector.broadcast %cst_10 : f32 to vector<8x128xf32>
    %22 = arith.maximumf %20, %21 : vector<8x128xf32>
    %c512 = arith.constant 512 : index
    %c0_11 = arith.constant 0 : index
    %23 = vector.load %arg1[%c512, %c0_11] : memref<1160x128xf32, #tpu.memory_space<vmem>>, vector<128x128xf32>
    %cst_12 = arith.constant dense<0.000000e+00> : vector<8x128xf32>
    %24 = tpu.matmul %22, %23, %cst_12 {dimension_numbers = #tpu.dot_dimension_numbers<[1], [0], [0], [1], [0, 0, 1, 1], [], []>, precision = #tpu.contract_precision<fp32>} : vector<8x128xf32>, vector<128x128xf32>, vector<8x128xf32> -> vector<8x128xf32>
    %25 = vector.extract_strided_slice %1 {offsets = [3, 0], sizes = [1, 128], strides = [1, 1]} : vector<8x128xf32> to vector<1x128xf32>
    %26 = vector.broadcast %25 : vector<1x128xf32> to vector<8x128xf32>
    %27 = arith.addf %24, %26 : vector<8x128xf32>
    %cst_13 = arith.constant 0.000000e+00 : f32
    %28 = vector.broadcast %cst_13 : f32 to vector<8x128xf32>
    %29 = arith.maximumf %27, %28 : vector<8x128xf32>
    %c640 = arith.constant 640 : index
    %c0_14 = arith.constant 0 : index
    %30 = vector.load %arg1[%c640, %c0_14] : memref<1160x128xf32, #tpu.memory_space<vmem>>, vector<128x128xf32>
    %cst_15 = arith.constant dense<0.000000e+00> : vector<8x128xf32>
    %31 = tpu.matmul %29, %30, %cst_15 {dimension_numbers = #tpu.dot_dimension_numbers<[1], [0], [0], [1], [0, 0, 1, 1], [], []>, precision = #tpu.contract_precision<fp32>} : vector<8x128xf32>, vector<128x128xf32>, vector<8x128xf32> -> vector<8x128xf32>
    %32 = vector.extract_strided_slice %1 {offsets = [4, 0], sizes = [1, 128], strides = [1, 1]} : vector<8x128xf32> to vector<1x128xf32>
    %33 = vector.broadcast %32 : vector<1x128xf32> to vector<8x128xf32>
    %34 = arith.addf %31, %33 : vector<8x128xf32>
    %cst_16 = arith.constant 0.000000e+00 : f32
    %35 = vector.broadcast %cst_16 : f32 to vector<8x128xf32>
    %36 = arith.maximumf %34, %35 : vector<8x128xf32>
    %c768 = arith.constant 768 : index
    %c0_17 = arith.constant 0 : index
    %37 = vector.load %arg1[%c768, %c0_17] : memref<1160x128xf32, #tpu.memory_space<vmem>>, vector<128x128xf32>
    %cst_18 = arith.constant dense<0.000000e+00> : vector<8x128xf32>
    %38 = tpu.matmul %36, %37, %cst_18 {dimension_numbers = #tpu.dot_dimension_numbers<[1], [0], [0], [1], [0, 0, 1, 1], [], []>, precision = #tpu.contract_precision<fp32>} : vector<8x128xf32>, vector<128x128xf32>, vector<8x128xf32> -> vector<8x128xf32>
    %39 = vector.extract_strided_slice %1 {offsets = [5, 0], sizes = [1, 128], strides = [1, 1]} : vector<8x128xf32> to vector<1x128xf32>
    %40 = vector.broadcast %39 : vector<1x128xf32> to vector<8x128xf32>
    %41 = arith.addf %38, %40 : vector<8x128xf32>
    %cst_19 = arith.constant 0.000000e+00 : f32
    %42 = vector.broadcast %cst_19 : f32 to vector<8x128xf32>
    %43 = arith.maximumf %41, %42 : vector<8x128xf32>
    %c896 = arith.constant 896 : index
    %c0_20 = arith.constant 0 : index
    %44 = vector.load %arg1[%c896, %c0_20] : memref<1160x128xf32, #tpu.memory_space<vmem>>, vector<128x128xf32>
    %cst_21 = arith.constant dense<0.000000e+00> : vector<8x128xf32>
    %45 = tpu.matmul %43, %44, %cst_21 {dimension_numbers = #tpu.dot_dimension_numbers<[1], [0], [0], [1], [0, 0, 1, 1], [], []>, precision = #tpu.contract_precision<fp32>} : vector<8x128xf32>, vector<128x128xf32>, vector<8x128xf32> -> vector<8x128xf32>
    %46 = vector.extract_strided_slice %1 {offsets = [6, 0], sizes = [1, 128], strides = [1, 1]} : vector<8x128xf32> to vector<1x128xf32>
    %47 = vector.broadcast %46 : vector<1x128xf32> to vector<8x128xf32>
    %48 = arith.addf %45, %47 : vector<8x128xf32>
    %cst_22 = arith.constant 0.000000e+00 : f32
    %49 = vector.broadcast %cst_22 : f32 to vector<8x128xf32>
    %50 = arith.maximumf %48, %49 : vector<8x128xf32>
    %c1024 = arith.constant 1024 : index
    %c0_23 = arith.constant 0 : index
    %51 = vector.load %arg1[%c1024, %c0_23] : memref<1160x128xf32, #tpu.memory_space<vmem>>, vector<128x128xf32>
    %cst_24 = arith.constant dense<0.000000e+00> : vector<8x128xf32>
    %52 = tpu.matmul %50, %51, %cst_24 {dimension_numbers = #tpu.dot_dimension_numbers<[1], [0], [0], [1], [0, 0, 1, 1], [], []>, precision = #tpu.contract_precision<fp32>} : vector<8x128xf32>, vector<128x128xf32>, vector<8x128xf32> -> vector<8x128xf32>
    %53 = vector.extract_strided_slice %1 {offsets = [7, 0], sizes = [1, 128], strides = [1, 1]} : vector<8x128xf32> to vector<1x128xf32>
    %54 = vector.broadcast %53 : vector<1x128xf32> to vector<8x128xf32>
    %55 = arith.addf %52, %54 : vector<8x128xf32>
    %c0_25 = arith.constant 0 : index
    %c0_26 = arith.constant 0 : index
    %56 = vector.load %arg2[%c0_25, %c0_26] : memref<8x128xf32, #tpu.memory_space<vmem>>, vector<8x128xf32>
    tpu.vector_store %arg2[%c0_25, %c0_26], %55 {strides = array<i32>} : memref<8x128xf32, #tpu.memory_space<vmem>>, vector<8x128xf32>,
    return
  }
}

</mosaic_0001>

<bundles_post_ra>
// kernel: forward.1
= control target key start
LH: loop header
LB: loop body
LE: loop exit
PB: predicated region body
PF: predicated region fallthrough
CT: control target
= control target key end

     0   :  { %7 = vsyncpa [#allocation3], 0  ;;  %s7990_s9 = smov [#allocation2]   ;;  %s11163_s0 = inlined_call_operand.vmem [shape: f32[8,256], index: 0, kind: input, shape index: {}]   ;;  %s11164_s1 = inlined_call_operand.hbm [shape: f32[1160,128], index: 1, kind: input, shape index: {}]   ;;  %s11165_s2 = inlined_call_operand.vmem [shape: f32[8,128], index: 2, kind: output, shape index: {}]  }
   0x1   :  { %s15_s10 = sshll.u32 %s7990_s9, 4  ;;  %s16_s10 = int_to_ptr.vmem [resolvable:$true] %s15_s10 }
   0x2   :  { %s7976_s11 = scalar_lea.vmem %s16_s10, 18560  ;;  %p7981_p1 = scmp.lt.s32.totalorder %s16_s10, %s16_s10 }
   0x3   :  { %p7977_p0 = scmp.ne.s32.totalorder %s16_s10, %s7976_s11  ;;  %p7982_p2 = scmp.lt.s32.totalorder %s7976_s11, %s7976_s11 }
   0x5   :  { %p7983_p3 = por %p7982_p2, %p7981_p1 }
   0x7   :  { %p7984_p4 = pnand %p7983_p3, %p7977_p0 }
   0x9   :  { %7987 = shalt.err (!%p7984_p4)
}
   0xa   :  { %s7991_s12 = smov 128   ;;  %s7992_s13 = smov 8  }
   0xb   :  { %21 = dma.hbm_to_vmem [thread:$0]  %s11164_s1, 18560, %s16_s10, [#allocation3], %s7991_s12, %s7991_s12, %s7992_s13  }
   0xc   :  { %7988 = dma.done.wait [#allocation3], 18560  }
   0xd   :  { %7989 = vsyncadd [#allocation3], 4294948736  ;;  %v59_v0 = vld [vmem:[#allocation2 + $0xf8] sm:$0xff]  ;;  %v58_v2 = vld [vmem:[#allocation2 + $0xf0] sm:$0xff]  ;;  %vm7994_vm0 = vmmov 0  }
   0xe   :  { %v43_v1 = vld [vmem:[#allocation2 + $0x78] sm:$0xff]  ;;  %v8013_v3 = vand.u32 4294901760, %v59_v0  ;;  %v8017_v5 = vand.u32 4294901760, %v58_v2  ;;  %v42_v6 = vld [vmem:[#allocation2 + $0x70] sm:$0xff]  ;;  %v57_v7 = vld [vmem:[#allocation2 + $0xe8] sm:$0xff] }
   0xf   :  { %v8015_v4 = vand.u32 4294901760, %v43_v1  ;;  %v41_v8 = vld [vmem:[#allocation2 + $0x68] sm:$0xff]  ;;  %v8019_v9 = vand.u32 4294901760, %v42_v6  ;;  %v8021_v10 = vand.u32 4294901760, %v57_v7  ;;  %v56_v12 = vld [vmem:[#allocation2 + $0xe0] sm:$0xff]  ;;  %v55_v14 = vld [vmem:[#allocation2 + $0xd8] sm:$0xff] }
  0x10   :  { %v8023_v11 = vand.u32 4294901760, %v41_v8  ;;  %v40_v13 = vld [vmem:[#allocation2 + $0x60] sm:$0xff]  ;;  %5566 = vmatprep.subr.mxu0 %v8013_v3  ;;  %v8026_v15 = vand.u32 4294901760, %v56_v12  ;;  %v8030_v17 = vand.u32 4294901760, %v55_v14  ;;  %v8033_v18 = vsub.f32 %v59_v0, %v8013_v3  ;;  %v8035_v19 = vld [vmem:[#allocation2 + $0x58] sm:$0xff]  ;;  %v8037_v20 = vld [vmem:[#allocation2 + $0xd0] sm:$0xff] }
  0x11   :  { %v8028_v16 = vand.u32 4294901760, %v40_v13  ;;  %v8039_v21 = vld [vmem:[#allocation2 + $0x50] sm:$0xff]  ;;  %5567 = vmatpush3.msra.mxu0 %v8015_v4  ;;  %v8043_v22 = vand.u32 4294901760, %v8035_v19  ;;  %v8046_v23 = vsub.f32 %v43_v1, %v8015_v4  ;;  %v8049_v24 = vand.u32 4294901760, %v8037_v20  ;;  %v8054_v26 = vld [vmem:[#allocation2 + $0xc8] sm:$0xff]  ;;  %v8058_v28 = vld [vmem:[#allocation2 + $0xc0] sm:$0xff] }
  0x12   :  { %v8052_v25 = vsub.f32 %v58_v2, %v8017_v5  ;;  %v8056_v27 = vld [vmem:[#allocation2 + $0x48] sm:$0xff]  ;;  %5568 = vmatprep.subr.mxu0 %v8017_v5  ;;  %v11179_v29 = vand.u32 4294901760, %v8033_v18  ;;  %v8063_v30 = vand.u32 4294901760, %v8039_v21  ;;  %v8066_v31 = vsub.f32 %v42_v6, %v8019_v9  ;;  %v8080_v37 = vld [vmem:[#allocation2 + $0x40] sm:$0xff]  ;;  %v8104_v46 = vld [vmem:[#allocation2 + $0xb8] sm:$0xff] }
  0x13   :  { %v8069_v32 = vand.u32 4294901760, %v8054_v26  ;;  %5569 = vmatpush3.msra.mxu0 %v8019_v9  ;;  %v11177_v33 = vand.u32 4294901760, %v8046_v23  ;;  %v8075_v35 = vsub.f32 %v57_v7, %v8021_v10  ;;  %v8078_v36 = vand.u32 4294901760, %v8056_v27  ;;  %v8114_v51 = vld [vmem:[#allocation2 + $0x38] sm:$0xff]  ;;  %v8121_v56 = vld [vmem:[#allocation2 + $0xb0] sm:$0xff]  ;;  %v8145_v2 = vld [vmem:[#allocation2 + $0xa8] sm:$0xff] }
  0x14   :  { %11286 = vst [vmem:[#allocation5_spill] sm:$0xff] %v8063_v30  ;;  %v11176_v34 = vand.u32 4294901760, %v8052_v25  ;;  %5570 = vmatprep.subr.mxu0 %v8021_v10  ;;  %v292_v38 = vsub.f32 %v8033_v18, %v11179_v29  ;;  %v11174_v39 = vand.u32 4294901760, %v8066_v31  ;;  %v8088_v40 = vsub.f32 %v41_v8, %v8023_v11  ;;  %v8133_v61 = vld [vmem:[#allocation2 + $0x30] sm:$0xff] }
  0x15   :  { %11287 = vst [vmem:[#allocation6_spill] sm:$0xff] %v8069_v32  ;;  %11288 = vst [vmem:[#allocation7_spill] sm:$0xff] %v8078_v36  ;;  %v8091_v41 = vand.u32 4294901760, %v8058_v28  ;;  %5571 = vmatpush3.msra.mxu0 %v8023_v11  ;;  %v180_v42 = vsub.f32 %v8046_v23, %v11177_v33  ;;  %v11172_v44 = vand.u32 4294901760, %v8075_v35  ;;  %v8102_v45 = vsub.f32 %v56_v12, %v8026_v15 }
  0x16   :  { %v299_v43 = vsub.f32 %v8052_v25, %v11176_v34  ;;  %5572 = vmatprep.subr.mxu0 %v8026_v15  ;;  %v293_v47 = vand.u32 4294901760, %v292_v38  ;;  %v187_v48 = vsub.f32 %v8066_v31, %v11174_v39  ;;  %v11171_v49 = vand.u32 4294901760, %v8088_v40  ;;  %v8236_v39 = vld [vmem:[#allocation2 + $0x90] sm:$0xff] }
  0x17   :  { %11289 = vst [vmem:[#allocation8_spill] sm:$0xff] %v8091_v41  ;;  %v8112_v50 = vand.u32 4294901760, %v8080_v37  ;;  %5573 = vmatpush3.msra.mxu0 %v8028_v16  ;;  %v181_v52 = vand.u32 4294901760, %v180_v42  ;;  %v306_v54 = vsub.f32 %v8075_v35, %v11172_v44  ;;  %v11169_v55 = vand.u32 4294901760, %v8102_v45  ;;  %v8246_v34 = vld [vmem:[#allocation2 + $0x10] sm:$0xff] }
  0x18   :  { %v300_v53 = vand.u32 4294901760, %v299_v43  ;;  %5574 = vmatprep.subr.mxu0 %v8030_v17  ;;  %5601 = vmatprep.subr.mxu1 %v293_v47  ;;  %v188_v57 = vand.u32 4294901760, %v187_v48  ;;  %v194_v58 = vsub.f32 %v8088_v40, %v11171_v49  ;;  %v8128_v59 = vsub.f32 %v40_v13, %v8028_v16  ;;  %v8156_v13 = vld [vmem:[#allocation2 + $0x28] sm:$0xff]  ;;  %v8223_v49 = vld [vmem:[#allocation2 + $0x18] sm:$0xff] }
  0x19   :  { %11290 = vst [vmem:[#allocation9_spill] sm:$0xff] %v8112_v50  ;;  %v8131_v60 = vand.u32 4294901760, %v8104_v46  ;;  %5575 = vmatpush3.msra.mxu0 %v8043_v22  ;;  %5602 = vmatpush3.msra.mxu1 %v181_v52  ;;  %v307_v62 = vand.u32 4294901760, %v306_v54  ;;  %v313_v63 = vsub.f32 %v8102_v45, %v11169_v55  ;;  %v8140_v0 = vsub.f32 %v55_v14, %v8030_v17 }
  0x1a   :  { %v8143_v1 = vand.u32 4294901760, %v8114_v51  ;;  %5576 = vmatprep.subr.mxu0 %v8049_v24  ;;  %5603 = vmatprep.subr.mxu1 %v300_v53  ;;  %v195_v6 = vand.u32 4294901760, %v194_v58  ;;  %v11167_v7 = vand.u32 4294901760, %v8128_v59  ;;  %v8151_v8 = vsub.f32 %v8035_v19, %v8043_v22 }
  0x1b   :  { %11291 = vst [vmem:[#allocation10_spill] sm:$0xff] %v8131_v60  ;;  %v8154_v12 = vand.u32 4294901760, %v8121_v56  ;;  %5577 = vmatpush3.msra.mxu0 %v8063_v30  ;;  %5604 = vmatpush3.msra.mxu1 %v188_v57  ;;  %v314_v14 = vand.u32 4294901760, %v313_v63  ;;  %v11166_v38 = vand.u32 4294901760, %v8140_v0  ;;  %v8162_v42 = vsub.f32 %v8037_v20, %v8049_v24  ;;  %v8179_v20 = vld [vmem:[#allocation2 + $0xa0] sm:$0xff] }
  0x1c   :  { %11292 = vst [vmem:[#allocation11_spill] sm:$0xff] %v8143_v1  ;;  %v8165_v43 = vand.u32 4294901760, %v8133_v61  ;;  %5578 = vmatprep.subr.mxu0 %v8069_v32  ;;  %5605 = vmatprep.subr.mxu1 %v307_v62  ;;  %v201_v19 = vsub.f32 %v8128_v59, %v11167_v7  ;;  %v11168_v47 = vand.u32 4294901760, %v8151_v8  ;;  %v8174_v48 = vsub.f32 %v8039_v21, %v8063_v30 }
  0x1d   :  { %11293 = vst [vmem:[#allocation12_spill] sm:$0xff] %v8154_v12  ;;  %v8177_v52 = vand.u32 4294901760, %v8145_v2  ;;  %5579 = vmatpush3.msra.mxu0 %v8078_v36  ;;  %5606 = vmatpush3.msra.mxu1 %v195_v6  ;;  %v320_v53 = vsub.f32 %v8140_v0, %v11166_v38  ;;  %v11170_v54 = vand.u32 4294901760, %v8162_v42  ;;  %v8188_v57 = vsub.f32 %v8054_v26, %v8069_v32  ;;  %v8202_v38 = vld [vmem:[#allocation2 + $0x20] sm:$0xff] }
  0x1e   :  { %11294 = vst [vmem:[#allocation13_spill] sm:$0xff] %v8165_v43  ;;  %v8191_v21 = vand.u32 4294901760, %v8156_v13  ;;  %5580 = vmatprep.subr.mxu0 %v8091_v41  ;;  %5607 = vmatprep.subr.mxu1 %v314_v14  ;;  %v202_v58 = vand.u32 4294901760, %v201_v19  ;;  %v208_v62 = vsub.f32 %v8151_v8, %v11168_v47  ;;  %v11173_v63 = vand.u32 4294901760, %v8174_v48  ;;  %v8212_v47 = vld [vmem:[#allocation2 + $0x98] sm:$0xff] }
  0x1f   :  { %11295 = vst [vmem:[#allocation14_spill] sm:$0xff] %v8177_v52  ;;  %v8200_v6 = vsub.f32 %v8056_v27, %v8078_v36  ;;  %5581 = vmatpush3.msra.mxu0 %v8112_v50  ;;  %v321_v26 = vand.u32 4294901760, %v320_v53  ;;  %v327_v14 = vsub.f32 %v8162_v42, %v11170_v54  ;;  %v11175_v19 = vand.u32 4294901760, %v8188_v57 }
  0x20   :  { %11296 = vst [vmem:[#allocation15_spill] sm:$0xff] %v8191_v21  ;;  %v8210_v7 = vand.u32 4294901760, %v8179_v20  ;;  %5608 = vmatpush3.msra.mxu1 %v202_v58  ;;  %5582 = vmatprep.subr.mxu0 %v8131_v60  ;;  %v209_v27 = vand.u32 4294901760, %v208_v62  ;;  %v215_v55 = vsub.f32 %v8174_v48, %v11173_v63  ;;  %v8221_v54 = vsub.f32 %v8058_v28, %v8091_v41 }
  0x21   :  { %v11178_v53 = vand.u32 4294901760, %v8200_v6  ;;  %5609 = vmatprep.subr.mxu1 %v321_v26  ;;  %5583 = vmatpush3.msra.mxu0 %v8143_v1  ;;  %v328_v44 = vand.u32 4294901760, %v327_v14  ;;  %v334_v58 = vsub.f32 %v8188_v57, %v11175_v19  ;;  %v8230_v62 = vand.u32 4294901760, %v8202_v38 }
  0x22   :  { %11297 = vst [vmem:[#allocation16_spill] sm:$0xff] %v8210_v7  ;;  %v8234_v63 = vsub.f32 %v8080_v37, %v8112_v50  ;;  %5610 = vmatpush3.msra.mxu1 %v209_v27  ;;  %5584 = vmatprep.subr.mxu0 %v8154_v12  ;;  %v216_v28 = vand.u32 4294901760, %v215_v55  ;;  %v11182_v14 = vand.u32 4294901760, %v8221_v54  ;;  %v8244_v19 = vand.u32 4294901760, %v8212_v47 }
  0x23   :  { %11298 = vst [vmem:[#allocation17_spill] sm:$0xff] %v8230_v62  ;;  %v222_v26 = vsub.f32 %v8200_v6, %v11178_v53  ;;  %5611 = vmatprep.subr.mxu1 %v328_v44  ;;  %5585 = vmatpush3.msra.mxu0 %v8165_v43  ;;  %v335_v37 = vand.u32 4294901760, %v334_v58  ;;  %v8252_v55 = vsub.f32 %v8104_v46, %v8131_v60  ;;  %v8255_v33 = vand.u32 4294901760, %v8223_v49  ;;  %v8257_v53 = vld [vmem:[#allocation2 + $0x88] sm:$0xff] }
  0x24   :  { %v11185_v27 = vand.u32 4294901760, %v8234_v63  ;;  %5612 = vmatpush3.msra.mxu1 %v216_v28  ;;  %5586 = vmatprep.subr.mxu0 %v8177_v52  ;;  %v341_v44 = vsub.f32 %v8221_v54, %v11182_v14  ;;  %v8265_v58 = vsub.f32 %v8114_v51, %v8143_v1  ;;  %v8268_v46 = vand.u32 4294901760, %v8236_v39  ;;  %v8282_v51 = vld [vmem:[#allocation2 + $0x8] sm:$0xff] }
  0x25   :  { %11299 = vst [vmem:[#allocation18_spill] sm:$0xff] %v8255_v33  ;;  %v223_v29 = vand.u32 4294901760, %v222_v26  ;;  %5613 = vmatprep.subr.mxu1 %v335_v37  ;;  %5587 = vmatpush3.msra.mxu0 %v8191_v21  ;;  %v8277_v60 = vsub.f32 %v8121_v56, %v8154_v12  ;;  %v8280_v14 = vand.u32 4294901760, %v8246_v34  ;;  %v8291_v26 = vand.u32 4294901760, %v8257_v53  ;;  %v8293_v56 = vld [vmem:[#allocation2 + $0x80] sm:$0xff] }
  0x26   :  { %11300 = vst [vmem:[#allocation19_spill] sm:$0xff] %v8268_v46  ;;  %v229_v28 = vsub.f32 %v8234_v63, %v11185_v27  ;;  %5588 = vmatprep.subr.mxu0 %v8210_v7  ;;  %v342_v37 = vand.u32 4294901760, %v341_v44  ;;  %v8288_v27 = vsub.f32 %v8133_v61, %v8165_v43  ;;  %v11304_v50 = vand.u32 4294901760, %v8252_v55  ;;  %v8316_v44 = vld [vmem:[#allocation2] sm:$0xff] }
  0x27   :  { %11301 = vst [vmem:[#allocation20_spill] sm:$0xff] %v8280_v14  ;;  %5614 = vmatpush3.msra.mxu1 %v223_v29  ;;  %11303 = vst [vmem:[#allocation22_spill] sm:$0xff] %v8291_v26  ;;  %5589 = vmatpush3.msra.mxu0 %v8230_v62  ;;  %v8302_v1 = vsub.f32 %v8145_v2, %v8177_v52  ;;  %v11306_v61 = vand.u32 4294901760, %v8265_v58  ;;  %v8324_v41 = vand.u32 4294901760, %v8293_v56 }
  0x28   :  { %11302 = vst [vmem:[#allocation21_spill] sm:$0xff] %v8288_v27  ;;  %v230_v12 = vand.u32 4294901760, %v229_v28  ;;  %v348_v29 = vsub.f32 %v8252_v55, %v11304_v50  ;;  %5615 = vmatprep.subr.mxu1 %v342_v37  ;;  %5590 = vmatprep.subr.mxu0 %v8244_v19  ;;  %v8310_v28 = vand.u32 4294901760, %v8282_v51  ;;  %v8314_v50 = vsub.f32 %v8156_v13, %v8191_v21  ;;  %v26_v13 = vld [vmem:[%s11163_s0 + $0x8] sm:$0xff] }
  0x29   :  { %11305 = vst [vmem:[#allocation23_spill] sm:$0xff] %v8302_v1  ;;  %v236_v43 = vsub.f32 %v8265_v58, %v11306_v61  ;;  %5591 = vmatpush3.msra.mxu0 %v8255_v33  ;;  %v11307_v37 = vand.u32 4294901760, %v8277_v60  ;;  %v25_v61 = vld [vmem:[%s11163_s0] sm:$0xff]  ;;  %v8350_v36 = vsub.f32 %v8202_v38, %v8230_v62  ;;  %v8363_v38 = vsub.f32 %v8212_v47, %v8244_v19 }
  0x2a   :  { %5616 = vmatpush3.msra.mxu1 %v230_v12  ;;  %v349_v2 = vand.u32 4294901760, %v348_v29  ;;  %5592 = vmatprep.subr.mxu0 %v8268_v46  ;;  %v11308_v12 = vand.u32 4294901760, %v8288_v27 }
  0x2b   :  { %v355_v52 = vsub.f32 %v8277_v60, %v11307_v37  ;;  %v237_v21 = vand.u32 4294901760, %v236_v43  ;;  %v8336_v37 = vsub.f32 %v8179_v20, %v8210_v7  ;;  %5593 = vmatpush3.msra.mxu0 %v8280_v14  ;;  %v11309_v43 = vand.u32 4294901760, %v8302_v1 }
  0x2c   :  { %v243_v29 = vsub.f32 %v8288_v27, %v11308_v12  ;;  %5617 = vmatprep.subr.mxu1 %v349_v2  ;;  %v8346_v12 = vand.u32 4294901760, %v8316_v44  ;;  %5594 = vmatprep.subr.mxu0 %v8291_v26  ;;  %v11310_v2 = vand.u32 4294901760, %v8314_v50  ;;  %v8357_v27 = vand.u32 4294901760, %v26_v13 }
  0x2d   :  { %v356_v32 = vand.u32 4294901760, %v355_v52  ;;  %v362_v30 = vsub.f32 %v8302_v1, %v11309_v43  ;;  %5618 = vmatpush3.msra.mxu1 %v237_v21  ;;  %v11210_v7 = vand.u32 4294901760, %v8336_v37  ;;  %5595 = vmatpush3.msra.mxu0 %v8310_v28  ;;  %v11211_v1 = vand.u32 4294901760, %v8350_v36 }
  0x2e   :  { %v244_v20 = vand.u32 4294901760, %v243_v29  ;;  %v250_v52 = vsub.f32 %v8314_v50, %v11310_v2  ;;  %11311 = vst [vmem:[#allocation24_spill] sm:$0xff] %v8357_v27  ;;  %v8365_v21 = vand.u32 4294901760, %v25_v61  ;;  %5596 = vmatprep.subr.mxu0 %v8324_v41  ;;  %401 = vmatprep.mubr.f32.mxu1 %v8357_v27 }
  0x2f   :  { %5619 = vmatprep.subr.mxu1 %v356_v32  ;;  %v363_v43 = vand.u32 4294901760, %v362_v30  ;;  %v369_v2 = vsub.f32 %v8336_v37, %v11210_v7  ;;  %v8372_v30 = vsub.f32 %v26_v13, %v8357_v27  ;;  %v8376_v32 = vsub.f32 %v8223_v49, %v8255_v33  ;;  %5597 = vmatpush3.msra.mxu0 %v8346_v12 }
  0x30   :  { %11312 = vst [vmem:[#allocation25_spill] sm:$0xff] %v8365_v21  ;;  %5620 = vmatpush3.msra.mxu1 %v244_v20  ;;  %v251_v29 = vand.u32 4294901760, %v250_v52  ;;  %v257_v47 = vsub.f32 %v8350_v36, %v11211_v1  ;;  %v8384_v52 = vsub.f32 %v25_v61, %v8365_v21  ;;  %v8388_v13 = vsub.f32 %v8236_v39, %v8268_v46 }
  0x31   :  { %5621 = vmatprep.subr.mxu1 %v363_v43  ;;  %v370_v7 = vand.u32 4294901760, %v369_v2  ;;  %v11216_v49 = vand.u32 4294901760, %v8372_v30  ;;  %5636 = vmatprep.subr.mxu0 %v8033_v18  ;;  %v11219_v43 = vand.u32 4294901760, %v8376_v32  ;;  %v8395_v1 = vsub.f32 %v8246_v34, %v8280_v14 }
  0x32   :  { %5622 = vmatpush3.msra.mxu1 %v251_v29  ;;  %v258_v20 = vand.u32 4294901760, %v257_v47  ;;  %v11313_v61 = vand.u32 4294901760, %v8363_v38  ;;  %v11314_v29 = vand.u32 4294901760, %v8384_v52  ;;  %v11315_v27 = vand.u32 4294901760, %v8388_v13 }
  0x33   :  { %5623 = vmatprep.subr.mxu1 %v370_v7  ;;  %v163_v2 = vsub.f32 %v8372_v30, %v11216_v49  ;;  %v264_v34 = vsub.f32 %v8376_v32, %v11219_v43  ;;  %v8422_v14 = vsub.f32 %v8282_v51, %v8310_v28  ;;  %v11317_v46 = vand.u32 4294901760, %v8395_v1 }
  0x34   :  { %v376_v33 = vsub.f32 %v8363_v38, %v11313_v61  ;;  %v8412_v61 = vsub.f32 %v8257_v53, %v8291_v26  ;;  %5624 = vmatpush3.msra.mxu1 %v258_v20  ;;  %v169_v7 = vsub.f32 %v8384_v52, %v11314_v29  ;;  %v383_v49 = vsub.f32 %v8388_v13, %v11315_v27 }
  0x35   :  { %11316 = vst [vmem:[#allocation26_spill] sm:$0xff] %v8422_v14  ;;  %v164_v43 = vand.u32 4294901760, %v163_v2  ;;  %v265_v47 = vand.u32 4294901760, %v264_v34  ;;  %v271_v53 = vsub.f32 %v8395_v1, %v11317_v46  ;;  %v11226_v29 = vand.u32 4294901760, %v8422_v14 }
  0x36   :  { %v377_v39 = vand.u32 4294901760, %v376_v33  ;;  %v11227_v33 = vand.u32 4294901760, %v8412_v61  ;;  %v170_v20 = vand.u32 4294901760, %v169_v7  ;;  %v384_v26 = vand.u32 4294901760, %v383_v49 }
  0x37   :  { %v8431_v27 = vsub.f32 %v8293_v56, %v8324_v41  ;;  %165 = vmatprep.mubr.f32.mxu0 %v164_v43  ;;  %v272_v51 = vand.u32 4294901760, %v271_v53  ;;  %v8438_v46 = vsub.f32 %v8316_v44, %v8346_v12  ;;  %v278_v49 = vsub.f32 %v8422_v14, %v11226_v29  ;;  %v11320_v53 = vld [vmem:[#allocation21_spill] sm:$0xff]  ;;  %v11333_v29 = vld [vmem:[#allocation16_spill] sm:$0xff] }
  0x38   :  { %5625 = vmatprep.subr.mxu1 %v377_v39  ;;  %v390_v2 = vsub.f32 %v8412_v61, %v11227_v33  ;;  %171 = vmatmul.mubr.f32.vlgmr.msra.gmra.mxu0 %v170_v20  ;;  %v11321_v20 = vld [vmem:[#allocation5_spill] sm:$0xff]  ;;  %v11334_v33 = vand.u32 4294901760, %v8033_v18  ;;  %v11342_v18 = vand.u32 4294901760, %v8075_v35 }
  0x39   :  { %11318 = vst [vmem:[#allocation27_spill] sm:$0xff] %v8431_v27  ;;  %5626 = vmatpush3.msra.mxu1 %v265_v47  ;;  %11319 = vst [vmem:[#allocation28_spill] sm:$0xff] %v8438_v46  ;;  %v11225_v56 = vand.u32 4294901760, %v8431_v27  ;;  %5637 = vmatpush3.msra.mxu0 %v8046_v23  ;;  %v11224_v39 = vand.u32 4294901760, %v8438_v46  ;;  %v279_v34 = vand.u32 4294901760, %v278_v49  ;;  %v11324_v49 = vld [vmem:[#allocation7_spill] sm:$0xff] }
  0x3a   :  { %5627 = vmatprep.subr.mxu1 %v384_v26  ;;  %v391_v43 = vand.u32 4294901760, %v390_v2  ;;  %5638 = vmatprep.subr.mxu0 %v8052_v25  ;;  %v11323_v2 = vld [vmem:[#allocation6_spill] sm:$0xff] }
  0x3b   :  { %5628 = vmatpush3.msra.mxu1 %v272_v51  ;;  %v397_v44 = vsub.f32 %v8431_v27, %v11225_v56  ;;  %538 = vmatprep.mubr.f32.mxu0 %v8372_v30  ;;  %v285_v26 = vsub.f32 %v8438_v46, %v11224_v39  ;;  %v11322_v51 = vld [vmem:[#allocation23_spill] sm:$0xff]  ;;  %v11331_v39 = vld [vmem:[#allocation14_spill] sm:$0xff] }
  0x3c   :  { %5639 = vmatpush3.msra.mxu0 %v8066_v31  ;;  %5629 = vmatprep.subr.mxu1 %v391_v43  ;;  %v11325_v43 = vld [vmem:[#allocation8_spill] sm:$0xff]  ;;  %v11332_v56 = vld [vmem:[#allocation15_spill] sm:$0xff] }
  0x3d   :  { %5640 = vmatprep.subr.mxu0 %v8075_v35  ;;  %5630 = vmatpush3.msra.mxu1 %v279_v34  ;;  %v398_v47 = vand.u32 4294901760, %v397_v44  ;;  %v286_v7 = vand.u32 4294901760, %v285_v26  ;;  %v11326_v34 = vld [vmem:[#allocation9_spill] sm:$0xff]  ;;  %v11327_v44 = vld [vmem:[#allocation10_spill] sm:$0xff]  ;;  %v11328_v26 = vld [vmem:[#allocation11_spill] sm:$0xff]  ;;  %v11347_v35 = vand.u32 4294901760, %v8384_v52 }
  0x3e   :  { %5641 = vmatpush3.msra.mxu0 %v8088_v40 }
  0x3f   :  { %5631 = vmatprep.subr.mxu1 %v398_v47  ;;  %5642 = vmatprep.subr.mxu0 %v8102_v45  ;;  %v11329_v47 = vld [vmem:[#allocation12_spill] sm:$0xff] }
  0x40   :  { %5632 = vmatpush3.msra.mxu1 %v286_v7  ;;  %5643 = vmatpush3.msra.mxu0 %v8128_v59  ;;  %v11330_v7 = vld [vmem:[#allocation13_spill] sm:$0xff] }
  0x41   :  { %403 = vmatmul.mubr.f32.vlgmr.msra.gmra.mxu1 %v8365_v21  ;;  %5644 = vmatprep.subr.mxu0 %v8140_v0  ;;  %v11335_v21 = vld [vmem:[#allocation18_spill] sm:$0xff] }
  0x42   :  { %5671 = vmatprep.subr.mxu1 %v8013_v3  ;;  %5645 = vmatpush3.msra.mxu0 %v8151_v8 }
  0x43   :  { %5672 = vmatpush3.msra.mxu1 %v8015_v4  ;;  %5646 = vmatprep.subr.mxu0 %v8162_v42 }
  0x44   :  { %5673 = vmatprep.subr.mxu1 %v8017_v5  ;;  %5647 = vmatpush3.msra.mxu0 %v8174_v48 }
  0x45   :  { %5674 = vmatpush3.msra.mxu1 %v8019_v9  ;;  %5648 = vmatprep.subr.mxu0 %v8188_v57 }
  0x46   :  { %5675 = vmatprep.subr.mxu1 %v8021_v10  ;;  %5649 = vmatpush3.msra.mxu0 %v8200_v6 }
  0x47   :  { %5676 = vmatpush3.msra.mxu1 %v8023_v11  ;;  %5650 = vmatprep.subr.mxu0 %v8221_v54 }
  0x48   :  { %5677 = vmatprep.subr.mxu1 %v8026_v15  ;;  %5651 = vmatpush3.msra.mxu0 %v8234_v63 }
  0x49   :  { %5678 = vmatpush3.msra.mxu1 %v8028_v16  ;;  %5652 = vmatprep.subr.mxu0 %v8252_v55 }
  0x4a   :  { %5679 = vmatprep.subr.mxu1 %v8030_v17  ;;  %5653 = vmatpush3.msra.mxu0 %v8265_v58 }
  0x4b   :  { %5680 = vmatpush3.msra.mxu1 %v8043_v22  ;;  %5654 = vmatprep.subr.mxu0 %v8277_v60 }
  0x4c   :  { %5681 = vmatprep.subr.mxu1 %v8049_v24  ;;  %5655 = vmatpush3.msra.mxu0 %v11320_v53 }
  0x4d   :  { %5682 = vmatpush3.msra.mxu1 %v11321_v20  ;;  %5656 = vmatprep.subr.mxu0 %v11322_v51 }
  0x4e   :  { %5683 = vmatprep.subr.mxu1 %v11323_v2  ;;  %5657 = vmatpush3.msra.mxu0 %v8314_v50 }
  0x4f   :  { %5684 = vmatpush3.msra.mxu1 %v11324_v49  ;;  %5658 = vmatprep.subr.mxu0 %v8336_v37 }
  0x50   :  { %5685 = vmatprep.subr.mxu1 %v11325_v43  ;;  %5659 = vmatpush3.msra.mxu0 %v8350_v36 }
  0x51   :  { %5686 = vmatpush3.msra.mxu1 %v11326_v34  ;;  %5660 = vmatprep.subr.mxu0 %v8363_v38 }
  0x52   :  { %5687 = vmatprep.subr.mxu1 %v11327_v44  ;;  %5661 = vmatpush3.msra.mxu0 %v8376_v32 }
  0x53   :  { %5688 = vmatpush3.msra.mxu1 %v11328_v26  ;;  %5662 = vmatprep.subr.mxu0 %v8388_v13 }
  0x54   :  { %5689 = vmatprep.subr.mxu1 %v11329_v47  ;;  %5663 = vmatpush3.msra.mxu0 %v8395_v1 }
  0x55   :  { %5690 = vmatpush3.msra.mxu1 %v11330_v7  ;;  %5664 = vmatprep.subr.mxu0 %v8412_v61 }
  0x56   :  { %5691 = vmatprep.subr.mxu1 %v11331_v39  ;;  %5665 = vmatpush3.msra.mxu0 %v8422_v14  ;;  %v11336_v14 = vand.u32 4294901760, %v8046_v23  ;;  %v11343_v23 = vand.u32 4294901760, %v8088_v40  ;;  %v11349_v40 = vand.u32 4294901760, %v8151_v8  ;;  %v11365_v8 = vand.u32 4294901760, %v8376_v32  ;;  %v942_v32 = vld [vmem:[#allocation2 + $0x178] sm:$0xff] }
  0x57   :  { %5692 = vmatpush3.msra.mxu1 %v11332_v56  ;;  %5666 = vmatprep.subr.mxu0 %v8431_v27  ;;  %v11337_v56 = vld [vmem:[#allocation19_spill] sm:$0xff]  ;;  %v11341_v27 = vld [vmem:[#allocation22_spill] sm:$0xff] }
  0x58   :  { %5693 = vmatprep.subr.mxu1 %v11333_v29  ;;  %5667 = vmatpush3.msra.mxu0 %v8438_v46  ;;  %v11338_v29 = vand.u32 4294901760, %v8052_v25  ;;  %v11339_v46 = vld [vmem:[#allocation20_spill] sm:$0xff]  ;;  %v11344_v25 = vand.u32 4294901760, %v8102_v45  ;;  %v11350_v45 = vand.u32 4294901760, %v8162_v42  ;;  %v11366_v42 = vand.u32 4294901760, %v8388_v13 }
  0x59   :  { %5694 = vmatpush3.msra.mxu1 %v8230_v62  ;;  %541 = vmatmul.mubr.f32.vlgmr.msra.gmra.mxu0 %v8384_v52  ;;  %v11340_v62 = vand.u32 4294901760, %v8066_v31  ;;  %v11345_v31 = vand.u32 4294901760, %v8372_v30  ;;  %v11379_v30 = vld [vmem:[#allocation25_spill] sm:$0xff]  ;;  %v941_v52 = vld [vmem:[#allocation2 + $0x170] sm:$0xff] }
  0x5a   :  { %5695 = vmatprep.subr.mxu1 %v8244_v19  ;;  %5706 = vmatprep.subr.mxu0 %v11334_v33  ;;  %v8626_v13 = vand.u32 4294901760, %v941_v52  ;;  %v939_v33 = vld [vmem:[#allocation2 + $0x160] sm:$0xff] }
  0x5b   :  { %5696 = vmatpush3.msra.mxu1 %v11335_v21  ;;  %5707 = vmatpush3.msra.mxu0 %v11336_v14  ;;  %v11348_v14 = vand.u32 4294901760, %v8140_v0  ;;  %v11352_v0 = vand.u32 4294901760, %v8188_v57 }
  0x5c   :  { %5697 = vmatprep.subr.mxu1 %v11337_v56  ;;  %5708 = vmatprep.subr.mxu0 %v11338_v29  ;;  %v938_v29 = vld [vmem:[#allocation2 + $0x158] sm:$0xff] }
  0x5d   :  { %5698 = vmatpush3.msra.mxu1 %v11339_v46  ;;  %5709 = vmatpush3.msra.mxu0 %v11340_v62  ;;  %v11346_v62 = vand.u32 4294901760, %v8128_v59  ;;  %v11351_v59 = vand.u32 4294901760, %v8174_v48  ;;  %v11368_v48 = vand.u32 4294901760, %v8412_v61  ;;  %v940_v61 = vld [vmem:[#allocation2 + $0x168] sm:$0xff] }
  0x5e   :  { %5699 = vmatprep.subr.mxu1 %v11341_v27  ;;  %5710 = vmatprep.subr.mxu0 %v11342_v18 }
  0x5f   :  { %5700 = vmatpush3.msra.mxu1 %v8310_v28  ;;  %5711 = vmatpush3.msra.mxu0 %v11343_v23 }
  0x60   :  { %5701 = vmatprep.subr.mxu1 %v8324_v41  ;;  %5712 = vmatprep.subr.mxu0 %v11344_v25 }
  0x61   :  { %5702 = vmatpush3.msra.mxu1 %v8346_v12  ;;  %645 = vmatprep.mubr.f32.mxu1 %v11345_v31 }
  0x62   :  { %5713 = vmatpush3.msra.mxu0 %v11346_v62  ;;  %649 = vmatmul.mubr.f32.vlgmr.msra.gmra.mxu1 %v11347_v35 }
  0x63   :  { %5714 = vmatprep.subr.mxu0 %v11348_v14  ;;  %5741 = vmatprep.subr.mxu1 %v8013_v3  ;;  %v11353_v3 = vand.u32 4294901760, %v8200_v6  ;;  %v11372_v6 = vld [vmem:[#allocation27_spill] sm:$0xff] }
  0x64   :  { %5715 = vmatpush3.msra.mxu0 %v11349_v40  ;;  %5742 = vmatpush3.msra.mxu1 %v8015_v4  ;;  %v11354_v4 = vand.u32 4294901760, %v8221_v54  ;;  %v11369_v54 = vld [vmem:[#allocation26_spill] sm:$0xff] }
  0x65   :  { %5716 = vmatprep.subr.mxu0 %v11350_v45  ;;  %5743 = vmatprep.subr.mxu1 %v8017_v5  ;;  %v11355_v5 = vand.u32 4294901760, %v8234_v63  ;;  %v11370_v57 = vand.u32 4294901760, %v11369_v54  ;;  %v11371_v63 = vld [vmem:[#allocation15_spill] sm:$0xff] }
  0x66   :  { %5717 = vmatpush3.msra.mxu0 %v11351_v59  ;;  %5744 = vmatpush3.msra.mxu1 %v8019_v9  ;;  %v11356_v9 = vand.u32 4294901760, %v8252_v55  ;;  %v11373_v55 = vand.u32 4294901760, %v11372_v6 }
  0x67   :  { %5718 = vmatprep.subr.mxu0 %v11352_v0  ;;  %5745 = vmatprep.subr.mxu1 %v8021_v10  ;;  %v11357_v10 = vand.u32 4294901760, %v8265_v58  ;;  %v11374_v58 = vld [vmem:[#allocation16_spill] sm:$0xff] }
  0x68   :  { %5719 = vmatpush3.msra.mxu0 %v11353_v3  ;;  %5746 = vmatpush3.msra.mxu1 %v8023_v11  ;;  %v11358_v11 = vand.u32 4294901760, %v8277_v60  ;;  %v11364_v60 = vand.u32 4294901760, %v8363_v38  ;;  %v11378_v38 = vld [vmem:[#allocation17_spill] sm:$0xff] }
  0x69   :  { %5720 = vmatprep.subr.mxu0 %v11354_v4  ;;  %5747 = vmatprep.subr.mxu1 %v8026_v15  ;;  %v11359_v15 = vand.u32 4294901760, %v11320_v53  ;;  %v8638_v53 = vsub.f32 %v941_v52, %v8626_v13 }
  0x6a   :  { %5721 = vmatpush3.msra.mxu0 %v11355_v5  ;;  %5748 = vmatpush3.msra.mxu1 %v8028_v16  ;;  %v11360_v16 = vand.u32 4294901760, %v11322_v51  ;;  %v935_v5 = vld [vmem:[#allocation2 + $0x140] sm:$0xff] }
  0x6b   :  { %5722 = vmatprep.subr.mxu0 %v11356_v9  ;;  %5749 = vmatprep.subr.mxu1 %v8030_v17  ;;  %v11361_v17 = vand.u32 4294901760, %v8314_v50  ;;  %v11375_v50 = vld [vmem:[#allocation28_spill] sm:$0xff] }
  0x6c   :  { %5723 = vmatpush3.msra.mxu0 %v11357_v10  ;;  %5750 = vmatpush3.msra.mxu1 %v8043_v22  ;;  %v11362_v22 = vand.u32 4294901760, %v8336_v37  ;;  %v11377_v37 = vld [vmem:[#allocation24_spill] sm:$0xff] }
  0x6d   :  { %5724 = vmatprep.subr.mxu0 %v11358_v11  ;;  %5751 = vmatprep.subr.mxu1 %v8049_v24  ;;  %v11363_v24 = vand.u32 4294901760, %v8350_v36  ;;  %v11367_v36 = vand.u32 4294901760, %v8395_v1  ;;  %v11376_v1 = vand.u32 4294901760, %v11375_v50  ;;  %v8698_v11 = vand.u32 4294901760, %v935_v5 }
  0x6e   :  { %5725 = vmatpush3.msra.mxu0 %v11359_v15  ;;  %5752 = vmatpush3.msra.mxu1 %v11321_v20  ;;  %v934_v15 = vld [vmem:[#allocation2 + $0x138] sm:$0xff] }
  0x6f   :  { %5726 = vmatprep.subr.mxu0 %v11360_v16  ;;  %5753 = vmatprep.subr.mxu1 %v11323_v2 }
  0x70   :  { %5727 = vmatpush3.msra.mxu0 %v11361_v17  ;;  %5754 = vmatpush3.msra.mxu1 %v11324_v49  ;;  %v8704_v17 = vsub.f32 %v935_v5, %v8698_v11  ;;  %v927_v5 = vld [vmem:[#allocation2 + $0x100] sm:$0xff] }
  0x71   :  { %5728 = vmatprep.subr.mxu0 %v11362_v22  ;;  %5755 = vmatprep.subr.mxu1 %v11325_v43  ;;  %v8706_v22 = vand.u32 4294901760, %v934_v15 }
  0x72   :  { %5729 = vmatpush3.msra.mxu0 %v11363_v24  ;;  %5756 = vmatpush3.msra.mxu1 %v11326_v34  ;;  %v933_v24 = vld [vmem:[#allocation2 + $0x130] sm:$0xff] }
  0x73   :  { %5730 = vmatprep.subr.mxu0 %v11364_v60  ;;  %5757 = vmatprep.subr.mxu1 %v11327_v44  ;;  %v1048_v44 = vand.u32 4294901760, %v8638_v53 }
  0x74   :  { %5731 = vmatpush3.msra.mxu0 %v11365_v8  ;;  %5758 = vmatpush3.msra.mxu1 %v11328_v26  ;;  %v11242_v8 = vand.u32 4294901760, %v8704_v17 }
  0x75   :  { %5732 = vmatprep.subr.mxu0 %v11366_v42  ;;  %5759 = vmatprep.subr.mxu1 %v11329_v47  ;;  %v1049_v31 = vsub.f32 %v8638_v53, %v1048_v44  ;;  %v8713_v42 = vsub.f32 %v934_v15, %v8706_v22 }
  0x76   :  { %5733 = vmatpush3.msra.mxu0 %v11367_v36  ;;  %5760 = vmatpush3.msra.mxu1 %v11330_v7  ;;  %v8715_v36 = vand.u32 4294901760, %v933_v24  ;;  %v1091_v54 = vsub.f32 %v8704_v17, %v11242_v8 }
  0x77   :  { %5734 = vmatprep.subr.mxu0 %v11368_v48  ;;  %5761 = vmatprep.subr.mxu1 %v11331_v39  ;;  %v1050_v40 = vand.u32 4294901760, %v1049_v31  ;;  %v932_v48 = vld [vmem:[#allocation2 + $0x128] sm:$0xff] }
  0x78   :  { %5735 = vmatpush3.msra.mxu0 %v11370_v57  ;;  %5762 = vmatpush3.msra.mxu1 %v11371_v63  ;;  %v11241_v57 = vand.u32 4294901760, %v8713_v42  ;;  %v8725_v63 = vsub.f32 %v933_v24, %v8715_v36  ;;  %v8727_v6 = vand.u32 4294901760, %v932_v48 }
  0x79   :  { %5736 = vmatprep.subr.mxu0 %v11373_v55  ;;  %5763 = vmatprep.subr.mxu1 %v11374_v58  ;;  %v931_v55 = vld [vmem:[#allocation2 + $0x120] sm:$0xff]  ;;  %v1092_v58 = vand.u32 4294901760, %v1091_v54 }
  0x7a   :  { %5737 = vmatpush3.msra.mxu0 %v11376_v1  ;;  %815 = vmatprep.mubr.f32.mxu0 %v11377_v37  ;;  %v1098_v50 = vsub.f32 %v8713_v42, %v11241_v57  ;;  %v11240_v1 = vand.u32 4294901760, %v8725_v63 }
  0x7b   :  { %5764 = vmatpush3.msra.mxu1 %v11378_v38  ;;  %817 = vmatmul.mubr.f32.vlgmr.msra.gmra.mxu0 %v11379_v30  ;;  %v8741_v38 = vand.u32 4294901760, %v931_v55 }
  0x7c   :  { %5765 = vmatprep.subr.mxu1 %v8244_v19  ;;  %919 = vmatprep.mubr.f32.mxu1 %v11377_v37  ;;  %v8621_v19 = vand.u32 4294901760, %v942_v32  ;;  %v8737_v37 = vsub.f32 %v932_v48, %v8727_v6  ;;  %v1105_v52 = vsub.f32 %v8725_v63, %v11240_v1 }
  0x7d   :  { %5766 = vmatpush3.msra.mxu1 %v11335_v21 }
  0x7e   :  { %5767 = vmatprep.subr.mxu1 %v11337_v56  ;;  %v8624_v21 = vsub.f32 %v942_v32, %v8621_v19  ;;  %v936_v56 = vld [vmem:[#allocation2 + $0x148] sm:$0xff]  ;;  %v1099_v32 = vand.u32 4294901760, %v1098_v50 }
  0x7f   :  { %5768 = vmatpush3.msra.mxu1 %v11339_v46  ;;  %v937_v46 = vld [vmem:[#allocation2 + $0x150] sm:$0xff]  ;;  %v8643_v51 = vand.u32 4294901760, %v936_v56 }
  0x80   :  { %5769 = vmatprep.subr.mxu1 %v11341_v27  ;;  %v7993_v27 = vmov 0.0   ;;  %v1041_v39 = vand.u32 4294901760, %v8624_v21  ;;  %v8641_v20 = vand.u32 4294901760, %v937_v46 }
  0x81   :  { %5770 = vmatpush3.msra.mxu1 %v8310_v28  ;;  %v8631_v28 = vand.u32 4294901760, %v939_v33  ;;  %6490 = vmatprep.subr.mxu0 %v7993_v27  ;;  %v8664_v47 = vsub.f32 %v936_v56, %v8643_v51  ;;  %v1106_v56 = vand.u32 4294901760, %v1105_v52 }
  0x82   :  { %5771 = vmatprep.subr.mxu1 %v8324_v41  ;;  %v8629_v41 = vand.u32 4294901760, %v940_v61  ;;  %6491 = vmatpush3.msra.mxu0 %v8621_v19  ;;  %v1042_v34 = vsub.f32 %v8624_v21, %v1041_v39  ;;  %v8661_v26 = vsub.f32 %v937_v46, %v8641_v20  ;;  %v929_v46 = vld [vmem:[#allocation2 + $0x110] sm:$0xff] }
  0x83   :  { %5772 = vmatpush3.msra.mxu1 %v8346_v12  ;;  %v8634_v12 = vand.u32 4294901760, %v938_v29  ;;  %v8649_v49 = vsub.f32 %v939_v33, %v8631_v28  ;;  %6492 = vmatprep.subr.mxu0 %v7993_v27  ;;  %v11243_v59 = vand.u32 4294901760, %v8664_v47  ;;  %v8762_v31 = vand.u32 4294901760, %v929_v46 }
  0x84   :  { %921 = vmatmul.mubr.f32.vlgmr.msra.gmra.mxu1 %v11379_v30  ;;  %6525 = vmatprep.subr.mxu1 %v7993_v27  ;;  %v8646_v2 = vsub.f32 %v940_v61, %v8629_v41  ;;  %v1043_v25 = vand.u32 4294901760, %v1042_v34  ;;  %v11244_v62 = vand.u32 4294901760, %v8661_v26  ;;  %v930_v30 = vld [vmem:[#allocation2 + $0x118] sm:$0xff]  ;;  %v11239_v61 = vand.u32 4294901760, %v8737_v37 }
  0x85   :  { %v8652_v43 = vsub.f32 %v938_v29, %v8634_v12  ;;  %6493 = vmatpush3.msra.mxu0 %v8626_v13  ;;  %v11246_v18 = vand.u32 4294901760, %v8649_v49  ;;  %v1084_v10 = vsub.f32 %v8664_v47, %v11243_v59  ;;  %v8748_v33 = vand.u32 4294901760, %v930_v30  ;;  %6557 = vmatprep.mubr.msk.f32.mxu1 %vm7994_vm0, %v7993_v27 }
  0x86   :  { %v1055_v7 = vand.u32 4294901760, %v8646_v2  ;;  %6494 = vmatprep.subr.mxu0 %v7993_v27  ;;  %6526 = vmatpush3.msra.mxu1 %v1043_v25  ;;  %v1077_v4 = vsub.f32 %v8661_v26, %v11244_v62  ;;  %v8753_v29 = vsub.f32 %v931_v55, %v8741_v38  ;;  %v1112_v34 = vsub.f32 %v8737_v37, %v11239_v61 }
  0x87   :  { %v11245_v23 = vand.u32 4294901760, %v8652_v43  ;;  %6495 = vmatpush3.msra.mxu0 %v8629_v41  ;;  %v1063_v14 = vsub.f32 %v8649_v49, %v11246_v18  ;;  %6527 = vmatprep.subr.mxu1 %v7993_v27  ;;  %v1085_v60 = vand.u32 4294901760, %v1084_v10  ;;  %v8760_v25 = vsub.f32 %v930_v30, %v8748_v33 }
  0x88   :  { %v1056_v35 = vsub.f32 %v8646_v2, %v1055_v7  ;;  %6496 = vmatprep.subr.mxu0 %v7993_v27  ;;  %6528 = vmatpush3.msra.mxu1 %v1050_v40  ;;  %v1078_v16 = vand.u32 4294901760, %v1077_v4  ;;  %v1113_v40 = vand.u32 4294901760, %v1112_v34 }
  0x89   :  { %v1070_v45 = vsub.f32 %v8652_v43, %v11245_v23  ;;  %6497 = vmatpush3.msra.mxu0 %v8631_v28  ;;  %v1064_v3 = vand.u32 4294901760, %v1063_v14  ;;  %6529 = vmatprep.subr.mxu1 %v7993_v27  ;;  %v928_v14 = vld [vmem:[#allocation2 + $0x108] sm:$0xff] }
  0x8a   :  { %v1057_v0 = vand.u32 4294901760, %v1056_v35  ;;  %6498 = vmatprep.subr.mxu0 %v7993_v27  ;;  %v11238_v35 = vand.u32 4294901760, %v8753_v29  ;;  %6522 = vmatprep.mubr.msk.f32.mxu0 %vm7994_vm0, %v7993_v27 }
  0x8b   :  { %6499 = vmatpush3.msra.mxu0 %v8634_v12  ;;  %v1071_v9 = vand.u32 4294901760, %v1070_v45  ;;  %v11237_v45 = vand.u32 4294901760, %v8760_v25 }
  0x8c   :  { %6500 = vmatprep.subr.mxu0 %v7993_v27  ;;  %6530 = vmatpush3.msra.mxu1 %v1057_v0  ;;  %v8770_v0 = vsub.f32 %v929_v46, %v8762_v31  ;;  %v1119_v4 = vsub.f32 %v8753_v29, %v11238_v35 }
  0x8d   :  { %6501 = vmatpush3.msra.mxu0 %v8641_v20  ;;  %6531 = vmatprep.subr.mxu1 %v7993_v27 }
  0x8e   :  { %6502 = vmatprep.subr.mxu0 %v7993_v27  ;;  %6532 = vmatpush3.msra.mxu1 %v1064_v3  ;;  %v8772_v3 = vand.u32 4294901760, %v928_v14  ;;  %v11236_v10 = vand.u32 4294901760, %v8770_v0  ;;  %v1120_v24 = vand.u32 4294901760, %v1119_v4 }
  0x8f   :  { %6503 = vmatpush3.msra.mxu0 %v8643_v51  ;;  %6533 = vmatprep.subr.mxu1 %v7993_v27 }
  0x90   :  { %6504 = vmatprep.subr.mxu0 %v7993_v27  ;;  %6534 = vmatpush3.msra.mxu1 %v1071_v9  ;;  %v1126_v9 = vsub.f32 %v8760_v25, %v11237_v45  ;;  %v8785_v15 = vsub.f32 %v928_v14, %v8772_v3  ;;  %v1133_v48 = vsub.f32 %v8770_v0, %v11236_v10 }
  0x91   :  { %6505 = vmatpush3.msra.mxu0 %v8698_v11  ;;  %6535 = vmatprep.subr.mxu1 %v7993_v27 }
  0x92   :  { %6506 = vmatprep.subr.mxu0 %v7993_v27  ;;  %6536 = vmatpush3.msra.mxu1 %v1078_v16  ;;  %v8787_v16 = vand.u32 4294901760, %v927_v5  ;;  %v11235_v54 = vand.u32 4294901760, %v8785_v15 }
  0x93   :  { %6507 = vmatpush3.msra.mxu0 %v8706_v22  ;;  %6537 = vmatprep.subr.mxu1 %v7993_v27 }
  0x94   :  { %6508 = vmatprep.subr.mxu0 %v7993_v27  ;;  %6538 = vmatpush3.msra.mxu1 %v1085_v60  ;;  %v1127_v60 = vand.u32 4294901760, %v1126_v9  ;;  %v8797_v55 = vsub.f32 %v927_v5, %v8787_v16  ;;  %v1140_v50 = vsub.f32 %v8785_v15, %v11235_v54  ;;  %v8822_v9 = vld [vmem:[#allocation2 + $0x480] sm:$0xff] }
  0x95   :  { %6509 = vmatpush3.msra.mxu0 %v8715_v36  ;;  %6539 = vmatprep.subr.mxu1 %v7993_v27 }
  0x96   :  { %6510 = vmatprep.subr.mxu0 %v7993_v27  ;;  %6540 = vmatpush3.msra.mxu1 %v1092_v58  ;;  %v1134_v58 = vand.u32 4294901760, %v1133_v48  ;;  %v11234_v30 = vand.u32 4294901760, %v8797_v55 }
  0x97   :  { %6511 = vmatpush3.msra.mxu0 %v8727_v6  ;;  %6541 = vmatprep.subr.mxu1 %v7993_v27 }
  0x98   :  { %6512 = vmatprep.subr.mxu0 %v7993_v27  ;;  %6542 = vmatpush3.msra.mxu1 %v1099_v32  ;;  %v1141_v32 = vand.u32 4294901760, %v1140_v50  ;;  %v1147_v52 = vsub.f32 %v8797_v55, %v11234_v30 }
  0x99   :  { %6513 = vmatpush3.msra.mxu0 %v8741_v38  ;;  %6543 = vmatprep.subr.mxu1 %v7993_v27 }
  0x9a   :  { %6514 = vmatprep.subr.mxu0 %v7993_v27  ;;  %6544 = vmatpush3.msra.mxu1 %v1106_v56  ;;  %v1148_v46 = vand.u32 4294901760, %v1147_v52  ;;  %v60_v56 = vlaneseq }
  0x9b   :  { %6515 = vmatpush3.msra.mxu0 %v8748_v33  ;;  %6545 = vmatprep.subr.mxu1 %v7993_v27 }
  0x9c   :  { %6516 = vmatprep.subr.mxu0 %v7993_v27  ;;  %6546 = vmatpush3.msra.mxu1 %v1113_v40  ;;  %v8819_v14 = vshrl.u32 %v60_v56, 7 }
  0x9d   :  { %6517 = vmatpush3.msra.mxu0 %v8762_v31  ;;  %6547 = vmatprep.subr.mxu1 %v7993_v27 }
  0x9e   :  { %6518 = vmatprep.subr.mxu0 %v7993_v27  ;;  %6548 = vmatpush3.msra.mxu1 %v1120_v24  ;;  %v62_v5 = vsub.s32 0, %v8819_v14 }
  0x9f   :  { %6519 = vmatpush3.msra.mxu0 %v8772_v3  ;;  %6549 = vmatprep.subr.mxu1 %v7993_v27 }
  0xa0   :  { %6520 = vmatprep.subr.mxu0 %v7993_v27  ;;  %6550 = vmatpush3.msra.mxu1 %v1127_v60  ;;  %v63_v48 = vrot.slane %v8822_v9, %v62_v5 }
  0xa1   :  { %6521 = vmatpush3.msra.mxu0 %v8787_v16  ;;  %6551 = vmatprep.subr.mxu1 %v7993_v27 }
  0xa2   :  { %6560 = vmatprep.subr.mxu0 %v7993_v27  ;;  %6552 = vmatpush3.msra.mxu1 %v1134_v58 }
  0xa3   :  { %6553 = vmatprep.subr.mxu1 %v7993_v27 }
  0xa4   :  { %6554 = vmatpush3.msra.mxu1 %v1141_v32 }
  0xa5   :  { %6555 = vmatprep.subr.mxu1 %v7993_v27 }
  0xa6   :  { %6556 = vmatpush3.msra.mxu1 %v1148_v46 }
  0xa7   :  { %6595 = vmatprep.subr.mxu1 %v7993_v27 }
  0xf8   :  { %v5598_v34 = vpop.f32.mrf.mxu0 }
  0xfa   :  { %v5599_v40 = vpop.f32.mrf.mxu0 }
  0xfb   :  { %v5600_v58 = vadd.f32 %v5599_v40, %v5598_v34 }
  0xfd   :  { %v173_v46 = vadd.f32 %v5600_v58, %v63_v48 }
 0x101   :  { %v5633_v4 = vpop.f32.mrf.mxu1 }
 0x103   :  { %v5634_v60 = vpop.f32.mrf.mxu1 }
 0x104   :  { %v5635_v30 = vadd.f32 %v5634_v60, %v5633_v4 }
 0x106   :  { %v405_v45 = vadd.f32 %v5635_v30, %v173_v46 }
 0x119   :  { %v5668_v24 = vpop.f32.mrf.mxu0 }
 0x11b   :  { %v5669_v50 = vpop.f32.mrf.mxu0 }
 0x11c   :  { %v5670_v10 = vadd.f32 %v5669_v50, %v5668_v24 }
 0x11e   :  { %v543_v61 = vadd.f32 %v5670_v10, %v405_v45 }
 0x122   :  { %v5703_v32 = vpop.f32.mrf.mxu1 }
 0x124   :  { %v5704_v54 = vpop.f32.mrf.mxu1 }
 0x125   :  { %v5705_v35 = vadd.f32 %v5704_v54, %v5703_v32 }
 0x127   :  { %v651_v8 = vadd.f32 %v5705_v35, %v543_v61 }
 0x13b   :  { %v5738_v52 = vpop.f32.mrf.mxu0 }
 0x13d   :  { %v5739_v56 = vpop.f32.mrf.mxu0 }
 0x13e   :  { %v5740_v1 = vadd.f32 %v5739_v56, %v5738_v52 }
 0x140   :  { %v819_v62 = vadd.f32 %v5740_v1, %v651_v8 }
 0x144   :  { %v5773_v57 = vpop.f32.mrf.mxu1 }
 0x146   :  { %v5774_v59 = vpop.f32.mrf.mxu1 }
 0x147   :  { %v5775_v23 = vadd.f32 %v5774_v59, %v5773_v57  ;;  %v1602_v59 = vld [vmem:[#allocation2 + $0x1e8] sm:$0xff] }
 0x148   :  { %v1598_v57 = vld [vmem:[#allocation2 + $0x1c8] sm:$0xff] }
 0x149   :  { %v923_v18 = vadd.f32 %v5775_v23, %v819_v62 }
 0x14b   :  { %v926_v5 = vmax.f32 %v923_v18, 0.0 }
 0x14d   :  { %v8825_v34 = vand.u32 4294901760, %v926_v5 }
 0x14f   :  { %v8828_v40 = vsub.f32 %v926_v5, %v8825_v34  ;;  %6558 = vmatmul.mubr.f32.vlgmr.msra.gmra.mxu1 %v8825_v34 }
 0x150   :  { %6596 = vmatpush3.msra.mxu1 %v8621_v19  ;;  %6627 = vmatprep.mubr.msk.f32.mxu1 %vm7994_vm0, %v7993_v27 }
 0x151   :  { %v1030_v45 = vand.u32 4294901760, %v8828_v40  ;;  %6597 = vmatprep.subr.mxu1 %v7993_v27 }
 0x152   :  { %6598 = vmatpush3.msra.mxu1 %v8626_v13 }
 0x153   :  { %6599 = vmatprep.subr.mxu1 %v7993_v27  ;;  %v1031_v18 = vsub.f32 %v8828_v40, %v1030_v45 }
 0x154   :  { %6600 = vmatpush3.msra.mxu1 %v8629_v41 }
 0x155   :  { %6601 = vmatprep.subr.mxu1 %v7993_v27  ;;  %v1032_v23 = vand.u32 4294901760, %v1031_v18 }
 0x156   :  { %6602 = vmatpush3.msra.mxu1 %v8631_v28 }
 0x157   :  { %6603 = vmatprep.subr.mxu1 %v7993_v27  ;;  %6523 = vmatmul.mubr.f32.vlgmr.msra.gmra.mxu0 %v1032_v23 }
 0x158   :  { %6561 = vmatpush3.msra.mxu0 %v8624_v21  ;;  %6604 = vmatpush3.msra.mxu1 %v8634_v12  ;;  %v11381_v21 = vand.u32 4294901760, %v8652_v43 }
 0x159   :  { %6562 = vmatprep.subr.mxu0 %v7993_v27  ;;  %6605 = vmatprep.subr.mxu1 %v7993_v27 }
 0x15a   :  { %6563 = vmatpush3.msra.mxu0 %v8638_v53  ;;  %6606 = vmatpush3.msra.mxu1 %v8641_v20  ;;  %v11387_v53 = vand.u32 4294901760, %v8737_v37 }
 0x15b   :  { %6564 = vmatprep.subr.mxu0 %v7993_v27  ;;  %6607 = vmatprep.subr.mxu1 %v7993_v27 }
 0x15c   :  { %6565 = vmatpush3.msra.mxu0 %v8646_v2  ;;  %6608 = vmatpush3.msra.mxu1 %v8643_v51  ;;  %v11390_v2 = vand.u32 4294901760, %v8770_v0 }
 0x15d   :  { %6566 = vmatprep.subr.mxu0 %v7993_v27  ;;  %6609 = vmatprep.subr.mxu1 %v7993_v27 }
 0x15e   :  { %6567 = vmatpush3.msra.mxu0 %v8649_v49  ;;  %6610 = vmatpush3.msra.mxu1 %v8698_v11 }
 0x15f   :  { %6568 = vmatprep.subr.mxu0 %v7993_v27  ;;  %6611 = vmatprep.subr.mxu1 %v7993_v27 }
 0x160   :  { %6569 = vmatpush3.msra.mxu0 %v8652_v43  ;;  %6612 = vmatpush3.msra.mxu1 %v8706_v22  ;;  %v11392_v43 = vand.u32 4294901760, %v8797_v55 }
 0x161   :  { %6570 = vmatprep.subr.mxu0 %v7993_v27  ;;  %6613 = vmatprep.subr.mxu1 %v7993_v27 }
 0x162   :  { %6571 = vmatpush3.msra.mxu0 %v8661_v26  ;;  %6614 = vmatpush3.msra.mxu1 %v8715_v36 }
 0x163   :  { %6572 = vmatprep.subr.mxu0 %v7993_v27  ;;  %6615 = vmatprep.subr.mxu1 %v7993_v27 }
 0x164   :  { %6573 = vmatpush3.msra.mxu0 %v8664_v47  ;;  %6616 = vmatpush3.msra.mxu1 %v8727_v6 }
 0x165   :  { %6574 = vmatprep.subr.mxu0 %v7993_v27  ;;  %6617 = vmatprep.subr.mxu1 %v7993_v27 }
 0x166   :  { %6575 = vmatpush3.msra.mxu0 %v8704_v17  ;;  %6618 = vmatpush3.msra.mxu1 %v8741_v38 }
 0x167   :  { %6576 = vmatprep.subr.mxu0 %v7993_v27  ;;  %6619 = vmatprep.subr.mxu1 %v7993_v27 }
 0x168   :  { %6577 = vmatpush3.msra.mxu0 %v8713_v42  ;;  %6620 = vmatpush3.msra.mxu1 %v8748_v33 }
 0x169   :  { %6578 = vmatprep.subr.mxu0 %v7993_v27  ;;  %6621 = vmatprep.subr.mxu1 %v7993_v27 }
 0x16a   :  { %6579 = vmatpush3.msra.mxu0 %v8725_v63  ;;  %6622 = vmatpush3.msra.mxu1 %v8762_v31 }
 0x16b   :  { %6580 = vmatprep.subr.mxu0 %v7993_v27  ;;  %6623 = vmatprep.subr.mxu1 %v7993_v27 }
 0x16c   :  { %6581 = vmatpush3.msra.mxu0 %v8737_v37  ;;  %6624 = vmatpush3.msra.mxu1 %v8772_v3 }
 0x16d   :  { %6582 = vmatprep.subr.mxu0 %v7993_v27  ;;  %6625 = vmatprep.subr.mxu1 %v7993_v27 }
 0x16e   :  { %6583 = vmatpush3.msra.mxu0 %v8753_v29  ;;  %6626 = vmatpush3.msra.mxu1 %v8787_v16 }
 0x16f   :  { %6584 = vmatprep.subr.mxu0 %v7993_v27  ;;  %6628 = vmatmul.mubr.f32.vlgmr.msra.gmra.mxu1 %v1030_v45 }
 0x170   :  { %6665 = vmatprep.subr.mxu1 %v7993_v27  ;;  %6585 = vmatpush3.msra.mxu0 %v8760_v25 }
 0x171   :  { %6666 = vmatpush3.msra.mxu1 %v8621_v19  ;;  %6586 = vmatprep.subr.mxu0 %v7993_v27  ;;  %v11380_v19 = vand.u32 4294901760, %v8649_v49  ;;  %v11391_v49 = vand.u32 4294901760, %v8785_v15 }
 0x172   :  { %6667 = vmatprep.subr.mxu1 %v7993_v27  ;;  %6587 = vmatpush3.msra.mxu0 %v8770_v0 }
 0x173   :  { %6668 = vmatpush3.msra.mxu1 %v8626_v13  ;;  %6588 = vmatprep.subr.mxu0 %v7993_v27  ;;  %v11382_v13 = vand.u32 4294901760, %v8661_v26 }
 0x174   :  { %6669 = vmatprep.subr.mxu1 %v7993_v27  ;;  %6589 = vmatpush3.msra.mxu0 %v8785_v15 }
 0x175   :  { %6670 = vmatpush3.msra.mxu1 %v8629_v41  ;;  %6590 = vmatprep.subr.mxu0 %v7993_v27  ;;  %v11383_v41 = vand.u32 4294901760, %v8664_v47  ;;  %v1603_v47 = vld [vmem:[#allocation2 + $0x1f0] sm:$0xff] }
 0x176   :  { %6671 = vmatprep.subr.mxu1 %v7993_v27  ;;  %6591 = vmatpush3.msra.mxu0 %v8797_v55  ;;  %v8997_v62 = vand.u32 4294901760, %v1603_v47 }
 0x177   :  { %6592 = vmatprep.mubr.msk.f32.mxu0 %vm7994_vm0, %v7993_v27  ;;  %6672 = vmatpush3.msra.mxu1 %v8631_v28  ;;  %v11384_v28 = vand.u32 4294901760, %v8704_v17  ;;  %v1600_v17 = vld [vmem:[#allocation2 + $0x1d8] sm:$0xff] }
 0x178   :  { %6593 = vmatmul.mubr.f32.vlgmr.msra.gmra.mxu0 %v8828_v40  ;;  %6630 = vmatprep.subr.mxu0 %v7993_v27  ;;  %v9009_v1 = vsub.f32 %v1603_v47, %v8997_v62  ;;  %v1596_v40 = vld [vmem:[#allocation2 + $0x1b8] sm:$0xff] }
 0x179   :  { %6673 = vmatprep.subr.mxu1 %v7993_v27  ;;  %6631 = vmatpush3.msra.mxu0 %v1041_v39  ;;  %v11386_v39 = vand.u32 4294901760, %v8725_v63  ;;  %v1597_v63 = vld [vmem:[#allocation2 + $0x1c0] sm:$0xff]  ;;  %v9081_v23 = vand.u32 4294901760, %v1596_v40  ;;  %v1592_v47 = vld [vmem:[#allocation2 + $0x198] sm:$0xff] }
 0x17a   :  { %6674 = vmatpush3.msra.mxu1 %v8634_v12  ;;  %6632 = vmatprep.subr.mxu0 %v7993_v27  ;;  %v11385_v12 = vand.u32 4294901760, %v8713_v42  ;;  %v9004_v42 = vand.u32 4294901760, %v1600_v17  ;;  %v1710_v35 = vand.u32 4294901760, %v9009_v1 }
 0x17b   :  { %6675 = vmatprep.subr.mxu1 %v7993_v27  ;;  %6633 = vmatpush3.msra.mxu0 %v1048_v44  ;;  %v1604_v44 = vld [vmem:[#allocation2 + $0x1f8] sm:$0xff] }
 0x17c   :  { %6676 = vmatpush3.msra.mxu1 %v8641_v20  ;;  %6634 = vmatprep.subr.mxu0 %v7993_v27  ;;  %v11388_v20 = vand.u32 4294901760, %v8753_v29  ;;  %v8992_v26 = vand.u32 4294901760, %v1604_v44  ;;  %v9023_v29 = vsub.f32 %v1600_v17, %v9004_v42  ;;  %v1711_v55 = vsub.f32 %v9009_v1, %v1710_v35 }
 0x17d   :  { %6677 = vmatprep.subr.mxu1 %v7993_v27  ;;  %6635 = vmatpush3.msra.mxu0 %v1055_v7 }
 0x17e   :  { %6678 = vmatpush3.msra.mxu1 %v8643_v51  ;;  %6636 = vmatprep.subr.mxu0 %v7993_v27  ;;  %v11389_v51 = vand.u32 4294901760, %v8760_v25  ;;  %v8995_v7 = vsub.f32 %v1604_v44, %v8992_v26  ;;  %v9026_v25 = vand.u32 4294901760, %v1597_v63  ;;  %v1712_v48 = vand.u32 4294901760, %v1711_v55 }
 0x17f   :  { %6679 = vmatprep.subr.mxu1 %v7993_v27  ;;  %6637 = vmatpush3.msra.mxu0 %v11380_v19  ;;  %v1595_v19 = vld [vmem:[#allocation2 + $0x1b0] sm:$0xff] }
 0x180   :  { %6680 = vmatpush3.msra.mxu1 %v8698_v11  ;;  %6638 = vmatprep.subr.mxu0 %v7993_v27  ;;  %v1601_v11 = vld [vmem:[#allocation2 + $0x1e0] sm:$0xff]  ;;  %v9049_v4 = vsub.f32 %v1597_v63, %v9026_v25  ;;  %v1591_v63 = vld [vmem:[#allocation2 + $0x190] sm:$0xff] }
 0x181   :  { %6681 = vmatprep.subr.mxu1 %v7993_v27  ;;  %6639 = vmatpush3.msra.mxu0 %v11381_v21  ;;  %v9002_v8 = vand.u32 4294901760, %v1601_v11 }
 0x182   :  { %6682 = vmatpush3.msra.mxu1 %v8706_v22  ;;  %6640 = vmatprep.subr.mxu0 %v7993_v27  ;;  %v9000_v22 = vand.u32 4294901760, %v1602_v59  ;;  %v1752_v56 = vand.u32 4294901760, %v9049_v4 }
 0x183   :  { %6683 = vmatprep.subr.mxu1 %v7993_v27  ;;  %6641 = vmatpush3.msra.mxu0 %v11382_v13  ;;  %v9087_v13 = vsub.f32 %v1596_v40, %v9081_v23 }
 0x184   :  { %6684 = vmatpush3.msra.mxu1 %v8715_v36  ;;  %6642 = vmatprep.subr.mxu0 %v7993_v27  ;;  %v1599_v36 = vld [vmem:[#allocation2 + $0x1d0] sm:$0xff]  ;;  %v9017_v61 = vsub.f32 %v1602_v59, %v9000_v22  ;;  %v1753_v18 = vsub.f32 %v9049_v4, %v1752_v56 }
 0x185   :  { %6685 = vmatprep.subr.mxu1 %v7993_v27  ;;  %6643 = vmatpush3.msra.mxu0 %v11383_v41  ;;  %v9012_v37 = vand.u32 4294901760, %v1599_v36  ;;  %v9089_v41 = vand.u32 4294901760, %v1595_v19 }
 0x186   :  { %6686 = vmatpush3.msra.mxu1 %v8727_v6  ;;  %6644 = vmatprep.subr.mxu0 %v7993_v27  ;;  %v1703_v6 = vand.u32 4294901760, %v8995_v7  ;;  %v1717_v10 = vand.u32 4294901760, %v9017_v61 }
 0x187   :  { %6687 = vmatprep.subr.mxu1 %v7993_v27  ;;  %6645 = vmatpush3.msra.mxu0 %v11384_v28  ;;  %v9033_v0 = vsub.f32 %v1599_v36, %v9012_v37  ;;  %v1594_v28 = vld [vmem:[#allocation2 + $0x1a8] sm:$0xff] }
 0x188   :  { %6688 = vmatpush3.msra.mxu1 %v8741_v38  ;;  %6646 = vmatprep.subr.mxu0 %v7993_v27  ;;  %v9014_v38 = vand.u32 4294901760, %v1598_v57  ;;  %v1718_v24 = vsub.f32 %v9017_v61, %v1717_v10 }
 0x189   :  { %6689 = vmatprep.subr.mxu1 %v7993_v27  ;;  %6647 = vmatpush3.msra.mxu0 %v11385_v12  ;;  %v1738_v30 = vand.u32 4294901760, %v9033_v0  ;;  %v1754_v12 = vand.u32 4294901760, %v1753_v18 }
 0x18a   :  { %6690 = vmatpush3.msra.mxu1 %v8748_v33  ;;  %6648 = vmatprep.subr.mxu0 %v7993_v27  ;;  %v9020_v33 = vsub.f32 %v1601_v11, %v9002_v8  ;;  %v1719_v32 = vand.u32 4294901760, %v1718_v24  ;;  %v9131_v24 = vand.u32 4294901760, %v1591_v63 }
 0x18b   :  { %6691 = vmatprep.subr.mxu1 %v7993_v27  ;;  %6649 = vmatpush3.msra.mxu0 %v11386_v39  ;;  %v1739_v46 = vsub.f32 %v9033_v0, %v1738_v30  ;;  %v1759_v39 = vand.u32 4294901760, %v9087_v13 }
 0x18c   :  { %6692 = vmatpush3.msra.mxu1 %v8762_v31  ;;  %6650 = vmatprep.subr.mxu0 %v7993_v27  ;;  %v1704_v31 = vsub.f32 %v8995_v7, %v1703_v6  ;;  %v1724_v15 = vand.u32 4294901760, %v9020_v33 }
 0x18d   :  { %6693 = vmatprep.subr.mxu1 %v7993_v27  ;;  %6651 = vmatpush3.msra.mxu0 %v11387_v53  ;;  %v1740_v45 = vand.u32 4294901760, %v1739_v46  ;;  %v9096_v53 = vsub.f32 %v1595_v19, %v9089_v41 }
 0x18e   :  { %6694 = vmatpush3.msra.mxu1 %v8772_v3  ;;  %6652 = vmatprep.subr.mxu0 %v7993_v27  ;;  %v9037_v3 = vsub.f32 %v1598_v57, %v9014_v38  ;;  %v1705_v54 = vand.u32 4294901760, %v1704_v31  ;;  %v1725_v60 = vsub.f32 %v9020_v33, %v1724_v15  ;;  %v9124_v57 = vand.u32 4294901760, %v1592_v47 }
 0x18f   :  { %6695 = vmatprep.subr.mxu1 %v7993_v27  ;;  %6653 = vmatpush3.msra.mxu0 %v11388_v20  ;;  %v9098_v20 = vand.u32 4294901760, %v1594_v28 }
 0x190   :  { %6696 = vmatpush3.msra.mxu1 %v8787_v16  ;;  %6697 = vmatprep.mubr.msk.f32.mxu1 %vm7994_vm0, %v7993_v27  ;;  %v1731_v16 = vand.u32 4294901760, %v9023_v29  ;;  %v1745_v50 = vand.u32 4294901760, %v9037_v3  ;;  %v1726_v52 = vand.u32 4294901760, %v1725_v60  ;;  %v9135_v60 = vsub.f32 %v1592_v47, %v9124_v57 }
 0x191   :  { %6654 = vmatprep.subr.mxu0 %v7993_v27  ;;  %6698 = vmatmul.mubr.f32.vlgmr.msra.gmra.mxu1 %v8825_v34 }
 0x192   :  { %6655 = vmatpush3.msra.mxu0 %v11389_v51  ;;  %6662 = vmatprep.mubr.msk.f32.mxu0 %vm7994_vm0, %v7993_v27  ;;  %v1732_v58 = vsub.f32 %v9023_v29, %v1731_v16  ;;  %v1593_v51 = vld [vmem:[#allocation2 + $0x1a0] sm:$0xff] }
 0x193   :  { %6656 = vmatprep.subr.mxu0 %v7993_v27  ;;  %6735 = vmatprep.subr.mxu1 %v7993_v27  ;;  %v9110_v44 = vand.u32 4294901760, %v1593_v51 }
 0x194   :  { %6657 = vmatpush3.msra.mxu0 %v11390_v2  ;;  %6767 = vmatprep.mubr.msk.f32.mxu1 %vm7994_vm0, %v7993_v27  ;;  %v1733_v5 = vand.u32 4294901760, %v1732_v58  ;;  %v1760_v2 = vsub.f32 %v9087_v13, %v1759_v39 }
 0x195   :  { %6658 = vmatprep.subr.mxu0 %v7993_v27  ;;  %6736 = vmatpush3.msra.mxu1 %v1705_v54  ;;  %v9120_v36 = vsub.f32 %v1593_v51, %v9110_v44 }
 0x196   :  { %6659 = vmatpush3.msra.mxu0 %v11391_v49  ;;  %6737 = vmatprep.subr.mxu1 %v7993_v27  ;;  %v11253_v49 = vand.u32 4294901760, %v9096_v53  ;;  %v1761_v59 = vand.u32 4294901760, %v1760_v2 }
 0x197   :  { %6660 = vmatprep.subr.mxu0 %v7993_v27  ;;  %6738 = vmatpush3.msra.mxu1 %v1712_v48  ;;  %v11251_v55 = vand.u32 4294901760, %v9120_v36  ;;  %v1590_v48 = vld [vmem:[#allocation2 + $0x188] sm:$0xff] }
 0x198   :  { %6661 = vmatpush3.msra.mxu0 %v11392_v43  ;;  %6739 = vmatprep.subr.mxu1 %v7993_v27  ;;  %v9108_v43 = vsub.f32 %v1594_v28, %v9098_v20  ;;  %v1767_v11 = vsub.f32 %v9096_v53, %v11253_v49  ;;  %v9144_v46 = vand.u32 4294901760, %v1590_v48 }
 0x199   :  { %6663 = vmatmul.mubr.f32.vlgmr.msra.gmra.mxu0 %v8825_v34  ;;  %6700 = vmatprep.subr.mxu0 %v7993_v27  ;;  %v1746_v34 = vsub.f32 %v9037_v3, %v1745_v50 }
 0x19a   :  { %6732 = vmatprep.mubr.msk.f32.mxu0 %vm7994_vm0, %v7993_v27  ;;  %6701 = vmatpush3.msra.mxu0 %v8992_v26  ;;  %v11252_v17 = vand.u32 4294901760, %v9108_v43  ;;  %v1768_v31 = vand.u32 4294901760, %v1767_v11  ;;  %v9152_v18 = vsub.f32 %v1590_v48, %v9144_v46 }
 0x19b   :  { %6702 = vmatprep.subr.mxu0 %v7993_v27  ;;  %6740 = vmatpush3.msra.mxu1 %v1719_v32  ;;  %v1747_v21 = vand.u32 4294901760, %v1746_v34  ;;  %v1781_v32 = vsub.f32 %v9120_v36, %v11251_v55  ;;  %v1589_v34 = vld [vmem:[#allocation2 + $0x180] sm:$0xff] }
 0x19c   :  { %6703 = vmatpush3.msra.mxu0 %v8997_v62  ;;  %6741 = vmatprep.subr.mxu1 %v7993_v27  ;;  %v1774_v54 = vsub.f32 %v9108_v43, %v11252_v17  ;;  %v9154_v19 = vand.u32 4294901760, %v1589_v34 }
 0x19d   :  { %6704 = vmatprep.subr.mxu0 %v7993_v27  ;;  %6742 = vmatpush3.msra.mxu1 %v1726_v52  ;;  %v9142_v52 = vsub.f32 %v1591_v63, %v9131_v24  ;;  %v1782_v40 = vand.u32 4294901760, %v1781_v32 }
 0x19e   :  { %6705 = vmatpush3.msra.mxu0 %v9000_v22  ;;  %6743 = vmatprep.subr.mxu1 %v7993_v27  ;;  %v1775_v58 = vand.u32 4294901760, %v1774_v54  ;;  %v9167_v51 = vsub.f32 %v1589_v34, %v9154_v19 }
 0x19f   :  { %6706 = vmatprep.subr.mxu0 %v7993_v27  ;;  %6744 = vmatpush3.msra.mxu1 %v1733_v5  ;;  %v11250_v5 = vand.u32 4294901760, %v9135_v60 }
 0x1a0   :  { %6707 = vmatpush3.msra.mxu0 %v9002_v8  ;;  %6745 = vmatprep.subr.mxu1 %v7993_v27  ;;  %v11247_v11 = vand.u32 4294901760, %v9167_v51 }
 0x1a1   :  { %6708 = vmatprep.subr.mxu0 %v7993_v27  ;;  %6746 = vmatpush3.msra.mxu1 %v1740_v45  ;;  %v11249_v45 = vand.u32 4294901760, %v9142_v52 }
 0x1a2   :  { %6709 = vmatpush3.msra.mxu0 %v9004_v42  ;;  %6747 = vmatprep.subr.mxu1 %v7993_v27 }
 0x1a3   :  { %6710 = vmatprep.subr.mxu0 %v7993_v27  ;;  %6748 = vmatpush3.msra.mxu1 %v1747_v21  ;;  %v1788_v21 = vsub.f32 %v9135_v60, %v11250_v5  ;;  %v1795_v28 = vsub.f32 %v9142_v52, %v11249_v45 }
 0x1a4   :  { %6711 = vmatpush3.msra.mxu0 %v9012_v37  ;;  %6749 = vmatprep.subr.mxu1 %v7993_v27 }
 0x1a5   :  { %6712 = vmatprep.subr.mxu0 %v7993_v27  ;;  %6750 = vmatpush3.msra.mxu1 %v1754_v12  ;;  %v11248_v12 = vand.u32 4294901760, %v9152_v18  ;;  %v1789_v2 = vand.u32 4294901760, %v1788_v21  ;;  %v1796_v47 = vand.u32 4294901760, %v1795_v28 }
 0x1a6   :  { %6713 = vmatpush3.msra.mxu0 %v9014_v38  ;;  %6751 = vmatprep.subr.mxu1 %v7993_v27 }
 0x1a7   :  { %6714 = vmatprep.subr.mxu0 %v7993_v27  ;;  %6752 = vmatpush3.msra.mxu1 %v1761_v59  ;;  %v1802_v59 = vsub.f32 %v9152_v18, %v11248_v12 }
 0x1a8   :  { %6715 = vmatpush3.msra.mxu0 %v9026_v25  ;;  %6753 = vmatprep.subr.mxu1 %v7993_v27 }
 0x1a9   :  { %6716 = vmatprep.subr.mxu0 %v7993_v27  ;;  %6754 = vmatpush3.msra.mxu1 %v1768_v31  ;;  %v1803_v63 = vand.u32 4294901760, %v1802_v59  ;;  %v1809_v31 = vsub.f32 %v9167_v51, %v11247_v11  ;;  %v945_v59 = vsub.s32 1, %v8819_v14 }
 0x1aa   :  { %6717 = vmatpush3.msra.mxu0 %v9081_v23  ;;  %6755 = vmatprep.subr.mxu1 %v7993_v27 }
 0x1ab   :  { %6718 = vmatprep.subr.mxu0 %v7993_v27  ;;  %6756 = vmatpush3.msra.mxu1 %v1775_v58  ;;  %v1810_v54 = vand.u32 4294901760, %v1809_v31 }
 0x1ac   :  { %6719 = vmatpush3.msra.mxu0 %v9089_v41  ;;  %6757 = vmatprep.subr.mxu1 %v7993_v27 }
 0x1ad   :  { %6720 = vmatprep.subr.mxu0 %v7993_v27  ;;  %6758 = vmatpush3.msra.mxu1 %v1782_v40 }
 0x1ae   :  { %6721 = vmatpush3.msra.mxu0 %v9098_v20  ;;  %6759 = vmatprep.subr.mxu1 %v7993_v27 }
 0x1af   :  { %6722 = vmatprep.subr.mxu0 %v7993_v27  ;;  %6760 = vmatpush3.msra.mxu1 %v1789_v2 }
 0x1b0   :  { %6723 = vmatpush3.msra.mxu0 %v9110_v44  ;;  %6761 = vmatprep.subr.mxu1 %v7993_v27 }
 0x1b1   :  { %6724 = vmatprep.subr.mxu0 %v7993_v27  ;;  %6762 = vmatpush3.msra.mxu1 %v1796_v47  ;;  %v946_v47 = vrot.slane %v8822_v9, %v945_v59  ;;  %v2258_v59 = vld [vmem:[#allocation2 + $0x238] sm:$0xff] }
 0x1b2   :  { %6725 = vmatpush3.msra.mxu0 %v9124_v57  ;;  %6763 = vmatprep.subr.mxu1 %v7993_v27 }
 0x1b3   :  { %6726 = vmatprep.subr.mxu0 %v7993_v27  ;;  %6764 = vmatpush3.msra.mxu1 %v1803_v63 }
 0x1b4   :  { %6727 = vmatpush3.msra.mxu0 %v9131_v24  ;;  %6765 = vmatprep.subr.mxu1 %v7993_v27 }
 0x1b5   :  { %6728 = vmatprep.subr.mxu0 %v7993_v27  ;;  %6766 = vmatpush3.msra.mxu1 %v1810_v54 }
 0x1b6   :  { %6729 = vmatpush3.msra.mxu0 %v9144_v46  ;;  %6805 = vmatprep.subr.mxu1 %v7993_v27 }
 0x1b7   :  { %6730 = vmatprep.subr.mxu0 %v7993_v27 }
 0x1b8   :  { %6731 = vmatpush3.msra.mxu0 %v9154_v19 }
 0x1b9   :  { %6770 = vmatprep.subr.mxu0 %v7993_v27 }
 0x20f   :  { %v1185_v48 = vpop.f32.mrf.mxu1 }
 0x211   :  { %v6559_v58 = vpop.f32.mrf.mxu1 }
 0x217   :  { %v1034_v32 = vpop.f32.mrf.mxu0 }
 0x218   :  { %v1035_v11 = vadd.f32 %v1034_v32, %v946_v47 }
 0x219   :  { %v6524_v34 = vpop.f32.mrf.mxu0 }
 0x21a   :  { %v1186_v63 = vadd.f32 %v1185_v48, %v1035_v11 }
 0x22f   :  { %v1378_v40 = vpop.f32.mrf.mxu1 }
 0x231   :  { %v6629_v21 = vpop.f32.mrf.mxu1 }
 0x238   :  { %v1289_v28 = vpop.f32.mrf.mxu0 }
 0x239   :  { %v1290_v45 = vadd.f32 %v1289_v28, %v1186_v63  ;;  %v9442_v63 = vand.u32 4294901760, %v2258_v59 }
 0x23a   :  { %v6594_v2 = vpop.f32.mrf.mxu0 }
 0x23b   :  { %v1379_v54 = vadd.f32 %v1378_v40, %v1290_v45 }
 0x251   :  { %v1584_v31 = vpop.f32.mrf.mxu1 }
 0x253   :  { %v6699_v12 = vpop.f32.mrf.mxu1 }
 0x259   :  { %v1497_v5 = vpop.f32.mrf.mxu0 }
 0x25a   :  { %v1498_v55 = vadd.f32 %v1497_v5, %v1379_v54  ;;  %v2257_v54 = vld [vmem:[#allocation2 + $0x230] sm:$0xff] }
 0x25b   :  { %v6664_v17 = vpop.f32.mrf.mxu0 }
 0x25c   :  { %v1585_v58 = vadd.f32 %v1584_v31, %v1498_v55 }
 0x25e   :  { %v1588_v49 = vmax.f32 %v1585_v58, 0.0 }
 0x260   :  { %v9186_v34 = vand.u32 4294901760, %v1588_v49 }
 0x262   :  { %v9189_v21 = vsub.f32 %v1588_v49, %v9186_v34  ;;  %6768 = vmatmul.mubr.f32.vlgmr.msra.gmra.mxu1 %v9186_v34 }
 0x263   :  { %6806 = vmatpush3.msra.mxu1 %v8992_v26  ;;  %6837 = vmatprep.mubr.msk.f32.mxu1 %vm7994_vm0, %v7993_v27 }
 0x264   :  { %v1692_v9 = vand.u32 4294901760, %v9189_v21  ;;  %6807 = vmatprep.subr.mxu1 %v7993_v27 }
 0x265   :  { %6808 = vmatpush3.msra.mxu1 %v8997_v62 }
 0x266   :  { %6809 = vmatprep.subr.mxu1 %v7993_v27  ;;  %v1693_v17 = vsub.f32 %v9189_v21, %v1692_v9 }
 0x267   :  { %6810 = vmatpush3.msra.mxu1 %v9000_v22 }
 0x268   :  { %6811 = vmatprep.subr.mxu1 %v7993_v27  ;;  %v1694_v49 = vand.u32 4294901760, %v1693_v17 }
 0x269   :  { %6812 = vmatpush3.msra.mxu1 %v9002_v8 }
 0x26a   :  { %6813 = vmatprep.subr.mxu1 %v7993_v27  ;;  %6733 = vmatmul.mubr.f32.vlgmr.msra.gmra.mxu0 %v1694_v49 }
 0x26b   :  { %6771 = vmatpush3.msra.mxu0 %v8995_v7  ;;  %6814 = vmatpush3.msra.mxu1 %v9004_v42  ;;  %v11394_v7 = vand.u32 4294901760, %v9108_v43 }
 0x26c   :  { %6772 = vmatprep.subr.mxu0 %v7993_v27  ;;  %6815 = vmatprep.subr.mxu1 %v7993_v27 }
 0x26d   :  { %6773 = vmatpush3.msra.mxu0 %v9009_v1  ;;  %6816 = vmatpush3.msra.mxu1 %v9012_v37  ;;  %v2266_v1 = vld [vmem:[#allocation2 + $0x278] sm:$0xff] }
 0x26e   :  { %6774 = vmatprep.subr.mxu0 %v7993_v27  ;;  %6817 = vmatprep.subr.mxu1 %v7993_v27 }
 0x26f   :  { %6775 = vmatpush3.msra.mxu0 %v9017_v61  ;;  %6818 = vmatpush3.msra.mxu1 %v9014_v38 }
 0x270   :  { %6776 = vmatprep.subr.mxu0 %v7993_v27  ;;  %6819 = vmatprep.subr.mxu1 %v7993_v27 }
 0x271   :  { %6777 = vmatpush3.msra.mxu0 %v9020_v33  ;;  %6820 = vmatpush3.msra.mxu1 %v9026_v25 }
 0x272   :  { %6778 = vmatprep.subr.mxu0 %v7993_v27  ;;  %6821 = vmatprep.subr.mxu1 %v7993_v27 }
 0x273   :  { %6779 = vmatpush3.msra.mxu0 %v9023_v29  ;;  %6822 = vmatpush3.msra.mxu1 %v9081_v23  ;;  %v2264_v29 = vld [vmem:[#allocation2 + $0x268] sm:$0xff] }
 0x274   :  { %6780 = vmatprep.subr.mxu0 %v7993_v27  ;;  %6823 = vmatprep.subr.mxu1 %v7993_v27 }
 0x275   :  { %6781 = vmatpush3.msra.mxu0 %v9033_v0  ;;  %6824 = vmatpush3.msra.mxu1 %v9089_v41  ;;  %v9361_v0 = vand.u32 4294901760, %v2264_v29 }
 0x276   :  { %6782 = vmatprep.subr.mxu0 %v7993_v27  ;;  %6825 = vmatprep.subr.mxu1 %v7993_v27 }
 0x277   :  { %6783 = vmatpush3.msra.mxu0 %v9037_v3  ;;  %6826 = vmatpush3.msra.mxu1 %v9098_v20 }
 0x278   :  { %6784 = vmatprep.subr.mxu0 %v7993_v27  ;;  %6827 = vmatprep.subr.mxu1 %v7993_v27 }
 0x279   :  { %6785 = vmatpush3.msra.mxu0 %v9049_v4  ;;  %6828 = vmatpush3.msra.mxu1 %v9110_v44 }
 0x27a   :  { %6786 = vmatprep.subr.mxu0 %v7993_v27  ;;  %6829 = vmatprep.subr.mxu1 %v7993_v27 }
 0x27b   :  { %6787 = vmatpush3.msra.mxu0 %v9087_v13  ;;  %6830 = vmatpush3.msra.mxu1 %v9124_v57  ;;  %v9378_v13 = vsub.f32 %v2264_v29, %v9361_v0 }
 0x27c   :  { %6788 = vmatprep.subr.mxu0 %v7993_v27  ;;  %6831 = vmatprep.subr.mxu1 %v7993_v27 }
 0x27d   :  { %6789 = vmatpush3.msra.mxu0 %v9096_v53  ;;  %6832 = vmatpush3.msra.mxu1 %v9131_v24 }
 0x27e   :  { %6790 = vmatprep.subr.mxu0 %v7993_v27  ;;  %6833 = vmatprep.subr.mxu1 %v7993_v27 }
 0x27f   :  { %6791 = vmatpush3.msra.mxu0 %v9108_v43  ;;  %6834 = vmatpush3.msra.mxu1 %v9144_v46 }
 0x280   :  { %6792 = vmatprep.subr.mxu0 %v7993_v27  ;;  %6835 = vmatprep.subr.mxu1 %v7993_v27 }
 0x281   :  { %6793 = vmatpush3.msra.mxu0 %v9120_v36  ;;  %6836 = vmatpush3.msra.mxu1 %v9154_v19 }
 0x282   :  { %6794 = vmatprep.subr.mxu0 %v7993_v27  ;;  %6838 = vmatmul.mubr.f32.vlgmr.msra.gmra.mxu1 %v1692_v9  ;;  %v2256_v9 = vld [vmem:[#allocation2 + $0x228] sm:$0xff] }
 0x283   :  { %6875 = vmatprep.subr.mxu1 %v7993_v27  ;;  %6795 = vmatpush3.msra.mxu0 %v9135_v60 }
 0x284   :  { %6876 = vmatpush3.msra.mxu1 %v8992_v26  ;;  %6796 = vmatprep.subr.mxu0 %v7993_v27  ;;  %v11393_v26 = vand.u32 4294901760, %v9096_v53 }
 0x285   :  { %6877 = vmatprep.subr.mxu1 %v7993_v27  ;;  %6797 = vmatpush3.msra.mxu0 %v9142_v52 }
 0x286   :  { %6878 = vmatpush3.msra.mxu1 %v8997_v62  ;;  %6798 = vmatprep.subr.mxu0 %v7993_v27  ;;  %v11395_v62 = vand.u32 4294901760, %v9120_v36 }
 0x287   :  { %6879 = vmatprep.subr.mxu1 %v7993_v27  ;;  %6799 = vmatpush3.msra.mxu0 %v9152_v18 }
 0x288   :  { %6880 = vmatpush3.msra.mxu1 %v9000_v22  ;;  %6800 = vmatprep.subr.mxu0 %v7993_v27  ;;  %v11396_v22 = vand.u32 4294901760, %v9135_v60 }
 0x289   :  { %6881 = vmatprep.subr.mxu1 %v7993_v27  ;;  %6801 = vmatpush3.msra.mxu0 %v9167_v51 }
 0x28a   :  { %6802 = vmatprep.mubr.msk.f32.mxu0 %vm7994_vm0, %v7993_v27  ;;  %6882 = vmatpush3.msra.mxu1 %v9002_v8  ;;  %v11397_v8 = vand.u32 4294901760, %v9142_v52 }
 0x28b   :  { %6803 = vmatmul.mubr.f32.vlgmr.msra.gmra.mxu0 %v9189_v21  ;;  %6840 = vmatprep.subr.mxu0 %v7993_v27  ;;  %v9450_v21 = vand.u32 4294901760, %v2257_v54 }
 0x28c   :  { %6883 = vmatprep.subr.mxu1 %v7993_v27  ;;  %6841 = vmatpush3.msra.mxu0 %v1703_v6  ;;  %v11399_v6 = vand.u32 4294901760, %v9167_v51 }
 0x28d   :  { %6884 = vmatpush3.msra.mxu1 %v9004_v42  ;;  %6842 = vmatprep.subr.mxu0 %v7993_v27  ;;  %v11398_v42 = vand.u32 4294901760, %v9152_v18 }
 0x28e   :  { %6885 = vmatprep.subr.mxu1 %v7993_v27  ;;  %6843 = vmatpush3.msra.mxu0 %v1710_v35  ;;  %v2262_v35 = vld [vmem:[#allocation2 + $0x258] sm:$0xff] }
 0x28f   :  { %6886 = vmatpush3.msra.mxu1 %v9012_v37  ;;  %6844 = vmatprep.subr.mxu0 %v7993_v27  ;;  %v9353_v37 = vand.u32 4294901760, %v2266_v1 }
 0x290   :  { %6887 = vmatprep.subr.mxu1 %v7993_v27  ;;  %6845 = vmatpush3.msra.mxu0 %v1717_v10  ;;  %v9365_v10 = vand.u32 4294901760, %v2262_v35 }
 0x291   :  { %6888 = vmatpush3.msra.mxu1 %v9014_v38  ;;  %6846 = vmatprep.subr.mxu0 %v7993_v27  ;;  %v2265_v38 = vld [vmem:[#allocation2 + $0x270] sm:$0xff]  ;;  %v9356_v61 = vsub.f32 %v2266_v1, %v9353_v37  ;;  %v2254_v1 = vld [vmem:[#allocation2 + $0x218] sm:$0xff] }
 0x292   :  { %6889 = vmatprep.subr.mxu1 %v7993_v27  ;;  %6847 = vmatpush3.msra.mxu0 %v1724_v15  ;;  %v9358_v33 = vand.u32 4294901760, %v2265_v38  ;;  %v2261_v15 = vld [vmem:[#allocation2 + $0x250] sm:$0xff] }
 0x293   :  { %6890 = vmatpush3.msra.mxu1 %v9026_v25  ;;  %6848 = vmatprep.subr.mxu0 %v7993_v27  ;;  %v2263_v25 = vld [vmem:[#allocation2 + $0x260] sm:$0xff]  ;;  %v2365_v4 = vand.u32 4294901760, %v9356_v61 }
 0x294   :  { %6891 = vmatprep.subr.mxu1 %v7993_v27  ;;  %6849 = vmatpush3.msra.mxu0 %v1731_v16  ;;  %v9363_v3 = vand.u32 4294901760, %v2263_v25  ;;  %v2260_v16 = vld [vmem:[#allocation2 + $0x248] sm:$0xff] }
 0x295   :  { %6892 = vmatpush3.msra.mxu1 %v9081_v23  ;;  %6850 = vmatprep.subr.mxu0 %v7993_v27  ;;  %v9375_v23 = vand.u32 4294901760, %v2260_v16 }
 0x296   :  { %6893 = vmatprep.subr.mxu1 %v7993_v27  ;;  %6851 = vmatpush3.msra.mxu0 %v1738_v30  ;;  %v2259_v30 = vld [vmem:[#allocation2 + $0x240] sm:$0xff] }
 0x297   :  { %6894 = vmatpush3.msra.mxu1 %v9089_v41  ;;  %6852 = vmatprep.subr.mxu0 %v7993_v27  ;;  %v9381_v41 = vsub.f32 %v2263_v25, %v9363_v3  ;;  %v9387_v53 = vand.u32 4294901760, %v2259_v30  ;;  %v9398_v36 = vsub.f32 %v2260_v16, %v9375_v23  ;;  %v2253_v16 = vld [vmem:[#allocation2 + $0x210] sm:$0xff] }
 0x298   :  { %6895 = vmatprep.subr.mxu1 %v7993_v27  ;;  %6853 = vmatpush3.msra.mxu0 %v1745_v50  ;;  %v9370_v50 = vsub.f32 %v2265_v38, %v9358_v33 }
 0x299   :  { %6896 = vmatpush3.msra.mxu1 %v9098_v20  ;;  %6854 = vmatprep.subr.mxu0 %v7993_v27  ;;  %v2366_v20 = vsub.f32 %v9356_v61, %v2365_v4  ;;  %v2386_v55 = vand.u32 4294901760, %v9381_v41  ;;  %v9410_v5 = vsub.f32 %v2259_v30, %v9387_v53  ;;  %v2407_v51 = vand.u32 4294901760, %v9398_v36 }
 0x29a   :  { %6897 = vmatprep.subr.mxu1 %v7993_v27  ;;  %6855 = vmatpush3.msra.mxu0 %v1752_v56  ;;  %v9373_v56 = vand.u32 4294901760, %v2261_v15  ;;  %v2372_v43 = vand.u32 4294901760, %v9370_v50 }
 0x29b   :  { %6898 = vmatpush3.msra.mxu1 %v9110_v44  ;;  %6856 = vmatprep.subr.mxu0 %v7993_v27  ;;  %v2367_v60 = vand.u32 4294901760, %v2366_v20  ;;  %v2387_v18 = vsub.f32 %v9381_v41, %v2386_v55  ;;  %v2414_v40 = vand.u32 4294901760, %v9410_v5  ;;  %v2408_v2 = vsub.f32 %v9398_v36, %v2407_v51 }
 0x29c   :  { %6899 = vmatprep.subr.mxu1 %v7993_v27  ;;  %6857 = vmatpush3.msra.mxu0 %v1759_v39  ;;  %v9384_v39 = vsub.f32 %v2262_v35, %v9365_v10  ;;  %v9394_v44 = vsub.f32 %v2261_v15, %v9373_v56  ;;  %v2373_v52 = vsub.f32 %v9370_v50, %v2372_v43  ;;  %v9485_v15 = vand.u32 4294901760, %v2254_v1 }
 0x29d   :  { %6900 = vmatpush3.msra.mxu1 %v9124_v57  ;;  %6858 = vmatprep.subr.mxu0 %v7993_v27  ;;  %v2379_v57 = vand.u32 4294901760, %v9378_v13  ;;  %v2388_v48 = vand.u32 4294901760, %v2387_v18  ;;  %v2415_v31 = vsub.f32 %v9410_v5, %v2414_v40  ;;  %v2409_v58 = vand.u32 4294901760, %v2408_v2  ;;  %v2252_v18 = vld [vmem:[#allocation2 + $0x208] sm:$0xff] }
 0x29e   :  { %6901 = vmatprep.subr.mxu1 %v7993_v27  ;;  %6859 = vmatpush3.msra.mxu0 %v11393_v26  ;;  %v9457_v26 = vsub.f32 %v2257_v54, %v9450_v21 }
 0x29f   :  { %6902 = vmatpush3.msra.mxu1 %v9131_v24  ;;  %6860 = vmatprep.subr.mxu0 %v7993_v27  ;;  %v2393_v24 = vand.u32 4294901760, %v9384_v39  ;;  %v2380_v45 = vsub.f32 %v9378_v13, %v2379_v57  ;;  %v2416_v17 = vand.u32 4294901760, %v2415_v31 }
 0x2a0   :  { %6903 = vmatprep.subr.mxu1 %v7993_v27  ;;  %6861 = vmatpush3.msra.mxu0 %v11394_v7  ;;  %v9459_v7 = vand.u32 4294901760, %v2256_v9 }
 0x2a1   :  { %6904 = vmatpush3.msra.mxu1 %v9144_v46  ;;  %6862 = vmatprep.subr.mxu0 %v7993_v27  ;;  %v2400_v46 = vand.u32 4294901760, %v9394_v44  ;;  %v2394_v12 = vsub.f32 %v9384_v39, %v2393_v24  ;;  %v2381_v11 = vand.u32 4294901760, %v2380_v45  ;;  %v9496_v45 = vsub.f32 %v2254_v1, %v9485_v15 }
 0x2a2   :  { %6905 = vmatprep.subr.mxu1 %v7993_v27  ;;  %6863 = vmatpush3.msra.mxu0 %v11395_v62  ;;  %v2255_v62 = vld [vmem:[#allocation2 + $0x220] sm:$0xff] }
 0x2a3   :  { %6906 = vmatpush3.msra.mxu1 %v9154_v19  ;;  %6907 = vmatprep.mubr.msk.f32.mxu1 %vm7994_vm0, %v7993_v27  ;;  %v2374_v19 = vand.u32 4294901760, %v2373_v52  ;;  %v2401_v32 = vsub.f32 %v9394_v44, %v2400_v46  ;;  %v2395_v28 = vand.u32 4294901760, %v2394_v12  ;;  %v9492_v52 = vand.u32 4294901760, %v2253_v16 }
 0x2a4   :  { %6864 = vmatprep.subr.mxu0 %v7993_v27  ;;  %6908 = vmatmul.mubr.f32.vlgmr.msra.gmra.mxu1 %v9186_v34 }
 0x2a5   :  { %6865 = vmatpush3.msra.mxu0 %v11396_v22  ;;  %6872 = vmatprep.mubr.msk.f32.mxu0 %vm7994_vm0, %v7993_v27  ;;  %v2402_v47 = vand.u32 4294901760, %v2401_v32  ;;  %v11257_v32 = vand.u32 4294901760, %v9496_v45 }
 0x2a6   :  { %6866 = vmatprep.subr.mxu0 %v7993_v27  ;;  %6945 = vmatprep.subr.mxu1 %v7993_v27 }
 0x2a7   :  { %6867 = vmatpush3.msra.mxu0 %v11397_v8  ;;  %6977 = vmatprep.mubr.msk.f32.mxu1 %vm7994_vm0, %v7993_v27  ;;  %v2428_v8 = vand.u32 4294901760, %v9457_v26  ;;  %v2450_v54 = vsub.f32 %v9496_v45, %v11257_v32 }
 0x2a8   :  { %6868 = vmatprep.subr.mxu0 %v7993_v27  ;;  %6946 = vmatpush3.msra.mxu1 %v2367_v60 }
 0x2a9   :  { %6869 = vmatpush3.msra.mxu0 %v11398_v42  ;;  %6947 = vmatprep.subr.mxu1 %v7993_v27  ;;  %v9469_v42 = vsub.f32 %v2256_v9, %v9459_v7  ;;  %v2429_v29 = vsub.f32 %v9457_v26, %v2428_v8 }
 0x2aa   :  { %6870 = vmatprep.subr.mxu0 %v7993_v27  ;;  %6948 = vmatpush3.msra.mxu1 %v2374_v19 }
 0x2ab   :  { %6871 = vmatpush3.msra.mxu0 %v11399_v6  ;;  %6949 = vmatprep.subr.mxu1 %v7993_v27  ;;  %v9471_v6 = vand.u32 4294901760, %v2255_v62  ;;  %v11259_v25 = vand.u32 4294901760, %v9469_v42  ;;  %v2430_v30 = vand.u32 4294901760, %v2429_v29 }
 0x2ac   :  { %6873 = vmatmul.mubr.f32.vlgmr.msra.gmra.mxu0 %v9186_v34  ;;  %6910 = vmatprep.subr.mxu0 %v7993_v27  ;;  %v9448_v34 = vsub.f32 %v2258_v59, %v9442_v63 }
 0x2ad   :  { %6942 = vmatprep.mubr.msk.f32.mxu0 %vm7994_vm0, %v7993_v27  ;;  %6911 = vmatpush3.msra.mxu0 %v9353_v37  ;;  %v9481_v35 = vsub.f32 %v2255_v62, %v9471_v6  ;;  %v2436_v20 = vsub.f32 %v9469_v42, %v11259_v25  ;;  %v2451_v62 = vand.u32 4294901760, %v2450_v54 }
 0x2ae   :  { %6912 = vmatprep.subr.mxu0 %v7993_v27  ;;  %6950 = vmatpush3.msra.mxu1 %v2381_v11  ;;  %v2421_v49 = vand.u32 4294901760, %v9448_v34  ;;  %v9503_v11 = vsub.f32 %v2253_v16, %v9492_v52 }
 0x2af   :  { %6913 = vmatpush3.msra.mxu0 %v9358_v33  ;;  %6951 = vmatprep.subr.mxu1 %v7993_v27  ;;  %v11258_v60 = vand.u32 4294901760, %v9481_v35  ;;  %v2437_v19 = vand.u32 4294901760, %v2436_v20 }
 0x2b0   :  { %6914 = vmatprep.subr.mxu0 %v7993_v27  ;;  %6952 = vmatpush3.msra.mxu1 %v2388_v48  ;;  %v2422_v22 = vsub.f32 %v9448_v34, %v2421_v49  ;;  %v9505_v48 = vand.u32 4294901760, %v2252_v18  ;;  %v11256_v59 = vand.u32 4294901760, %v9503_v11 }
 0x2b1   :  { %6915 = vmatpush3.msra.mxu0 %v9361_v0  ;;  %6953 = vmatprep.subr.mxu1 %v7993_v27  ;;  %v2443_v12 = vsub.f32 %v9481_v35, %v11258_v60 }
 0x2b2   :  { %6916 = vmatprep.subr.mxu0 %v7993_v27  ;;  %6954 = vmatpush3.msra.mxu1 %v2395_v28  ;;  %v2423_v38 = vand.u32 4294901760, %v2422_v22  ;;  %v2251_v28 = vld [vmem:[#allocation2 + $0x200] sm:$0xff] }
 0x2b3   :  { %6917 = vmatpush3.msra.mxu0 %v9363_v3  ;;  %6955 = vmatprep.subr.mxu1 %v7993_v27  ;;  %v2444_v2 = vand.u32 4294901760, %v2443_v12  ;;  %v9515_v31 = vand.u32 4294901760, %v2251_v28 }
 0x2b4   :  { %6918 = vmatprep.subr.mxu0 %v7993_v27  ;;  %6956 = vmatpush3.msra.mxu1 %v2402_v47  ;;  %v9513_v47 = vsub.f32 %v2252_v18, %v9505_v48 }
 0x2b5   :  { %6919 = vmatpush3.msra.mxu0 %v9365_v10  ;;  %6957 = vmatprep.subr.mxu1 %v7993_v27 }
 0x2b6   :  { %6920 = vmatprep.subr.mxu0 %v7993_v27  ;;  %6958 = vmatpush3.msra.mxu1 %v2409_v58  ;;  %v2457_v58 = vsub.f32 %v9503_v11, %v11256_v59  ;;  %v11255_v9 = vand.u32 4294901760, %v9513_v47 }
 0x2b7   :  { %6921 = vmatpush3.msra.mxu0 %v9373_v56  ;;  %6959 = vmatprep.subr.mxu1 %v7993_v27 }
 0x2b8   :  { %6922 = vmatprep.subr.mxu0 %v7993_v27  ;;  %6960 = vmatpush3.msra.mxu1 %v2416_v17  ;;  %v9528_v17 = vsub.f32 %v2251_v28, %v9515_v31  ;;  %v2458_v22 = vand.u32 4294901760, %v2457_v58  ;;  %v2464_v1 = vsub.f32 %v9513_v47, %v11255_v9 }
 0x2b9   :  { %6923 = vmatpush3.msra.mxu0 %v9375_v23  ;;  %6961 = vmatprep.subr.mxu1 %v7993_v27 }
 0x2ba   :  { %6924 = vmatprep.subr.mxu0 %v7993_v27  ;;  %6962 = vmatpush3.msra.mxu1 %v2423_v38  ;;  %v11254_v38 = vand.u32 4294901760, %v9528_v17  ;;  %v2465_v29 = vand.u32 4294901760, %v2464_v1 }
 0x2bb   :  { %6925 = vmatpush3.msra.mxu0 %v9387_v53  ;;  %6963 = vmatprep.subr.mxu1 %v7993_v27 }
 0x2bc   :  { %6926 = vmatprep.subr.mxu0 %v7993_v27  ;;  %6964 = vmatpush3.msra.mxu1 %v2430_v30  ;;  %v2471_v16 = vsub.f32 %v9528_v17, %v11254_v38 }
 0x2bd   :  { %6927 = vmatpush3.msra.mxu0 %v9442_v63  ;;  %6965 = vmatprep.subr.mxu1 %v7993_v27 }
 0x2be   :  { %6928 = vmatprep.subr.mxu0 %v7993_v27  ;;  %6966 = vmatpush3.msra.mxu1 %v2437_v19  ;;  %v2472_v30 = vand.u32 4294901760, %v2471_v16 }
 0x2bf   :  { %6929 = vmatpush3.msra.mxu0 %v9450_v21  ;;  %6967 = vmatprep.subr.mxu1 %v7993_v27 }
 0x2c0   :  { %6930 = vmatprep.subr.mxu0 %v7993_v27  ;;  %6968 = vmatpush3.msra.mxu1 %v2444_v2 }
 0x2c1   :  { %6931 = vmatpush3.msra.mxu0 %v9459_v7  ;;  %6969 = vmatprep.subr.mxu1 %v7993_v27 }
 0x2c2   :  { %6932 = vmatprep.subr.mxu0 %v7993_v27  ;;  %6970 = vmatpush3.msra.mxu1 %v2451_v62  ;;  %v1607_v62 = vsub.s32 2, %v8819_v14 }
 0x2c3   :  { %6933 = vmatpush3.msra.mxu0 %v9471_v6  ;;  %6971 = vmatprep.subr.mxu1 %v7993_v27 }
 0x2c4   :  { %6934 = vmatprep.subr.mxu0 %v7993_v27  ;;  %6972 = vmatpush3.msra.mxu1 %v2458_v22  ;;  %v9546_v22 = vld [vmem:[#allocation2 + $0x480] sm:$0xff] }
 0x2c5   :  { %6935 = vmatpush3.msra.mxu0 %v9485_v15  ;;  %6973 = vmatprep.subr.mxu1 %v7993_v27  ;;  %v1608_v1 = vrot.slane %v9546_v22, %v1607_v62 }
 0x2c6   :  { %6936 = vmatprep.subr.mxu0 %v7993_v27  ;;  %6974 = vmatpush3.msra.mxu1 %v2465_v29 }
 0x2c7   :  { %6937 = vmatpush3.msra.mxu0 %v9492_v52  ;;  %6975 = vmatprep.subr.mxu1 %v7993_v27 }
 0x2c8   :  { %6938 = vmatprep.subr.mxu0 %v7993_v27  ;;  %6976 = vmatpush3.msra.mxu1 %v2472_v30 }
 0x2c9   :  { %6939 = vmatpush3.msra.mxu0 %v9505_v48  ;;  %7015 = vmatprep.subr.mxu1 %v7993_v27 }
 0x2ca   :  { %6940 = vmatprep.subr.mxu0 %v7993_v27 }
 0x2cb   :  { %6941 = vmatpush3.msra.mxu0 %v9515_v31 }
 0x2cc   :  { %6980 = vmatprep.subr.mxu0 %v7993_v27 }
 0x322   :  { %v1847_v20 = vpop.f32.mrf.mxu1 }
 0x324   :  { %v6769_v18 = vpop.f32.mrf.mxu1 }
 0x32a   :  { %v1696_v19 = vpop.f32.mrf.mxu0 }
 0x32b   :  { %v1697_v29 = vadd.f32 %v1696_v19, %v1608_v1  ;;  %v2920_v1 = vld [vmem:[#allocation2 + $0x2b8] sm:$0xff] }
 0x32c   :  { %v6734_v12 = vpop.f32.mrf.mxu0 }
 0x32d   :  { %v1848_v38 = vadd.f32 %v1847_v20, %v1697_v29 }
 0x342   :  { %v2040_v28 = vpop.f32.mrf.mxu1 }
 0x344   :  { %v6839_v2 = vpop.f32.mrf.mxu1 }
 0x34b   :  { %v1951_v54 = vpop.f32.mrf.mxu0 }
 0x34c   :  { %v1952_v9 = vadd.f32 %v1951_v54, %v1848_v38 }
 0x34d   :  { %v6804_v58 = vpop.f32.mrf.mxu0 }
 0x34e   :  { %v2041_v59 = vadd.f32 %v2040_v28, %v1952_v9 }
 0x364   :  { %v2246_v16 = vpop.f32.mrf.mxu1 }
 0x366   :  { %v6909_v30 = vpop.f32.mrf.mxu1 }
 0x367   :  { %v9805_v30 = vand.u32 4294901760, %v2920_v1 }
 0x36c   :  { %v2159_v32 = vpop.f32.mrf.mxu0 }
 0x36d   :  { %v2160_v18 = vadd.f32 %v2159_v32, %v2041_v59 }
 0x36e   :  { %v6874_v60 = vpop.f32.mrf.mxu0 }
 0x36f   :  { %v2247_v12 = vadd.f32 %v2246_v16, %v2160_v18  ;;  %v2919_v18 = vld [vmem:[#allocation2 + $0x2b0] sm:$0xff] }
 0x371   :  { %v2250_v25 = vmax.f32 %v2247_v12, 0.0 }
 0x373   :  { %v9549_v2 = vand.u32 4294901760, %v2250_v25 }
 0x375   :  { %v9552_v58 = vsub.f32 %v2250_v25, %v9549_v2  ;;  %6978 = vmatmul.mubr.f32.vlgmr.msra.gmra.mxu1 %v9549_v2 }
 0x376   :  { %7016 = vmatpush3.msra.mxu1 %v9353_v37  ;;  %7047 = vmatprep.mubr.msk.f32.mxu1 %vm7994_vm0, %v7993_v27 }
 0x377   :  { %v2354_v38 = vand.u32 4294901760, %v9552_v58  ;;  %7017 = vmatprep.subr.mxu1 %v7993_v27 }
 0x378   :  { %7018 = vmatpush3.msra.mxu1 %v9358_v33 }
 0x379   :  { %7019 = vmatprep.subr.mxu1 %v7993_v27  ;;  %v2355_v60 = vsub.f32 %v9552_v58, %v2354_v38 }
 0x37a   :  { %7020 = vmatpush3.msra.mxu1 %v9361_v0 }
 0x37b   :  { %7021 = vmatprep.subr.mxu1 %v7993_v27  ;;  %v2356_v25 = vand.u32 4294901760, %v2355_v60 }
 0x37c   :  { %7022 = vmatpush3.msra.mxu1 %v9363_v3 }
 0x37d   :  { %7023 = vmatprep.subr.mxu1 %v7993_v27  ;;  %6943 = vmatmul.mubr.f32.vlgmr.msra.gmra.mxu0 %v2356_v25 }
 0x37e   :  { %6981 = vmatpush3.msra.mxu0 %v9356_v61  ;;  %7024 = vmatpush3.msra.mxu1 %v9365_v10  ;;  %v11401_v61 = vand.u32 4294901760, %v9481_v35 }
 0x37f   :  { %6982 = vmatprep.subr.mxu0 %v7993_v27  ;;  %7025 = vmatprep.subr.mxu1 %v7993_v27 }
 0x380   :  { %6983 = vmatpush3.msra.mxu0 %v9370_v50  ;;  %7026 = vmatpush3.msra.mxu1 %v9373_v56 }
 0x381   :  { %6984 = vmatprep.subr.mxu0 %v7993_v27  ;;  %7027 = vmatprep.subr.mxu1 %v7993_v27 }
 0x382   :  { %6985 = vmatpush3.msra.mxu0 %v9378_v13  ;;  %7028 = vmatpush3.msra.mxu1 %v9375_v23 }
 0x383   :  { %6986 = vmatprep.subr.mxu0 %v7993_v27  ;;  %7029 = vmatprep.subr.mxu1 %v7993_v27 }
 0x384   :  { %6987 = vmatpush3.msra.mxu0 %v9381_v41  ;;  %7030 = vmatpush3.msra.mxu1 %v9387_v53  ;;  %v2926_v41 = vld [vmem:[#allocation2 + $0x2e8] sm:$0xff] }
 0x385   :  { %6988 = vmatprep.subr.mxu0 %v7993_v27  ;;  %7031 = vmatprep.subr.mxu1 %v7993_v27 }
 0x386   :  { %6989 = vmatpush3.msra.mxu0 %v9384_v39  ;;  %7032 = vmatpush3.msra.mxu1 %v9442_v63  ;;  %v2925_v39 = vld [vmem:[#allocation2 + $0x2e0] sm:$0xff] }
 0x387   :  { %6990 = vmatprep.subr.mxu0 %v7993_v27  ;;  %7033 = vmatprep.subr.mxu1 %v7993_v27 }
 0x388   :  { %6991 = vmatpush3.msra.mxu0 %v9394_v44  ;;  %7034 = vmatpush3.msra.mxu1 %v9450_v21  ;;  %v9726_v44 = vand.u32 4294901760, %v2925_v39 }
 0x389   :  { %6992 = vmatprep.subr.mxu0 %v7993_v27  ;;  %7035 = vmatprep.subr.mxu1 %v7993_v27 }
 0x38a   :  { %6993 = vmatpush3.msra.mxu0 %v9398_v36  ;;  %7036 = vmatpush3.msra.mxu1 %v9459_v7 }
 0x38b   :  { %6994 = vmatprep.subr.mxu0 %v7993_v27  ;;  %7037 = vmatprep.subr.mxu1 %v7993_v27 }
 0x38c   :  { %6995 = vmatpush3.msra.mxu0 %v9410_v5  ;;  %7038 = vmatpush3.msra.mxu1 %v9471_v6 }
 0x38d   :  { %6996 = vmatprep.subr.mxu0 %v7993_v27  ;;  %7039 = vmatprep.subr.mxu1 %v7993_v27 }
 0x38e   :  { %6997 = vmatpush3.msra.mxu0 %v9448_v34  ;;  %7040 = vmatpush3.msra.mxu1 %v9485_v15  ;;  %v9744_v34 = vsub.f32 %v2925_v39, %v9726_v44 }
 0x38f   :  { %6998 = vmatprep.subr.mxu0 %v7993_v27  ;;  %7041 = vmatprep.subr.mxu1 %v7993_v27 }
 0x390   :  { %6999 = vmatpush3.msra.mxu0 %v9457_v26  ;;  %7042 = vmatpush3.msra.mxu1 %v9492_v52 }
 0x391   :  { %7000 = vmatprep.subr.mxu0 %v7993_v27  ;;  %7043 = vmatprep.subr.mxu1 %v7993_v27 }
 0x392   :  { %7001 = vmatpush3.msra.mxu0 %v9469_v42  ;;  %7044 = vmatpush3.msra.mxu1 %v9505_v48 }
 0x393   :  { %7002 = vmatprep.subr.mxu0 %v7993_v27  ;;  %7045 = vmatprep.subr.mxu1 %v7993_v27 }
 0x394   :  { %7003 = vmatpush3.msra.mxu0 %v9481_v35  ;;  %7046 = vmatpush3.msra.mxu1 %v9515_v31  ;;  %v3048_v35 = vand.u32 4294901760, %v9744_v34 }
 0x395   :  { %7004 = vmatprep.subr.mxu0 %v7993_v27  ;;  %7048 = vmatmul.mubr.f32.vlgmr.msra.gmra.mxu1 %v2354_v38  ;;  %v2918_v38 = vld [vmem:[#allocation2 + $0x2a8] sm:$0xff] }
 0x396   :  { %7085 = vmatprep.subr.mxu1 %v7993_v27  ;;  %7005 = vmatpush3.msra.mxu0 %v9496_v45  ;;  %v3049_v59 = vsub.f32 %v9744_v34, %v3048_v35 }
 0x397   :  { %7086 = vmatpush3.msra.mxu1 %v9353_v37  ;;  %7006 = vmatprep.subr.mxu0 %v7993_v27  ;;  %v11400_v37 = vand.u32 4294901760, %v9469_v42 }
 0x398   :  { %7087 = vmatprep.subr.mxu1 %v7993_v27  ;;  %7007 = vmatpush3.msra.mxu0 %v9503_v11  ;;  %v3050_v20 = vand.u32 4294901760, %v3049_v59 }
 0x399   :  { %7088 = vmatpush3.msra.mxu1 %v9358_v33  ;;  %7008 = vmatprep.subr.mxu0 %v7993_v27  ;;  %v11402_v33 = vand.u32 4294901760, %v9496_v45 }
 0x39a   :  { %7089 = vmatprep.subr.mxu1 %v7993_v27  ;;  %7009 = vmatpush3.msra.mxu0 %v9513_v47 }
 0x39b   :  { %7090 = vmatpush3.msra.mxu1 %v9361_v0  ;;  %7010 = vmatprep.subr.mxu0 %v7993_v27  ;;  %v11403_v0 = vand.u32 4294901760, %v9503_v11 }
 0x39c   :  { %7091 = vmatprep.subr.mxu1 %v7993_v27  ;;  %7011 = vmatpush3.msra.mxu0 %v9528_v17 }
 0x39d   :  { %7012 = vmatprep.mubr.msk.f32.mxu0 %vm7994_vm0, %v7993_v27  ;;  %7092 = vmatpush3.msra.mxu1 %v9363_v3  ;;  %v11404_v3 = vand.u32 4294901760, %v9513_v47 }
 0x39e   :  { %7013 = vmatmul.mubr.f32.vlgmr.msra.gmra.mxu0 %v9552_v58  ;;  %7050 = vmatprep.subr.mxu0 %v7993_v27  ;;  %v9813_v58 = vand.u32 4294901760, %v2919_v18 }
 0x39f   :  { %7093 = vmatprep.subr.mxu1 %v7993_v27  ;;  %7051 = vmatpush3.msra.mxu0 %v2365_v4  ;;  %v2928_v4 = vld [vmem:[#allocation2 + $0x2f8] sm:$0xff] }
 0x3a0   :  { %7094 = vmatpush3.msra.mxu1 %v9365_v10  ;;  %7052 = vmatprep.subr.mxu0 %v7993_v27  ;;  %v11405_v10 = vand.u32 4294901760, %v9528_v17  ;;  %v9716_v50 = vand.u32 4294901760, %v2928_v4 }
 0x3a1   :  { %7095 = vmatprep.subr.mxu1 %v7993_v27  ;;  %7053 = vmatpush3.msra.mxu0 %v2372_v43  ;;  %v9724_v43 = vand.u32 4294901760, %v2926_v41 }
 0x3a2   :  { %7096 = vmatpush3.msra.mxu1 %v9373_v56  ;;  %7054 = vmatprep.subr.mxu0 %v7993_v27  ;;  %v2927_v56 = vld [vmem:[#allocation2 + $0x2f0] sm:$0xff] }
 0x3a3   :  { %7097 = vmatprep.subr.mxu1 %v7993_v27  ;;  %7055 = vmatpush3.msra.mxu0 %v2379_v57  ;;  %v9721_v13 = vand.u32 4294901760, %v2927_v56  ;;  %v2923_v57 = vld [vmem:[#allocation2 + $0x2d0] sm:$0xff] }
 0x3a4   :  { %7098 = vmatpush3.msra.mxu1 %v9375_v23  ;;  %7056 = vmatprep.subr.mxu0 %v7993_v27  ;;  %v9719_v23 = vsub.f32 %v2928_v4, %v9716_v50 }
 0x3a5   :  { %7099 = vmatprep.subr.mxu1 %v7993_v27  ;;  %7057 = vmatpush3.msra.mxu0 %v2386_v55  ;;  %v2922_v55 = vld [vmem:[#allocation2 + $0x2c8] sm:$0xff]  ;;  %v9733_v5 = vsub.f32 %v2927_v56, %v9721_v13  ;;  %v2916_v56 = vld [vmem:[#allocation2 + $0x298] sm:$0xff] }
 0x3a6   :  { %7100 = vmatpush3.msra.mxu1 %v9387_v53  ;;  %7058 = vmatprep.subr.mxu0 %v7993_v27  ;;  %v2924_v53 = vld [vmem:[#allocation2 + $0x2d8] sm:$0xff] }
 0x3a7   :  { %7101 = vmatprep.subr.mxu1 %v7993_v27  ;;  %7059 = vmatpush3.msra.mxu0 %v2393_v24  ;;  %v9728_v36 = vand.u32 4294901760, %v2924_v53  ;;  %v2921_v24 = vld [vmem:[#allocation2 + $0x2c0] sm:$0xff] }
 0x3a8   :  { %7102 = vmatpush3.msra.mxu1 %v9442_v63  ;;  %7060 = vmatprep.subr.mxu0 %v7993_v27  ;;  %v9741_v63 = vsub.f32 %v2926_v41, %v9724_v43 }
 0x3a9   :  { %7103 = vmatprep.subr.mxu1 %v7993_v27  ;;  %7061 = vmatpush3.msra.mxu0 %v2400_v46  ;;  %v3027_v46 = vand.u32 4294901760, %v9719_v23 }
 0x3aa   :  { %7104 = vmatpush3.msra.mxu1 %v9450_v21  ;;  %7062 = vmatprep.subr.mxu0 %v7993_v27  ;;  %v9747_v21 = vsub.f32 %v2924_v53, %v9728_v36 }
 0x3ab   :  { %7105 = vmatprep.subr.mxu1 %v7993_v27  ;;  %7063 = vmatpush3.msra.mxu0 %v2407_v51  ;;  %v9736_v51 = vand.u32 4294901760, %v2923_v57  ;;  %v3028_v26 = vsub.f32 %v9719_v23, %v3027_v46 }
 0x3ac   :  { %7106 = vmatpush3.msra.mxu1 %v9459_v7  ;;  %7064 = vmatprep.subr.mxu0 %v7993_v27  ;;  %v3034_v7 = vand.u32 4294901760, %v9733_v5 }
 0x3ad   :  { %7107 = vmatprep.subr.mxu1 %v7993_v27  ;;  %7065 = vmatpush3.msra.mxu0 %v2414_v40  ;;  %v9738_v40 = vand.u32 4294901760, %v2922_v55 }
 0x3ae   :  { %7108 = vmatpush3.msra.mxu1 %v9471_v6  ;;  %7066 = vmatprep.subr.mxu0 %v7993_v27  ;;  %v3041_v6 = vand.u32 4294901760, %v9741_v63  ;;  %v3035_v45 = vsub.f32 %v9733_v5, %v3034_v7 }
 0x3af   :  { %7109 = vmatprep.subr.mxu1 %v7993_v27  ;;  %7067 = vmatpush3.msra.mxu0 %v2421_v49  ;;  %v9750_v49 = vand.u32 4294901760, %v2921_v24  ;;  %v9761_v42 = vsub.f32 %v2922_v55, %v9738_v40  ;;  %v9848_v55 = vand.u32 4294901760, %v2916_v56 }
 0x3b0   :  { %7110 = vmatpush3.msra.mxu1 %v9485_v15  ;;  %7068 = vmatprep.subr.mxu0 %v7993_v27  ;;  %v3055_v15 = vand.u32 4294901760, %v9747_v21  ;;  %v3042_v32 = vsub.f32 %v9741_v63, %v3041_v6  ;;  %v3036_v47 = vand.u32 4294901760, %v3035_v45 }
 0x3b1   :  { %7111 = vmatprep.subr.mxu1 %v7993_v27  ;;  %7069 = vmatpush3.msra.mxu0 %v2428_v8  ;;  %v9757_v8 = vsub.f32 %v2923_v57, %v9736_v51  ;;  %v3069_v9 = vand.u32 4294901760, %v9761_v42  ;;  %v9859_v59 = vsub.f32 %v2916_v56, %v9848_v55 }
 0x3b2   :  { %7112 = vmatpush3.msra.mxu1 %v9492_v52  ;;  %7070 = vmatprep.subr.mxu0 %v7993_v27  ;;  %v3029_v52 = vand.u32 4294901760, %v3028_v26  ;;  %v3043_v17 = vand.u32 4294901760, %v3042_v32 }
 0x3b3   :  { %7113 = vmatprep.subr.mxu1 %v7993_v27  ;;  %7071 = vmatpush3.msra.mxu0 %v11400_v37  ;;  %v3062_v11 = vand.u32 4294901760, %v9757_v8  ;;  %v3070_v62 = vsub.f32 %v9761_v42, %v3069_v9  ;;  %v9820_v37 = vsub.f32 %v2919_v18, %v9813_v58 }
 0x3b4   :  { %7114 = vmatpush3.msra.mxu1 %v9505_v48  ;;  %7072 = vmatprep.subr.mxu0 %v7993_v27  ;;  %v9773_v48 = vsub.f32 %v2921_v24, %v9750_v49  ;;  %v2915_v24 = vld [vmem:[#allocation2 + $0x290] sm:$0xff] }
 0x3b5   :  { %7115 = vmatprep.subr.mxu1 %v7993_v27  ;;  %7073 = vmatpush3.msra.mxu0 %v11401_v61  ;;  %v3063_v19 = vsub.f32 %v9757_v8, %v3062_v11  ;;  %v3071_v12 = vand.u32 4294901760, %v3070_v62  ;;  %v9822_v61 = vand.u32 4294901760, %v2918_v38  ;;  %v9855_v32 = vand.u32 4294901760, %v2915_v24  ;;  %v2913_v62 = vld [vmem:[#allocation2 + $0x280] sm:$0xff] }
 0x3b6   :  { %7116 = vmatpush3.msra.mxu1 %v9515_v31  ;;  %7117 = vmatprep.mubr.msk.f32.mxu1 %vm7994_vm0, %v7993_v27  ;;  %v3056_v31 = vsub.f32 %v9747_v21, %v3055_v15  ;;  %v3076_v28 = vand.u32 4294901760, %v9773_v48  ;;  %v9878_v18 = vand.u32 4294901760, %v2913_v62 }
 0x3b7   :  { %7074 = vmatprep.subr.mxu0 %v7993_v27  ;;  %7118 = vmatmul.mubr.f32.vlgmr.msra.gmra.mxu1 %v9549_v2  ;;  %v3064_v29 = vand.u32 4294901760, %v3063_v19 }
 0x3b8   :  { %7075 = vmatpush3.msra.mxu0 %v11402_v33  ;;  %7082 = vmatprep.mubr.msk.f32.mxu0 %vm7994_vm0, %v7993_v27  ;;  %v3057_v54 = vand.u32 4294901760, %v3056_v31  ;;  %v3077_v16 = vsub.f32 %v9773_v48, %v3076_v28  ;;  %v2917_v33 = vld [vmem:[#allocation2 + $0x2a0] sm:$0xff] }
 0x3b9   :  { %7076 = vmatprep.subr.mxu0 %v7993_v27  ;;  %7155 = vmatprep.subr.mxu1 %v7993_v27  ;;  %v9834_v4 = vand.u32 4294901760, %v2917_v33 }
 0x3ba   :  { %7077 = vmatpush3.msra.mxu0 %v11403_v0  ;;  %7187 = vmatprep.mubr.msk.f32.mxu1 %vm7994_vm0, %v7993_v27  ;;  %v3078_v60 = vand.u32 4294901760, %v3077_v16 }
 0x3bb   :  { %7078 = vmatprep.subr.mxu0 %v7993_v27  ;;  %7156 = vmatpush3.msra.mxu1 %v3029_v52  ;;  %v9844_v57 = vsub.f32 %v2917_v33, %v9834_v4  ;;  %v9891_v33 = vsub.f32 %v2913_v62, %v9878_v18 }
 0x3bc   :  { %7079 = vmatpush3.msra.mxu0 %v11404_v3  ;;  %7157 = vmatprep.subr.mxu1 %v7993_v27  ;;  %v11266_v3 = vand.u32 4294901760, %v9820_v37 }
 0x3bd   :  { %7080 = vmatprep.subr.mxu0 %v7993_v27  ;;  %7158 = vmatpush3.msra.mxu1 %v3036_v47  ;;  %v11264_v45 = vand.u32 4294901760, %v9844_v57  ;;  %v2914_v47 = vld [vmem:[#allocation2 + $0x288] sm:$0xff] }
 0x3be   :  { %7081 = vmatpush3.msra.mxu0 %v11405_v10  ;;  %7159 = vmatprep.subr.mxu1 %v7993_v27  ;;  %v9832_v10 = vsub.f32 %v2918_v38, %v9822_v61  ;;  %v3091_v39 = vsub.f32 %v9820_v37, %v11266_v3  ;;  %v9868_v19 = vand.u32 4294901760, %v2914_v47 }
 0x3bf   :  { %7083 = vmatmul.mubr.f32.vlgmr.msra.gmra.mxu0 %v9549_v2  ;;  %7120 = vmatprep.subr.mxu0 %v7993_v27  ;;  %v9811_v2 = vsub.f32 %v2920_v1, %v9805_v30 }
 0x3c0   :  { %7152 = vmatprep.mubr.msk.f32.mxu0 %vm7994_vm0, %v7993_v27  ;;  %7121 = vmatpush3.msra.mxu0 %v9716_v50  ;;  %v11265_v53 = vand.u32 4294901760, %v9832_v10  ;;  %v3092_v26 = vand.u32 4294901760, %v3091_v39  ;;  %v9876_v16 = vsub.f32 %v2914_v47, %v9868_v19  ;;  %v11260_v39 = vand.u32 4294901760, %v9891_v33 }
 0x3c1   :  { %7122 = vmatprep.subr.mxu0 %v7993_v27  ;;  %7160 = vmatpush3.msra.mxu1 %v3043_v17  ;;  %v3083_v25 = vand.u32 4294901760, %v9811_v2  ;;  %v3105_v17 = vsub.f32 %v9844_v57, %v11264_v45 }
 0x3c2   :  { %7123 = vmatpush3.msra.mxu0 %v9721_v13  ;;  %7161 = vmatprep.subr.mxu1 %v7993_v27  ;;  %v3098_v52 = vsub.f32 %v9832_v10, %v11265_v53 }
 0x3c3   :  { %7124 = vmatprep.subr.mxu0 %v7993_v27  ;;  %7162 = vmatpush3.msra.mxu1 %v3050_v20  ;;  %v3084_v0 = vsub.f32 %v9811_v2, %v3083_v25  ;;  %v9866_v20 = vsub.f32 %v2915_v24, %v9855_v32  ;;  %v3106_v1 = vand.u32 4294901760, %v3105_v17 }
 0x3c4   :  { %7125 = vmatpush3.msra.mxu0 %v9724_v43  ;;  %7163 = vmatprep.subr.mxu1 %v7993_v27  ;;  %v3099_v31 = vand.u32 4294901760, %v3098_v52 }
 0x3c5   :  { %7126 = vmatprep.subr.mxu0 %v7993_v27  ;;  %7164 = vmatpush3.msra.mxu1 %v3057_v54  ;;  %v3085_v41 = vand.u32 4294901760, %v3084_v0  ;;  %v11263_v54 = vand.u32 4294901760, %v9859_v59 }
 0x3c6   :  { %7127 = vmatpush3.msra.mxu0 %v9726_v44  ;;  %7165 = vmatprep.subr.mxu1 %v7993_v27 }
 0x3c7   :  { %7128 = vmatprep.subr.mxu0 %v7993_v27  ;;  %7166 = vmatpush3.msra.mxu1 %v3064_v29  ;;  %v11262_v29 = vand.u32 4294901760, %v9866_v20 }
 0x3c8   :  { %7129 = vmatpush3.msra.mxu0 %v9728_v36  ;;  %7167 = vmatprep.subr.mxu1 %v7993_v27 }
 0x3c9   :  { %7130 = vmatprep.subr.mxu0 %v7993_v27  ;;  %7168 = vmatpush3.msra.mxu1 %v3071_v12  ;;  %v3112_v12 = vsub.f32 %v9859_v59, %v11263_v54  ;;  %v3119_v38 = vsub.f32 %v9866_v20, %v11262_v29 }
 0x3ca   :  { %7131 = vmatpush3.msra.mxu0 %v9736_v51  ;;  %7169 = vmatprep.subr.mxu1 %v7993_v27 }
 0x3cb   :  { %7132 = vmatprep.subr.mxu0 %v7993_v27  ;;  %7170 = vmatpush3.msra.mxu1 %v3078_v60  ;;  %v11261_v60 = vand.u32 4294901760, %v9876_v16  ;;  %v3113_v0 = vand.u32 4294901760, %v3112_v12  ;;  %v3120_v56 = vand.u32 4294901760, %v3119_v38 }
 0x3cc   :  { %7133 = vmatpush3.msra.mxu0 %v9738_v40  ;;  %7171 = vmatprep.subr.mxu1 %v7993_v27 }
 0x3cd   :  { %7134 = vmatprep.subr.mxu0 %v7993_v27  ;;  %7172 = vmatpush3.msra.mxu1 %v3085_v41  ;;  %v3126_v41 = vsub.f32 %v9876_v16, %v11261_v60 }
 0x3ce   :  { %7135 = vmatpush3.msra.mxu0 %v9750_v49  ;;  %7173 = vmatprep.subr.mxu1 %v7993_v27 }
 0x3cf   :  { %7136 = vmatprep.subr.mxu0 %v7993_v27  ;;  %7174 = vmatpush3.msra.mxu1 %v3092_v26  ;;  %v3127_v24 = vand.u32 4294901760, %v3126_v41  ;;  %v3133_v26 = vsub.f32 %v9891_v33, %v11260_v39  ;;  %v2269_v41 = vsub.s32 3, %v8819_v14 }
 0x3d0   :  { %7137 = vmatpush3.msra.mxu0 %v9805_v30  ;;  %7175 = vmatprep.subr.mxu1 %v7993_v27 }
 0x3d1   :  { %7138 = vmatprep.subr.mxu0 %v7993_v27  ;;  %7176 = vmatpush3.msra.mxu1 %v3099_v31  ;;  %v3134_v52 = vand.u32 4294901760, %v3133_v26 }
 0x3d2   :  { %7139 = vmatpush3.msra.mxu0 %v9813_v58  ;;  %7177 = vmatprep.subr.mxu1 %v7993_v27 }
 0x3d3   :  { %7140 = vmatprep.subr.mxu0 %v7993_v27  ;;  %7178 = vmatpush3.msra.mxu1 %v3106_v1 }
 0x3d4   :  { %7141 = vmatpush3.msra.mxu0 %v9822_v61  ;;  %7179 = vmatprep.subr.mxu1 %v7993_v27 }
 0x3d5   :  { %7142 = vmatprep.subr.mxu0 %v7993_v27  ;;  %7180 = vmatpush3.msra.mxu1 %v3113_v0 }
 0x3d6   :  { %7143 = vmatpush3.msra.mxu0 %v9834_v4  ;;  %7181 = vmatprep.subr.mxu1 %v7993_v27 }
 0x3d7   :  { %7144 = vmatprep.subr.mxu0 %v7993_v27  ;;  %7182 = vmatpush3.msra.mxu1 %v3120_v56  ;;  %v2270_v56 = vrot.slane %v9546_v22, %v2269_v41  ;;  %v3582_v41 = vld [vmem:[#allocation2 + $0x338] sm:$0xff] }
 0x3d8   :  { %7145 = vmatpush3.msra.mxu0 %v9848_v55  ;;  %7183 = vmatprep.subr.mxu1 %v7993_v27 }
 0x3d9   :  { %7146 = vmatprep.subr.mxu0 %v7993_v27  ;;  %7184 = vmatpush3.msra.mxu1 %v3127_v24 }
 0x3da   :  { %7147 = vmatpush3.msra.mxu0 %v9855_v32  ;;  %7185 = vmatprep.subr.mxu1 %v7993_v27 }
 0x3db   :  { %7148 = vmatprep.subr.mxu0 %v7993_v27  ;;  %7186 = vmatpush3.msra.mxu1 %v3134_v52 }
 0x3dc   :  { %7149 = vmatpush3.msra.mxu0 %v9868_v19  ;;  %7225 = vmatprep.subr.mxu1 %v7993_v27 }
 0x3dd   :  { %7150 = vmatprep.subr.mxu0 %v7993_v27 }
 0x3de   :  { %7151 = vmatpush3.msra.mxu0 %v9878_v18 }
 0x3df   :  { %7190 = vmatprep.subr.mxu0 %v7993_v27 }
 0x435   :  { %v2509_v47 = vpop.f32.mrf.mxu1 }
 0x437   :  { %v6979_v31 = vpop.f32.mrf.mxu1 }
 0x43d   :  { %v2358_v17 = vpop.f32.mrf.mxu0 }
 0x43e   :  { %v2359_v39 = vadd.f32 %v2358_v17, %v2270_v56 }
 0x43f   :  { %v6944_v62 = vpop.f32.mrf.mxu0 }
 0x440   :  { %v2510_v24 = vadd.f32 %v2509_v47, %v2359_v39 }
 0x455   :  { %v2702_v1 = vpop.f32.mrf.mxu1 }
 0x457   :  { %v7049_v12 = vpop.f32.mrf.mxu1 }
 0x45e   :  { %v2613_v38 = vpop.f32.mrf.mxu0 }
 0x45f   :  { %v2614_v29 = vadd.f32 %v2613_v38, %v2510_v24  ;;  %v10166_v24 = vand.u32 4294901760, %v3582_v41 }
 0x460   :  { %v7014_v0 = vpop.f32.mrf.mxu0 }
 0x461   :  { %v2703_v52 = vadd.f32 %v2702_v1, %v2614_v29 }
 0x477   :  { %v2908_v26 = vpop.f32.mrf.mxu1 }
 0x479   :  { %v7119_v60 = vpop.f32.mrf.mxu1 }
 0x47f   :  { %v2821_v54 = vpop.f32.mrf.mxu0 }
 0x480   :  { %v2822_v45 = vadd.f32 %v2821_v54, %v2703_v52  ;;  %v3581_v52 = vld [vmem:[#allocation2 + $0x330] sm:$0xff] }
 0x481   :  { %v7084_v53 = vpop.f32.mrf.mxu0 }
 0x482   :  { %v2909_v31 = vadd.f32 %v2908_v26, %v2822_v45 }
 0x484   :  { %v2912_v3 = vmax.f32 %v2909_v31, 0.0 }
 0x486   :  { %v9910_v62 = vand.u32 4294901760, %v2912_v3 }
 0x488   :  { %v9913_v12 = vsub.f32 %v2912_v3, %v9910_v62  ;;  %7188 = vmatmul.mubr.f32.vlgmr.msra.gmra.mxu1 %v9910_v62 }
 0x489   :  { %7226 = vmatpush3.msra.mxu1 %v9716_v50  ;;  %7257 = vmatprep.mubr.msk.f32.mxu1 %vm7994_vm0, %v7993_v27 }
 0x48a   :  { %v3016_v22 = vand.u32 4294901760, %v9913_v12  ;;  %7227 = vmatprep.subr.mxu1 %v7993_v27 }
 0x48b   :  { %7228 = vmatpush3.msra.mxu1 %v9721_v13 }
 0x48c   :  { %7229 = vmatprep.subr.mxu1 %v7993_v27  ;;  %v3017_v53 = vsub.f32 %v9913_v12, %v3016_v22 }
 0x48d   :  { %7230 = vmatpush3.msra.mxu1 %v9724_v43 }
 0x48e   :  { %7231 = vmatprep.subr.mxu1 %v7993_v27  ;;  %v3018_v3 = vand.u32 4294901760, %v3017_v53 }
 0x48f   :  { %7232 = vmatpush3.msra.mxu1 %v9726_v44 }
 0x490   :  { %7233 = vmatprep.subr.mxu1 %v7993_v27  ;;  %7153 = vmatmul.mubr.f32.vlgmr.msra.gmra.mxu0 %v3018_v3 }
 0x491   :  { %7191 = vmatpush3.msra.mxu0 %v9719_v23  ;;  %7234 = vmatpush3.msra.mxu1 %v9728_v36  ;;  %v11407_v23 = vand.u32 4294901760, %v9832_v10 }
 0x492   :  { %7192 = vmatprep.subr.mxu0 %v7993_v27  ;;  %7235 = vmatprep.subr.mxu1 %v7993_v27 }
 0x493   :  { %7193 = vmatpush3.msra.mxu0 %v9733_v5  ;;  %7236 = vmatpush3.msra.mxu1 %v9736_v51  ;;  %v3590_v5 = vld [vmem:[#allocation2 + $0x378] sm:$0xff] }
 0x494   :  { %7194 = vmatprep.subr.mxu0 %v7993_v27  ;;  %7237 = vmatprep.subr.mxu1 %v7993_v27 }
 0x495   :  { %7195 = vmatpush3.msra.mxu0 %v9741_v63  ;;  %7238 = vmatpush3.msra.mxu1 %v9738_v40 }
 0x496   :  { %7196 = vmatprep.subr.mxu0 %v7993_v27  ;;  %7239 = vmatprep.subr.mxu1 %v7993_v27 }
 0x497   :  { %7197 = vmatpush3.msra.mxu0 %v9744_v34  ;;  %7240 = vmatpush3.msra.mxu1 %v9750_v49 }
 0x498   :  { %7198 = vmatprep.subr.mxu0 %v7993_v27  ;;  %7241 = vmatprep.subr.mxu1 %v7993_v27 }
 0x499   :  { %7199 = vmatpush3.msra.mxu0 %v9747_v21  ;;  %7242 = vmatpush3.msra.mxu1 %v9805_v30  ;;  %v3588_v21 = vld [vmem:[#allocation2 + $0x368] sm:$0xff] }
 0x49a   :  { %7200 = vmatprep.subr.mxu0 %v7993_v27  ;;  %7243 = vmatprep.subr.mxu1 %v7993_v27 }
 0x49b   :  { %7201 = vmatpush3.msra.mxu0 %v9757_v8  ;;  %7244 = vmatpush3.msra.mxu1 %v9813_v58  ;;  %v10085_v8 = vand.u32 4294901760, %v3588_v21 }
 0x49c   :  { %7202 = vmatprep.subr.mxu0 %v7993_v27  ;;  %7245 = vmatprep.subr.mxu1 %v7993_v27 }
 0x49d   :  { %7203 = vmatpush3.msra.mxu0 %v9761_v42  ;;  %7246 = vmatpush3.msra.mxu1 %v9822_v61 }
 0x49e   :  { %7204 = vmatprep.subr.mxu0 %v7993_v27  ;;  %7247 = vmatprep.subr.mxu1 %v7993_v27 }
 0x49f   :  { %7205 = vmatpush3.msra.mxu0 %v9773_v48  ;;  %7248 = vmatpush3.msra.mxu1 %v9834_v4 }
 0x4a0   :  { %7206 = vmatprep.subr.mxu0 %v7993_v27  ;;  %7249 = vmatprep.subr.mxu1 %v7993_v27 }
 0x4a1   :  { %7207 = vmatpush3.msra.mxu0 %v9811_v2  ;;  %7250 = vmatpush3.msra.mxu1 %v9848_v55  ;;  %v10102_v2 = vsub.f32 %v3588_v21, %v10085_v8 }
 0x4a2   :  { %7208 = vmatprep.subr.mxu0 %v7993_v27  ;;  %7251 = vmatprep.subr.mxu1 %v7993_v27 }
 0x4a3   :  { %7209 = vmatpush3.msra.mxu0 %v9820_v37  ;;  %7252 = vmatpush3.msra.mxu1 %v9855_v32 }
 0x4a4   :  { %7210 = vmatprep.subr.mxu0 %v7993_v27  ;;  %7253 = vmatprep.subr.mxu1 %v7993_v27 }
 0x4a5   :  { %7211 = vmatpush3.msra.mxu0 %v9832_v10  ;;  %7254 = vmatpush3.msra.mxu1 %v9868_v19 }
 0x4a6   :  { %7212 = vmatprep.subr.mxu0 %v7993_v27  ;;  %7255 = vmatprep.subr.mxu1 %v7993_v27 }
 0x4a7   :  { %7213 = vmatpush3.msra.mxu0 %v9844_v57  ;;  %7256 = vmatpush3.msra.mxu1 %v9878_v18 }
 0x4a8   :  { %7214 = vmatprep.subr.mxu0 %v7993_v27  ;;  %7258 = vmatmul.mubr.f32.vlgmr.msra.gmra.mxu1 %v3016_v22  ;;  %v3580_v22 = vld [vmem:[#allocation2 + $0x328] sm:$0xff] }
 0x4a9   :  { %7295 = vmatprep.subr.mxu1 %v7993_v27  ;;  %7215 = vmatpush3.msra.mxu0 %v9859_v59 }
 0x4aa   :  { %7296 = vmatpush3.msra.mxu1 %v9716_v50  ;;  %7216 = vmatprep.subr.mxu0 %v7993_v27  ;;  %v11406_v50 = vand.u32 4294901760, %v9820_v37 }
 0x4ab   :  { %7297 = vmatprep.subr.mxu1 %v7993_v27  ;;  %7217 = vmatpush3.msra.mxu0 %v9866_v20 }
 0x4ac   :  { %7298 = vmatpush3.msra.mxu1 %v9721_v13  ;;  %7218 = vmatprep.subr.mxu0 %v7993_v27  ;;  %v11408_v13 = vand.u32 4294901760, %v9844_v57 }
 0x4ad   :  { %7299 = vmatprep.subr.mxu1 %v7993_v27  ;;  %7219 = vmatpush3.msra.mxu0 %v9876_v16 }
 0x4ae   :  { %7300 = vmatpush3.msra.mxu1 %v9724_v43  ;;  %7220 = vmatprep.subr.mxu0 %v7993_v27  ;;  %v11409_v43 = vand.u32 4294901760, %v9859_v59 }
 0x4af   :  { %7301 = vmatprep.subr.mxu1 %v7993_v27  ;;  %7221 = vmatpush3.msra.mxu0 %v9891_v33 }
 0x4b0   :  { %7222 = vmatprep.mubr.msk.f32.mxu0 %vm7994_vm0, %v7993_v27  ;;  %7302 = vmatpush3.msra.mxu1 %v9726_v44  ;;  %v11410_v44 = vand.u32 4294901760, %v9866_v20 }
 0x4b1   :  { %7223 = vmatmul.mubr.f32.vlgmr.msra.gmra.mxu0 %v9913_v12  ;;  %7260 = vmatprep.subr.mxu0 %v7993_v27  ;;  %v10174_v12 = vand.u32 4294901760, %v3581_v52 }
 0x4b2   :  { %7303 = vmatprep.subr.mxu1 %v7993_v27  ;;  %7261 = vmatpush3.msra.mxu0 %v3027_v46  ;;  %v11412_v46 = vand.u32 4294901760, %v9891_v33 }
 0x4b3   :  { %7304 = vmatpush3.msra.mxu1 %v9728_v36  ;;  %7262 = vmatprep.subr.mxu0 %v7993_v27  ;;  %v11411_v36 = vand.u32 4294901760, %v9876_v16 }
 0x4b4   :  { %7305 = vmatprep.subr.mxu1 %v7993_v27  ;;  %7263 = vmatpush3.msra.mxu0 %v3034_v7  ;;  %v3586_v7 = vld [vmem:[#allocation2 + $0x358] sm:$0xff] }
 0x4b5   :  { %7306 = vmatpush3.msra.mxu1 %v9736_v51  ;;  %7264 = vmatprep.subr.mxu0 %v7993_v27  ;;  %v10077_v51 = vand.u32 4294901760, %v3590_v5 }
 0x4b6   :  { %7307 = vmatprep.subr.mxu1 %v7993_v27  ;;  %7265 = vmatpush3.msra.mxu0 %v3041_v6  ;;  %v10089_v6 = vand.u32 4294901760, %v3586_v7 }
 0x4b7   :  { %7308 = vmatpush3.msra.mxu1 %v9738_v40  ;;  %7266 = vmatprep.subr.mxu0 %v7993_v27  ;;  %v3589_v40 = vld [vmem:[#allocation2 + $0x370] sm:$0xff]  ;;  %v10080_v63 = vsub.f32 %v3590_v5, %v10077_v51  ;;  %v3578_v5 = vld [vmem:[#allocation2 + $0x318] sm:$0xff] }
 0x4b8   :  { %7309 = vmatprep.subr.mxu1 %v7993_v27  ;;  %7267 = vmatpush3.msra.mxu0 %v3048_v35  ;;  %v10082_v34 = vand.u32 4294901760, %v3589_v40  ;;  %v3585_v35 = vld [vmem:[#allocation2 + $0x350] sm:$0xff] }
 0x4b9   :  { %7310 = vmatpush3.msra.mxu1 %v9750_v49  ;;  %7268 = vmatprep.subr.mxu0 %v7993_v27  ;;  %v3587_v49 = vld [vmem:[#allocation2 + $0x360] sm:$0xff]  ;;  %v3689_v48 = vand.u32 4294901760, %v10080_v63 }
 0x4ba   :  { %7311 = vmatprep.subr.mxu1 %v7993_v27  ;;  %7269 = vmatpush3.msra.mxu0 %v3055_v15  ;;  %v10087_v42 = vand.u32 4294901760, %v3587_v49  ;;  %v3584_v15 = vld [vmem:[#allocation2 + $0x348] sm:$0xff] }
 0x4bb   :  { %7312 = vmatpush3.msra.mxu1 %v9805_v30  ;;  %7270 = vmatprep.subr.mxu0 %v7993_v27  ;;  %v10099_v30 = vand.u32 4294901760, %v3584_v15 }
 0x4bc   :  { %7313 = vmatprep.subr.mxu1 %v7993_v27  ;;  %7271 = vmatpush3.msra.mxu0 %v3062_v11  ;;  %v3583_v11 = vld [vmem:[#allocation2 + $0x340] sm:$0xff] }
 0x4bd   :  { %7314 = vmatpush3.msra.mxu1 %v9813_v58  ;;  %7272 = vmatprep.subr.mxu0 %v7993_v27  ;;  %v10105_v58 = vsub.f32 %v3587_v49, %v10087_v42  ;;  %v10111_v37 = vand.u32 4294901760, %v3583_v11  ;;  %v10122_v57 = vsub.f32 %v3584_v15, %v10099_v30  ;;  %v3577_v15 = vld [vmem:[#allocation2 + $0x310] sm:$0xff] }
 0x4be   :  { %7315 = vmatprep.subr.mxu1 %v7993_v27  ;;  %7273 = vmatpush3.msra.mxu0 %v3069_v9  ;;  %v10094_v9 = vsub.f32 %v3589_v40, %v10082_v34 }
 0x4bf   :  { %7316 = vmatpush3.msra.mxu1 %v9822_v61  ;;  %7274 = vmatprep.subr.mxu0 %v7993_v27  ;;  %v3690_v61 = vsub.f32 %v10080_v63, %v3689_v48  ;;  %v3710_v45 = vand.u32 4294901760, %v10105_v58  ;;  %v10134_v54 = vsub.f32 %v3583_v11, %v10111_v37  ;;  %v3731_v33 = vand.u32 4294901760, %v10122_v57 }
 0x4c0   :  { %7317 = vmatprep.subr.mxu1 %v7993_v27  ;;  %7275 = vmatpush3.msra.mxu0 %v3076_v28  ;;  %v10097_v28 = vand.u32 4294901760, %v3585_v35  ;;  %v3696_v10 = vand.u32 4294901760, %v10094_v9 }
 0x4c1   :  { %7318 = vmatpush3.msra.mxu1 %v9834_v4  ;;  %7276 = vmatprep.subr.mxu0 %v7993_v27  ;;  %v3691_v59 = vand.u32 4294901760, %v3690_v61  ;;  %v3711_v16 = vsub.f32 %v10105_v58, %v3710_v45  ;;  %v3738_v1 = vand.u32 4294901760, %v10134_v54  ;;  %v3732_v0 = vsub.f32 %v10122_v57, %v3731_v33 }
 0x4c2   :  { %7319 = vmatprep.subr.mxu1 %v7993_v27  ;;  %7277 = vmatpush3.msra.mxu0 %v3083_v25  ;;  %v10108_v25 = vsub.f32 %v3586_v7, %v10089_v6  ;;  %v10118_v4 = vsub.f32 %v3585_v35, %v10097_v28  ;;  %v3697_v20 = vsub.f32 %v10094_v9, %v3696_v10  ;;  %v10209_v35 = vand.u32 4294901760, %v3578_v5 }
 0x4c3   :  { %7320 = vmatpush3.msra.mxu1 %v9848_v55  ;;  %7278 = vmatprep.subr.mxu0 %v7993_v27  ;;  %v3703_v55 = vand.u32 4294901760, %v10102_v2  ;;  %v3712_v47 = vand.u32 4294901760, %v3711_v16  ;;  %v3739_v26 = vsub.f32 %v10134_v54, %v3738_v1  ;;  %v3733_v31 = vand.u32 4294901760, %v3732_v0  ;;  %v3576_v16 = vld [vmem:[#allocation2 + $0x308] sm:$0xff] }
 0x4c4   :  { %7321 = vmatprep.subr.mxu1 %v7993_v27  ;;  %7279 = vmatpush3.msra.mxu0 %v11406_v50  ;;  %v10181_v50 = vsub.f32 %v3581_v52, %v10174_v12 }
 0x4c5   :  { %7322 = vmatpush3.msra.mxu1 %v9855_v32  ;;  %7280 = vmatprep.subr.mxu0 %v7993_v27  ;;  %v3717_v32 = vand.u32 4294901760, %v10108_v25  ;;  %v3704_v29 = vsub.f32 %v10102_v2, %v3703_v55  ;;  %v3740_v53 = vand.u32 4294901760, %v3739_v26 }
 0x4c6   :  { %7323 = vmatprep.subr.mxu1 %v7993_v27  ;;  %7281 = vmatpush3.msra.mxu0 %v11407_v23  ;;  %v10183_v23 = vand.u32 4294901760, %v3580_v22 }
 0x4c7   :  { %7324 = vmatpush3.msra.mxu1 %v9868_v19  ;;  %7282 = vmatprep.subr.mxu0 %v7993_v27  ;;  %v3724_v19 = vand.u32 4294901760, %v10118_v4  ;;  %v3718_v60 = vsub.f32 %v10108_v25, %v3717_v32  ;;  %v3705_v39 = vand.u32 4294901760, %v3704_v29  ;;  %v10220_v29 = vsub.f32 %v3578_v5, %v10209_v35 }
 0x4c8   :  { %7325 = vmatprep.subr.mxu1 %v7993_v27  ;;  %7283 = vmatpush3.msra.mxu0 %v11408_v13  ;;  %v3579_v13 = vld [vmem:[#allocation2 + $0x320] sm:$0xff] }
 0x4c9   :  { %7326 = vmatpush3.msra.mxu1 %v9878_v18  ;;  %7327 = vmatprep.mubr.msk.f32.mxu1 %vm7994_vm0, %v7993_v27  ;;  %v3698_v18 = vand.u32 4294901760, %v3697_v20  ;;  %v3725_v17 = vsub.f32 %v10118_v4, %v3724_v19  ;;  %v3719_v38 = vand.u32 4294901760, %v3718_v60  ;;  %v10216_v20 = vand.u32 4294901760, %v3577_v15 }
 0x4ca   :  { %7284 = vmatprep.subr.mxu0 %v7993_v27  ;;  %7328 = vmatmul.mubr.f32.vlgmr.msra.gmra.mxu1 %v9910_v62 }
 0x4cb   :  { %7285 = vmatpush3.msra.mxu0 %v11409_v43  ;;  %7292 = vmatprep.mubr.msk.f32.mxu0 %vm7994_vm0, %v7993_v27  ;;  %v3726_v56 = vand.u32 4294901760, %v3725_v17  ;;  %v11270_v17 = vand.u32 4294901760, %v10220_v29 }
 0x4cc   :  { %7286 = vmatprep.subr.mxu0 %v7993_v27  ;;  %7365 = vmatprep.subr.mxu1 %v7993_v27 }
 0x4cd   :  { %7287 = vmatpush3.msra.mxu0 %v11410_v44  ;;  %7397 = vmatprep.mubr.msk.f32.mxu1 %vm7994_vm0, %v7993_v27  ;;  %v3752_v44 = vand.u32 4294901760, %v10181_v50  ;;  %v3774_v52 = vsub.f32 %v10220_v29, %v11270_v17 }
 0x4ce   :  { %7288 = vmatprep.subr.mxu0 %v7993_v27  ;;  %7366 = vmatpush3.msra.mxu1 %v3691_v59 }
 0x4cf   :  { %7289 = vmatpush3.msra.mxu0 %v11411_v36  ;;  %7367 = vmatprep.subr.mxu1 %v7993_v27  ;;  %v10193_v36 = vsub.f32 %v3580_v22, %v10183_v23  ;;  %v3753_v21 = vsub.f32 %v10181_v50, %v3752_v44 }
 0x4d0   :  { %7290 = vmatprep.subr.mxu0 %v7993_v27  ;;  %7368 = vmatpush3.msra.mxu1 %v3698_v18 }
 0x4d1   :  { %7291 = vmatpush3.msra.mxu0 %v11412_v46  ;;  %7369 = vmatprep.subr.mxu1 %v7993_v27  ;;  %v10195_v46 = vand.u32 4294901760, %v3579_v13  ;;  %v11272_v49 = vand.u32 4294901760, %v10193_v36  ;;  %v3754_v11 = vand.u32 4294901760, %v3753_v21 }
 0x4d2   :  { %7293 = vmatmul.mubr.f32.vlgmr.msra.gmra.mxu0 %v9910_v62  ;;  %7330 = vmatprep.subr.mxu0 %v7993_v27  ;;  %v10172_v62 = vsub.f32 %v3582_v41, %v10166_v24 }
 0x4d3   :  { %7362 = vmatprep.mubr.msk.f32.mxu0 %vm7994_vm0, %v7993_v27  ;;  %7331 = vmatpush3.msra.mxu0 %v10077_v51  ;;  %v10205_v7 = vsub.f32 %v3579_v13, %v10195_v46  ;;  %v3760_v61 = vsub.f32 %v10193_v36, %v11272_v49  ;;  %v3775_v13 = vand.u32 4294901760, %v3774_v52 }
 0x4d4   :  { %7332 = vmatprep.subr.mxu0 %v7993_v27  ;;  %7370 = vmatpush3.msra.mxu1 %v3705_v39  ;;  %v3745_v3 = vand.u32 4294901760, %v10172_v62  ;;  %v10227_v39 = vsub.f32 %v3577_v15, %v10216_v20 }
 0x4d5   :  { %7333 = vmatpush3.msra.mxu0 %v10082_v34  ;;  %7371 = vmatprep.subr.mxu1 %v7993_v27  ;;  %v11271_v59 = vand.u32 4294901760, %v10205_v7  ;;  %v3761_v18 = vand.u32 4294901760, %v3760_v61 }
 0x4d6   :  { %7334 = vmatprep.subr.mxu0 %v7993_v27  ;;  %7372 = vmatpush3.msra.mxu1 %v3712_v47  ;;  %v3746_v43 = vsub.f32 %v10172_v62, %v3745_v3  ;;  %v10229_v47 = vand.u32 4294901760, %v3576_v16  ;;  %v11269_v41 = vand.u32 4294901760, %v10227_v39 }
 0x4d7   :  { %7335 = vmatpush3.msra.mxu0 %v10085_v8  ;;  %7373 = vmatprep.subr.mxu1 %v7993_v27  ;;  %v3767_v60 = vsub.f32 %v10205_v7, %v11271_v59 }
 0x4d8   :  { %7336 = vmatprep.subr.mxu0 %v7993_v27  ;;  %7374 = vmatpush3.msra.mxu1 %v3719_v38  ;;  %v3747_v40 = vand.u32 4294901760, %v3746_v43  ;;  %v3575_v38 = vld [vmem:[#allocation2 + $0x300] sm:$0xff] }
 0x4d9   :  { %7337 = vmatpush3.msra.mxu0 %v10087_v42  ;;  %7375 = vmatprep.subr.mxu1 %v7993_v27  ;;  %v3768_v0 = vand.u32 4294901760, %v3767_v60  ;;  %v10239_v26 = vand.u32 4294901760, %v3575_v38 }
 0x4da   :  { %7338 = vmatprep.subr.mxu0 %v7993_v27  ;;  %7376 = vmatpush3.msra.mxu1 %v3726_v56  ;;  %v10237_v56 = vsub.f32 %v3576_v16, %v10229_v47 }
 0x4db   :  { %7339 = vmatpush3.msra.mxu0 %v10089_v6  ;;  %7377 = vmatprep.subr.mxu1 %v7993_v27 }
 0x4dc   :  { %7340 = vmatprep.subr.mxu0 %v7993_v27  ;;  %7378 = vmatpush3.msra.mxu1 %v3733_v31  ;;  %v3781_v31 = vsub.f32 %v10227_v39, %v11269_v41  ;;  %v11268_v22 = vand.u32 4294901760, %v10237_v56 }
 0x4dd   :  { %7341 = vmatpush3.msra.mxu0 %v10097_v28  ;;  %7379 = vmatprep.subr.mxu1 %v7993_v27 }
 0x4de   :  { %7342 = vmatprep.subr.mxu0 %v7993_v27  ;;  %7380 = vmatpush3.msra.mxu1 %v3740_v53  ;;  %v10252_v53 = vsub.f32 %v3575_v38, %v10239_v26  ;;  %v3782_v43 = vand.u32 4294901760, %v3781_v31  ;;  %v3788_v5 = vsub.f32 %v10237_v56, %v11268_v22 }
 0x4df   :  { %7343 = vmatpush3.msra.mxu0 %v10099_v30  ;;  %7381 = vmatprep.subr.mxu1 %v7993_v27 }
 0x4e0   :  { %7344 = vmatprep.subr.mxu0 %v7993_v27  ;;  %7382 = vmatpush3.msra.mxu1 %v3747_v40  ;;  %v11267_v40 = vand.u32 4294901760, %v10252_v53  ;;  %v3789_v21 = vand.u32 4294901760, %v3788_v5 }
 0x4e1   :  { %7345 = vmatpush3.msra.mxu0 %v10111_v37  ;;  %7383 = vmatprep.subr.mxu1 %v7993_v27 }
 0x4e2   :  { %7346 = vmatprep.subr.mxu0 %v7993_v27  ;;  %7384 = vmatpush3.msra.mxu1 %v3754_v11  ;;  %v3795_v15 = vsub.f32 %v10252_v53, %v11267_v40 }
 0x4e3   :  { %7347 = vmatpush3.msra.mxu0 %v10166_v24  ;;  %7385 = vmatprep.subr.mxu1 %v7993_v27 }
 0x4e4   :  { %7348 = vmatprep.subr.mxu0 %v7993_v27  ;;  %7386 = vmatpush3.msra.mxu1 %v3761_v18  ;;  %v3796_v11 = vand.u32 4294901760, %v3795_v15 }
 0x4e5   :  { %7349 = vmatpush3.msra.mxu0 %v10174_v12  ;;  %7387 = vmatprep.subr.mxu1 %v7993_v27 }
 0x4e6   :  { %7350 = vmatprep.subr.mxu0 %v7993_v27  ;;  %7388 = vmatpush3.msra.mxu1 %v3768_v0 }
 0x4e7   :  { %7351 = vmatpush3.msra.mxu0 %v10183_v23  ;;  %7389 = vmatprep.subr.mxu1 %v7993_v27 }
 0x4e8   :  { %7352 = vmatprep.subr.mxu0 %v7993_v27  ;;  %7390 = vmatpush3.msra.mxu1 %v3775_v13  ;;  %v2931_v13 = vsub.s32 4, %v8819_v14 }
 0x4e9   :  { %7353 = vmatpush3.msra.mxu0 %v10195_v46  ;;  %7391 = vmatprep.subr.mxu1 %v7993_v27 }
 0x4ea   :  { %7354 = vmatprep.subr.mxu0 %v7993_v27  ;;  %7392 = vmatpush3.msra.mxu1 %v3782_v43  ;;  %v10270_v43 = vld [vmem:[#allocation2 + $0x480] sm:$0xff] }
 0x4eb   :  { %7355 = vmatpush3.msra.mxu0 %v10209_v35  ;;  %7393 = vmatprep.subr.mxu1 %v7993_v27  ;;  %v2932_v5 = vrot.slane %v10270_v43, %v2931_v13 }
 0x4ec   :  { %7356 = vmatprep.subr.mxu0 %v7993_v27  ;;  %7394 = vmatpush3.msra.mxu1 %v3789_v21 }
 0x4ed   :  { %7357 = vmatpush3.msra.mxu0 %v10216_v20  ;;  %7395 = vmatprep.subr.mxu1 %v7993_v27 }
 0x4ee   :  { %7358 = vmatprep.subr.mxu0 %v7993_v27  ;;  %7396 = vmatpush3.msra.mxu1 %v3796_v11 }
 0x4ef   :  { %7359 = vmatpush3.msra.mxu0 %v10229_v47  ;;  %7435 = vmatprep.subr.mxu1 %v7993_v27 }
 0x4f0   :  { %7360 = vmatprep.subr.mxu0 %v7993_v27 }
 0x4f1   :  { %7361 = vmatpush3.msra.mxu0 %v10239_v26 }
 0x4f2   :  { %7400 = vmatprep.subr.mxu0 %v7993_v27 }
 0x548   :  { %v3171_v61 = vpop.f32.mrf.mxu1 }
 0x54a   :  { %v7189_v16 = vpop.f32.mrf.mxu1 }
 0x550   :  { %v3020_v18 = vpop.f32.mrf.mxu0 }
 0x551   :  { %v3021_v21 = vadd.f32 %v3020_v18, %v2932_v5  ;;  %v4244_v5 = vld [vmem:[#allocation2 + $0x3b8] sm:$0xff] }
 0x552   :  { %v7154_v60 = vpop.f32.mrf.mxu0 }
 0x553   :  { %v3172_v40 = vadd.f32 %v3171_v61, %v3021_v21 }
 0x568   :  { %v3364_v38 = vpop.f32.mrf.mxu1 }
 0x56a   :  { %v7259_v0 = vpop.f32.mrf.mxu1 }
 0x571   :  { %v3275_v52 = vpop.f32.mrf.mxu0 }
 0x572   :  { %v3276_v22 = vadd.f32 %v3275_v52, %v3172_v40 }
 0x573   :  { %v7224_v31 = vpop.f32.mrf.mxu0 }
 0x574   :  { %v3365_v41 = vadd.f32 %v3364_v38, %v3276_v22 }
 0x58a   :  { %v3570_v15 = vpop.f32.mrf.mxu1 }
 0x58c   :  { %v7329_v11 = vpop.f32.mrf.mxu1 }
 0x58d   :  { %v10529_v11 = vand.u32 4294901760, %v4244_v5 }
 0x592   :  { %v3483_v17 = vpop.f32.mrf.mxu0 }
 0x593   :  { %v3484_v16 = vadd.f32 %v3483_v17, %v3365_v41 }
 0x594   :  { %v7294_v59 = vpop.f32.mrf.mxu0 }
 0x595   :  { %v3571_v60 = vadd.f32 %v3570_v15, %v3484_v16  ;;  %v4243_v16 = vld [vmem:[#allocation2 + $0x3b0] sm:$0xff] }
 0x597   :  { %v3574_v49 = vmax.f32 %v3571_v60, 0.0 }
 0x599   :  { %v10273_v0 = vand.u32 4294901760, %v3574_v49 }
 0x59b   :  { %v10276_v31 = vsub.f32 %v3574_v49, %v10273_v0  ;;  %7398 = vmatmul.mubr.f32.vlgmr.msra.gmra.mxu1 %v10273_v0 }
 0x59c   :  { %7436 = vmatpush3.msra.mxu1 %v10077_v51  ;;  %7467 = vmatprep.mubr.msk.f32.mxu1 %vm7994_vm0, %v7993_v27 }
 0x59d   :  { %v3678_v40 = vand.u32 4294901760, %v10276_v31  ;;  %7437 = vmatprep.subr.mxu1 %v7993_v27 }
 0x59e   :  { %7438 = vmatpush3.msra.mxu1 %v10082_v34 }
 0x59f   :  { %7439 = vmatprep.subr.mxu1 %v7993_v27  ;;  %v3679_v59 = vsub.f32 %v10276_v31, %v3678_v40 }
 0x5a0   :  { %7440 = vmatpush3.msra.mxu1 %v10085_v8 }
 0x5a1   :  { %7441 = vmatprep.subr.mxu1 %v7993_v27  ;;  %v3680_v49 = vand.u32 4294901760, %v3679_v59 }
 0x5a2   :  { %7442 = vmatpush3.msra.mxu1 %v10087_v42 }
 0x5a3   :  { %7443 = vmatprep.subr.mxu1 %v7993_v27  ;;  %7363 = vmatmul.mubr.f32.vlgmr.msra.gmra.mxu0 %v3680_v49 }
 0x5a4   :  { %7401 = vmatpush3.msra.mxu0 %v10080_v63  ;;  %7444 = vmatpush3.msra.mxu1 %v10089_v6  ;;  %v11414_v63 = vand.u32 4294901760, %v10205_v7 }
 0x5a5   :  { %7402 = vmatprep.subr.mxu0 %v7993_v27  ;;  %7445 = vmatprep.subr.mxu1 %v7993_v27 }
 0x5a6   :  { %7403 = vmatpush3.msra.mxu0 %v10094_v9  ;;  %7446 = vmatpush3.msra.mxu1 %v10097_v28 }
 0x5a7   :  { %7404 = vmatprep.subr.mxu0 %v7993_v27  ;;  %7447 = vmatprep.subr.mxu1 %v7993_v27 }
 0x5a8   :  { %7405 = vmatpush3.msra.mxu0 %v10102_v2  ;;  %7448 = vmatpush3.msra.mxu1 %v10099_v30 }
 0x5a9   :  { %7406 = vmatprep.subr.mxu0 %v7993_v27  ;;  %7449 = vmatprep.subr.mxu1 %v7993_v27 }
 0x5aa   :  { %7407 = vmatpush3.msra.mxu0 %v10105_v58  ;;  %7450 = vmatpush3.msra.mxu1 %v10111_v37  ;;  %v4250_v58 = vld [vmem:[#allocation2 + $0x3e8] sm:$0xff] }
 0x5ab   :  { %7408 = vmatprep.subr.mxu0 %v7993_v27  ;;  %7451 = vmatprep.subr.mxu1 %v7993_v27 }
 0x5ac   :  { %7409 = vmatpush3.msra.mxu0 %v10108_v25  ;;  %7452 = vmatpush3.msra.mxu1 %v10166_v24  ;;  %v4249_v25 = vld [vmem:[#allocation2 + $0x3e0] sm:$0xff] }
 0x5ad   :  { %7410 = vmatprep.subr.mxu0 %v7993_v27  ;;  %7453 = vmatprep.subr.mxu1 %v7993_v27 }
 0x5ae   :  { %7411 = vmatpush3.msra.mxu0 %v10118_v4  ;;  %7454 = vmatpush3.msra.mxu1 %v10174_v12  ;;  %v10450_v4 = vand.u32 4294901760, %v4249_v25 }
 0x5af   :  { %7412 = vmatprep.subr.mxu0 %v7993_v27  ;;  %7455 = vmatprep.subr.mxu1 %v7993_v27 }
 0x5b0   :  { %7413 = vmatpush3.msra.mxu0 %v10122_v57  ;;  %7456 = vmatpush3.msra.mxu1 %v10183_v23 }
 0x5b1   :  { %7414 = vmatprep.subr.mxu0 %v7993_v27  ;;  %7457 = vmatprep.subr.mxu1 %v7993_v27 }
 0x5b2   :  { %7415 = vmatpush3.msra.mxu0 %v10134_v54  ;;  %7458 = vmatpush3.msra.mxu1 %v10195_v46 }
 0x5b3   :  { %7416 = vmatprep.subr.mxu0 %v7993_v27  ;;  %7459 = vmatprep.subr.mxu1 %v7993_v27 }
 0x5b4   :  { %7417 = vmatpush3.msra.mxu0 %v10172_v62  ;;  %7460 = vmatpush3.msra.mxu1 %v10209_v35  ;;  %v10468_v62 = vsub.f32 %v4249_v25, %v10450_v4 }
 0x5b5   :  { %7418 = vmatprep.subr.mxu0 %v7993_v27  ;;  %7461 = vmatprep.subr.mxu1 %v7993_v27 }
 0x5b6   :  { %7419 = vmatpush3.msra.mxu0 %v10181_v50  ;;  %7462 = vmatpush3.msra.mxu1 %v10216_v20 }
 0x5b7   :  { %7420 = vmatprep.subr.mxu0 %v7993_v27  ;;  %7463 = vmatprep.subr.mxu1 %v7993_v27 }
 0x5b8   :  { %7421 = vmatpush3.msra.mxu0 %v10193_v36  ;;  %7464 = vmatpush3.msra.mxu1 %v10229_v47 }
 0x5b9   :  { %7422 = vmatprep.subr.mxu0 %v7993_v27  ;;  %7465 = vmatprep.subr.mxu1 %v7993_v27 }
 0x5ba   :  { %7423 = vmatpush3.msra.mxu0 %v10205_v7  ;;  %7466 = vmatpush3.msra.mxu1 %v10239_v26  ;;  %v4372_v7 = vand.u32 4294901760, %v10468_v62 }
 0x5bb   :  { %7424 = vmatprep.subr.mxu0 %v7993_v27  ;;  %7468 = vmatmul.mubr.f32.vlgmr.msra.gmra.mxu1 %v3678_v40  ;;  %v4242_v40 = vld [vmem:[#allocation2 + $0x3a8] sm:$0xff] }
 0x5bc   :  { %7505 = vmatprep.subr.mxu1 %v7993_v27  ;;  %7425 = vmatpush3.msra.mxu0 %v10220_v29  ;;  %v4373_v41 = vsub.f32 %v10468_v62, %v4372_v7 }
 0x5bd   :  { %7506 = vmatpush3.msra.mxu1 %v10077_v51  ;;  %7426 = vmatprep.subr.mxu0 %v7993_v27  ;;  %v11413_v51 = vand.u32 4294901760, %v10193_v36 }
 0x5be   :  { %7507 = vmatprep.subr.mxu1 %v7993_v27  ;;  %7427 = vmatpush3.msra.mxu0 %v10227_v39  ;;  %v4374_v61 = vand.u32 4294901760, %v4373_v41 }
 0x5bf   :  { %7508 = vmatpush3.msra.mxu1 %v10082_v34  ;;  %7428 = vmatprep.subr.mxu0 %v7993_v27  ;;  %v11415_v34 = vand.u32 4294901760, %v10220_v29 }
 0x5c0   :  { %7509 = vmatprep.subr.mxu1 %v7993_v27  ;;  %7429 = vmatpush3.msra.mxu0 %v10237_v56 }
 0x5c1   :  { %7510 = vmatpush3.msra.mxu1 %v10085_v8  ;;  %7430 = vmatprep.subr.mxu0 %v7993_v27  ;;  %v11416_v8 = vand.u32 4294901760, %v10227_v39 }
 0x5c2   :  { %7511 = vmatprep.subr.mxu1 %v7993_v27  ;;  %7431 = vmatpush3.msra.mxu0 %v10252_v53 }
 0x5c3   :  { %7432 = vmatprep.mubr.msk.f32.mxu0 %vm7994_vm0, %v7993_v27  ;;  %7512 = vmatpush3.msra.mxu1 %v10087_v42  ;;  %v11417_v42 = vand.u32 4294901760, %v10237_v56 }
 0x5c4   :  { %7433 = vmatmul.mubr.f32.vlgmr.msra.gmra.mxu0 %v10276_v31  ;;  %7470 = vmatprep.subr.mxu0 %v7993_v27  ;;  %v10537_v31 = vand.u32 4294901760, %v4243_v16 }
 0x5c5   :  { %7513 = vmatprep.subr.mxu1 %v7993_v27  ;;  %7471 = vmatpush3.msra.mxu0 %v3689_v48  ;;  %v4252_v48 = vld [vmem:[#allocation2 + $0x3f8] sm:$0xff] }
 0x5c6   :  { %7514 = vmatpush3.msra.mxu1 %v10089_v6  ;;  %7472 = vmatprep.subr.mxu0 %v7993_v27  ;;  %v11418_v6 = vand.u32 4294901760, %v10252_v53  ;;  %v10440_v9 = vand.u32 4294901760, %v4252_v48 }
 0x5c7   :  { %7515 = vmatprep.subr.mxu1 %v7993_v27  ;;  %7473 = vmatpush3.msra.mxu0 %v3696_v10  ;;  %v10448_v10 = vand.u32 4294901760, %v4250_v58 }
 0x5c8   :  { %7516 = vmatpush3.msra.mxu1 %v10097_v28  ;;  %7474 = vmatprep.subr.mxu0 %v7993_v27  ;;  %v4251_v28 = vld [vmem:[#allocation2 + $0x3f0] sm:$0xff] }
 0x5c9   :  { %7517 = vmatprep.subr.mxu1 %v7993_v27  ;;  %7475 = vmatpush3.msra.mxu0 %v3703_v55  ;;  %v10445_v2 = vand.u32 4294901760, %v4251_v28  ;;  %v4247_v55 = vld [vmem:[#allocation2 + $0x3d0] sm:$0xff] }
 0x5ca   :  { %7518 = vmatpush3.msra.mxu1 %v10099_v30  ;;  %7476 = vmatprep.subr.mxu0 %v7993_v27  ;;  %v10443_v30 = vsub.f32 %v4252_v48, %v10440_v9 }
 0x5cb   :  { %7519 = vmatprep.subr.mxu1 %v7993_v27  ;;  %7477 = vmatpush3.msra.mxu0 %v3710_v45  ;;  %v4246_v45 = vld [vmem:[#allocation2 + $0x3c8] sm:$0xff]  ;;  %v10457_v54 = vsub.f32 %v4251_v28, %v10445_v2  ;;  %v4240_v28 = vld [vmem:[#allocation2 + $0x398] sm:$0xff] }
 0x5cc   :  { %7520 = vmatpush3.msra.mxu1 %v10111_v37  ;;  %7478 = vmatprep.subr.mxu0 %v7993_v27  ;;  %v4248_v37 = vld [vmem:[#allocation2 + $0x3d8] sm:$0xff] }
 0x5cd   :  { %7521 = vmatprep.subr.mxu1 %v7993_v27  ;;  %7479 = vmatpush3.msra.mxu0 %v3717_v32  ;;  %v10452_v57 = vand.u32 4294901760, %v4248_v37  ;;  %v4245_v32 = vld [vmem:[#allocation2 + $0x3c0] sm:$0xff] }
 0x5ce   :  { %7522 = vmatpush3.msra.mxu1 %v10166_v24  ;;  %7480 = vmatprep.subr.mxu0 %v7993_v27  ;;  %v10465_v24 = vsub.f32 %v4250_v58, %v10448_v10 }
 0x5cf   :  { %7523 = vmatprep.subr.mxu1 %v7993_v27  ;;  %7481 = vmatpush3.msra.mxu0 %v3724_v19  ;;  %v4351_v19 = vand.u32 4294901760, %v10443_v30 }
 0x5d0   :  { %7524 = vmatpush3.msra.mxu1 %v10174_v12  ;;  %7482 = vmatprep.subr.mxu0 %v7993_v27  ;;  %v10471_v12 = vsub.f32 %v4248_v37, %v10452_v57 }
 0x5d1   :  { %7525 = vmatprep.subr.mxu1 %v7993_v27  ;;  %7483 = vmatpush3.msra.mxu0 %v3731_v33  ;;  %v10460_v33 = vand.u32 4294901760, %v4247_v55  ;;  %v4352_v50 = vsub.f32 %v10443_v30, %v4351_v19 }
 0x5d2   :  { %7526 = vmatpush3.msra.mxu1 %v10183_v23  ;;  %7484 = vmatprep.subr.mxu0 %v7993_v27  ;;  %v4358_v23 = vand.u32 4294901760, %v10457_v54 }
 0x5d3   :  { %7527 = vmatprep.subr.mxu1 %v7993_v27  ;;  %7485 = vmatpush3.msra.mxu0 %v3738_v1  ;;  %v10462_v1 = vand.u32 4294901760, %v4246_v45 }
 0x5d4   :  { %7528 = vmatpush3.msra.mxu1 %v10195_v46  ;;  %7486 = vmatprep.subr.mxu0 %v7993_v27  ;;  %v4365_v46 = vand.u32 4294901760, %v10465_v24  ;;  %v4359_v29 = vsub.f32 %v10457_v54, %v4358_v23 }
 0x5d5   :  { %7529 = vmatprep.subr.mxu1 %v7993_v27  ;;  %7487 = vmatpush3.msra.mxu0 %v3745_v3  ;;  %v10474_v3 = vand.u32 4294901760, %v4245_v32  ;;  %v10485_v36 = vsub.f32 %v4246_v45, %v10462_v1  ;;  %v10572_v45 = vand.u32 4294901760, %v4240_v28 }
 0x5d6   :  { %7530 = vmatpush3.msra.mxu1 %v10209_v35  ;;  %7488 = vmatprep.subr.mxu0 %v7993_v27  ;;  %v4379_v35 = vand.u32 4294901760, %v10471_v12  ;;  %v4366_v17 = vsub.f32 %v10465_v24, %v4365_v46  ;;  %v4360_v56 = vand.u32 4294901760, %v4359_v29 }
 0x5d7   :  { %7531 = vmatprep.subr.mxu1 %v7993_v27  ;;  %7489 = vmatpush3.msra.mxu0 %v3752_v44  ;;  %v10481_v44 = vsub.f32 %v4247_v55, %v10460_v33  ;;  %v4393_v22 = vand.u32 4294901760, %v10485_v36  ;;  %v10583_v41 = vsub.f32 %v4240_v28, %v10572_v45 }
 0x5d8   :  { %7532 = vmatpush3.msra.mxu1 %v10216_v20  ;;  %7490 = vmatprep.subr.mxu0 %v7993_v27  ;;  %v4353_v20 = vand.u32 4294901760, %v4352_v50  ;;  %v4367_v53 = vand.u32 4294901760, %v4366_v17 }
 0x5d9   :  { %7533 = vmatprep.subr.mxu1 %v7993_v27  ;;  %7491 = vmatpush3.msra.mxu0 %v11413_v51  ;;  %v4386_v39 = vand.u32 4294901760, %v10481_v44  ;;  %v4394_v13 = vsub.f32 %v10485_v36, %v4393_v22  ;;  %v10544_v51 = vsub.f32 %v4243_v16, %v10537_v31 }
 0x5da   :  { %7534 = vmatpush3.msra.mxu1 %v10229_v47  ;;  %7492 = vmatprep.subr.mxu0 %v7993_v27  ;;  %v10497_v47 = vsub.f32 %v4245_v32, %v10474_v3  ;;  %v4239_v32 = vld [vmem:[#allocation2 + $0x390] sm:$0xff] }
 0x5db   :  { %7535 = vmatprep.subr.mxu1 %v7993_v27  ;;  %7493 = vmatpush3.msra.mxu0 %v11414_v63  ;;  %v4387_v18 = vsub.f32 %v10481_v44, %v4386_v39  ;;  %v4395_v60 = vand.u32 4294901760, %v4394_v13  ;;  %v10546_v63 = vand.u32 4294901760, %v4242_v40  ;;  %v10579_v17 = vand.u32 4294901760, %v4239_v32  ;;  %v4237_v13 = vld [vmem:[#allocation2 + $0x380] sm:$0xff] }
 0x5dc   :  { %7536 = vmatpush3.msra.mxu1 %v10239_v26  ;;  %7537 = vmatprep.mubr.msk.f32.mxu1 %vm7994_vm0, %v7993_v27  ;;  %v4380_v26 = vsub.f32 %v10471_v12, %v4379_v35  ;;  %v4400_v38 = vand.u32 4294901760, %v10497_v47  ;;  %v10602_v16 = vand.u32 4294901760, %v4237_v13 }
 0x5dd   :  { %7494 = vmatprep.subr.mxu0 %v7993_v27  ;;  %7538 = vmatmul.mubr.f32.vlgmr.msra.gmra.mxu1 %v10273_v0  ;;  %v4388_v21 = vand.u32 4294901760, %v4387_v18 }
 0x5de   :  { %7495 = vmatpush3.msra.mxu0 %v11415_v34  ;;  %7502 = vmatprep.mubr.msk.f32.mxu0 %vm7994_vm0, %v7993_v27  ;;  %v4381_v52 = vand.u32 4294901760, %v4380_v26  ;;  %v4401_v15 = vsub.f32 %v10497_v47, %v4400_v38  ;;  %v4241_v34 = vld [vmem:[#allocation2 + $0x3a0] sm:$0xff] }
 0x5df   :  { %7496 = vmatprep.subr.mxu0 %v7993_v27  ;;  %7575 = vmatprep.subr.mxu1 %v7993_v27  ;;  %v10558_v48 = vand.u32 4294901760, %v4241_v34 }
 0x5e0   :  { %7497 = vmatpush3.msra.mxu0 %v11416_v8  ;;  %7607 = vmatprep.mubr.msk.f32.mxu1 %vm7994_vm0, %v7993_v27  ;;  %v4402_v59 = vand.u32 4294901760, %v4401_v15 }
 0x5e1   :  { %7498 = vmatprep.subr.mxu0 %v7993_v27  ;;  %7576 = vmatpush3.msra.mxu1 %v4353_v20  ;;  %v10568_v55 = vsub.f32 %v4241_v34, %v10558_v48  ;;  %v10615_v34 = vsub.f32 %v4237_v13, %v10602_v16 }
 0x5e2   :  { %7499 = vmatpush3.msra.mxu0 %v11417_v42  ;;  %7577 = vmatprep.subr.mxu1 %v7993_v27  ;;  %v11279_v42 = vand.u32 4294901760, %v10544_v51 }
 0x5e3   :  { %7500 = vmatprep.subr.mxu0 %v7993_v27  ;;  %7578 = vmatpush3.msra.mxu1 %v4360_v56  ;;  %v11277_v29 = vand.u32 4294901760, %v10568_v55  ;;  %v4238_v56 = vld [vmem:[#allocation2 + $0x388] sm:$0xff] }
 0x5e4   :  { %7501 = vmatpush3.msra.mxu0 %v11418_v6  ;;  %7579 = vmatprep.subr.mxu1 %v7993_v27  ;;  %v10556_v6 = vsub.f32 %v4242_v40, %v10546_v63  ;;  %v4415_v25 = vsub.f32 %v10544_v51, %v11279_v42  ;;  %v10592_v18 = vand.u32 4294901760, %v4238_v56 }
 0x5e5   :  { %7503 = vmatmul.mubr.f32.vlgmr.msra.gmra.mxu0 %v10273_v0  ;;  %7540 = vmatprep.subr.mxu0 %v7993_v27  ;;  %v10535_v0 = vsub.f32 %v4244_v5, %v10529_v11 }
 0x5e6   :  { %7572 = vmatprep.mubr.msk.f32.mxu0 %vm7994_vm0, %v7993_v27  ;;  %7541 = vmatpush3.msra.mxu0 %v10440_v9  ;;  %v11278_v37 = vand.u32 4294901760, %v10556_v6  ;;  %v4416_v50 = vand.u32 4294901760, %v4415_v25  ;;  %v10600_v15 = vsub.f32 %v4238_v56, %v10592_v18  ;;  %v11273_v25 = vand.u32 4294901760, %v10615_v34 }
 0x5e7   :  { %7542 = vmatprep.subr.mxu0 %v7993_v27  ;;  %7580 = vmatpush3.msra.mxu1 %v4367_v53  ;;  %v4407_v49 = vand.u32 4294901760, %v10535_v0  ;;  %v4429_v53 = vsub.f32 %v10568_v55, %v11277_v29 }
 0x5e8   :  { %7543 = vmatpush3.msra.mxu0 %v10445_v2  ;;  %7581 = vmatprep.subr.mxu1 %v7993_v27  ;;  %v4422_v20 = vsub.f32 %v10556_v6, %v11278_v37 }
 0x5e9   :  { %7544 = vmatprep.subr.mxu0 %v7993_v27  ;;  %7582 = vmatpush3.msra.mxu1 %v4374_v61  ;;  %v4408_v8 = vsub.f32 %v10535_v0, %v4407_v49  ;;  %v10590_v61 = vsub.f32 %v4239_v32, %v10579_v17  ;;  %v4430_v5 = vand.u32 4294901760, %v4429_v53 }
 0x5ea   :  { %7545 = vmatpush3.msra.mxu0 %v10448_v10  ;;  %7583 = vmatprep.subr.mxu1 %v7993_v27  ;;  %v4423_v26 = vand.u32 4294901760, %v4422_v20 }
 0x5eb   :  { %7546 = vmatprep.subr.mxu0 %v7993_v27  ;;  %7584 = vmatpush3.msra.mxu1 %v4381_v52  ;;  %v4409_v58 = vand.u32 4294901760, %v4408_v8  ;;  %v11276_v52 = vand.u32 4294901760, %v10583_v41 }
 0x5ec   :  { %7547 = vmatpush3.msra.mxu0 %v10450_v4  ;;  %7585 = vmatprep.subr.mxu1 %v7993_v27 }
 0x5ed   :  { %7548 = vmatprep.subr.mxu0 %v7993_v27  ;;  %7586 = vmatpush3.msra.mxu1 %v4388_v21  ;;  %v11275_v21 = vand.u32 4294901760, %v10590_v61 }
 0x5ee   :  { %7549 = vmatpush3.msra.mxu0 %v10452_v57  ;;  %7587 = vmatprep.subr.mxu1 %v7993_v27 }
 0x5ef   :  { %7550 = vmatprep.subr.mxu0 %v7993_v27  ;;  %7588 = vmatpush3.msra.mxu1 %v4395_v60  ;;  %v4436_v60 = vsub.f32 %v10583_v41, %v11276_v52  ;;  %v4443_v40 = vsub.f32 %v10590_v61, %v11275_v21 }
 0x5f0   :  { %7551 = vmatpush3.msra.mxu0 %v10460_v33  ;;  %7589 = vmatprep.subr.mxu1 %v7993_v27 }
 0x5f1   :  { %7552 = vmatprep.subr.mxu0 %v7993_v27  ;;  %7590 = vmatpush3.msra.mxu1 %v4402_v59  ;;  %v11274_v59 = vand.u32 4294901760, %v10600_v15  ;;  %v4437_v8 = vand.u32 4294901760, %v4436_v60  ;;  %v4444_v28 = vand.u32 4294901760, %v4443_v40 }
 0x5f2   :  { %7553 = vmatpush3.msra.mxu0 %v10462_v1  ;;  %7591 = vmatprep.subr.mxu1 %v7993_v27 }
 0x5f3   :  { %7554 = vmatprep.subr.mxu0 %v7993_v27  ;;  %7592 = vmatpush3.msra.mxu1 %v4409_v58  ;;  %v4450_v58 = vsub.f32 %v10600_v15, %v11274_v59 }
 0x5f4   :  { %7555 = vmatpush3.msra.mxu0 %v10474_v3  ;;  %7593 = vmatprep.subr.mxu1 %v7993_v27 }
 0x5f5   :  { %7556 = vmatprep.subr.mxu0 %v7993_v27  ;;  %7594 = vmatpush3.msra.mxu1 %v4416_v50  ;;  %v4451_v32 = vand.u32 4294901760, %v4450_v58  ;;  %v4457_v50 = vsub.f32 %v10615_v34, %v11273_v25  ;;  %v3593_v58 = vsub.s32 5, %v8819_v14 }
 0x5f6   :  { %7557 = vmatpush3.msra.mxu0 %v10529_v11  ;;  %7595 = vmatprep.subr.mxu1 %v7993_v27 }
 0x5f7   :  { %7558 = vmatprep.subr.mxu0 %v7993_v27  ;;  %7596 = vmatpush3.msra.mxu1 %v4423_v26  ;;  %v4458_v20 = vand.u32 4294901760, %v4457_v50 }
 0x5f8   :  { %7559 = vmatpush3.msra.mxu0 %v10537_v31  ;;  %7597 = vmatprep.subr.mxu1 %v7993_v27 }
 0x5f9   :  { %7560 = vmatprep.subr.mxu0 %v7993_v27  ;;  %7598 = vmatpush3.msra.mxu1 %v4430_v5 }
 0x5fa   :  { %7561 = vmatpush3.msra.mxu0 %v10546_v63  ;;  %7599 = vmatprep.subr.mxu1 %v7993_v27 }
 0x5fb   :  { %7562 = vmatprep.subr.mxu0 %v7993_v27  ;;  %7600 = vmatpush3.msra.mxu1 %v4437_v8 }
 0x5fc   :  { %7563 = vmatpush3.msra.mxu0 %v10558_v48  ;;  %7601 = vmatprep.subr.mxu1 %v7993_v27 }
 0x5fd   :  { %7564 = vmatprep.subr.mxu0 %v7993_v27  ;;  %7602 = vmatpush3.msra.mxu1 %v4444_v28  ;;  %v3594_v28 = vrot.slane %v10270_v43, %v3593_v58  ;;  %v4906_v58 = vld [vmem:[#allocation2 + $0x438] sm:$0xff] }
 0x5fe   :  { %7565 = vmatpush3.msra.mxu0 %v10572_v45  ;;  %7603 = vmatprep.subr.mxu1 %v7993_v27 }
 0x5ff   :  { %7566 = vmatprep.subr.mxu0 %v7993_v27  ;;  %7604 = vmatpush3.msra.mxu1 %v4451_v32 }
 0x600   :  { %7567 = vmatpush3.msra.mxu0 %v10579_v17  ;;  %7605 = vmatprep.subr.mxu1 %v7993_v27 }
 0x601   :  { %7568 = vmatprep.subr.mxu0 %v7993_v27  ;;  %7606 = vmatpush3.msra.mxu1 %v4458_v20 }
 0x602   :  { %7569 = vmatpush3.msra.mxu0 %v10592_v18  ;;  %7645 = vmatprep.subr.mxu1 %v7993_v27 }
 0x603   :  { %7570 = vmatprep.subr.mxu0 %v7993_v27 }
 0x604   :  { %7571 = vmatpush3.msra.mxu0 %v10602_v16 }
 0x605   :  { %7610 = vmatprep.subr.mxu0 %v7993_v27 }
 0x65b   :  { %v3833_v56 = vpop.f32.mrf.mxu1 }
 0x65d   :  { %v7399_v26 = vpop.f32.mrf.mxu1 }
 0x663   :  { %v3682_v53 = vpop.f32.mrf.mxu0 }
 0x664   :  { %v3683_v25 = vadd.f32 %v3682_v53, %v3594_v28 }
 0x665   :  { %v7364_v13 = vpop.f32.mrf.mxu0 }
 0x666   :  { %v3834_v32 = vadd.f32 %v3833_v56, %v3683_v25 }
 0x67b   :  { %v4026_v5 = vpop.f32.mrf.mxu1 }
 0x67d   :  { %v7469_v60 = vpop.f32.mrf.mxu1 }
 0x684   :  { %v3937_v40 = vpop.f32.mrf.mxu0 }
 0x685   :  { %v3938_v21 = vadd.f32 %v3937_v40, %v3834_v32  ;;  %v10890_v32 = vand.u32 4294901760, %v4906_v58 }
 0x686   :  { %v7434_v8 = vpop.f32.mrf.mxu0 }
 0x687   :  { %v4027_v20 = vadd.f32 %v4026_v5, %v3938_v21 }
 0x69d   :  { %v4232_v50 = vpop.f32.mrf.mxu1 }
 0x69f   :  { %v7539_v59 = vpop.f32.mrf.mxu1 }
 0x6a5   :  { %v4145_v52 = vpop.f32.mrf.mxu0 }
 0x6a6   :  { %v4146_v29 = vadd.f32 %v4145_v52, %v4027_v20  ;;  %v4905_v20 = vld [vmem:[#allocation2 + $0x430] sm:$0xff] }
 0x6a7   :  { %v7504_v37 = vpop.f32.mrf.mxu0 }
 0x6a8   :  { %v4233_v26 = vadd.f32 %v4232_v50, %v4146_v29 }
 0x6aa   :  { %v4236_v42 = vmax.f32 %v4233_v26, 0.0 }
 0x6ac   :  { %v10634_v13 = vand.u32 4294901760, %v4236_v42 }
 0x6ae   :  { %v10637_v60 = vsub.f32 %v4236_v42, %v10634_v13  ;;  %7608 = vmatmul.mubr.f32.vlgmr.msra.gmra.mxu1 %v10634_v13 }
 0x6af   :  { %7646 = vmatpush3.msra.mxu1 %v10440_v9  ;;  %7677 = vmatprep.mubr.msk.f32.mxu1 %vm7994_vm0, %v7993_v27 }
 0x6b0   :  { %v4340_v43 = vand.u32 4294901760, %v10637_v60  ;;  %7647 = vmatprep.subr.mxu1 %v7993_v27 }
 0x6b1   :  { %7648 = vmatpush3.msra.mxu1 %v10445_v2 }
 0x6b2   :  { %7649 = vmatprep.subr.mxu1 %v7993_v27  ;;  %v4341_v37 = vsub.f32 %v10637_v60, %v4340_v43 }
 0x6b3   :  { %7650 = vmatpush3.msra.mxu1 %v10448_v10 }
 0x6b4   :  { %7651 = vmatprep.subr.mxu1 %v7993_v27  ;;  %v4342_v42 = vand.u32 4294901760, %v4341_v37 }
 0x6b5   :  { %7652 = vmatpush3.msra.mxu1 %v10450_v4 }
 0x6b6   :  { %7653 = vmatprep.subr.mxu1 %v7993_v27  ;;  %7573 = vmatmul.mubr.f32.vlgmr.msra.gmra.mxu0 %v4342_v42 }
 0x6b7   :  { %7611 = vmatpush3.msra.mxu0 %v10443_v30  ;;  %7654 = vmatpush3.msra.mxu1 %v10452_v57  ;;  %v11420_v30 = vand.u32 4294901760, %v10556_v6 }
 0x6b8   :  { %7612 = vmatprep.subr.mxu0 %v7993_v27  ;;  %7655 = vmatprep.subr.mxu1 %v7993_v27 }
 0x6b9   :  { %7613 = vmatpush3.msra.mxu0 %v10457_v54  ;;  %7656 = vmatpush3.msra.mxu1 %v10460_v33  ;;  %v4914_v54 = vld [vmem:[#allocation2 + $0x478] sm:$0xff] }
 0x6ba   :  { %7614 = vmatprep.subr.mxu0 %v7993_v27  ;;  %7657 = vmatprep.subr.mxu1 %v7993_v27 }
 0x6bb   :  { %7615 = vmatpush3.msra.mxu0 %v10465_v24  ;;  %7658 = vmatpush3.msra.mxu1 %v10462_v1 }
 0x6bc   :  { %7616 = vmatprep.subr.mxu0 %v7993_v27  ;;  %7659 = vmatprep.subr.mxu1 %v7993_v27 }
 0x6bd   :  { %7617 = vmatpush3.msra.mxu0 %v10468_v62  ;;  %7660 = vmatpush3.msra.mxu1 %v10474_v3 }
 0x6be   :  { %7618 = vmatprep.subr.mxu0 %v7993_v27  ;;  %7661 = vmatprep.subr.mxu1 %v7993_v27 }
 0x6bf   :  { %7619 = vmatpush3.msra.mxu0 %v10471_v12  ;;  %7662 = vmatpush3.msra.mxu1 %v10529_v11  ;;  %v4912_v12 = vld [vmem:[#allocation2 + $0x468] sm:$0xff] }
 0x6c0   :  { %7620 = vmatprep.subr.mxu0 %v7993_v27  ;;  %7663 = vmatprep.subr.mxu1 %v7993_v27 }
 0x6c1   :  { %7621 = vmatpush3.msra.mxu0 %v10481_v44  ;;  %7664 = vmatpush3.msra.mxu1 %v10537_v31  ;;  %v10809_v44 = vand.u32 4294901760, %v4912_v12 }
 0x6c2   :  { %7622 = vmatprep.subr.mxu0 %v7993_v27  ;;  %7665 = vmatprep.subr.mxu1 %v7993_v27 }
 0x6c3   :  { %7623 = vmatpush3.msra.mxu0 %v10485_v36  ;;  %7666 = vmatpush3.msra.mxu1 %v10546_v63 }
 0x6c4   :  { %7624 = vmatprep.subr.mxu0 %v7993_v27  ;;  %7667 = vmatprep.subr.mxu1 %v7993_v27 }
 0x6c5   :  { %7625 = vmatpush3.msra.mxu0 %v10497_v47  ;;  %7668 = vmatpush3.msra.mxu1 %v10558_v48 }
 0x6c6   :  { %7626 = vmatprep.subr.mxu0 %v7993_v27  ;;  %7669 = vmatprep.subr.mxu1 %v7993_v27 }
 0x6c7   :  { %7627 = vmatpush3.msra.mxu0 %v10535_v0  ;;  %7670 = vmatpush3.msra.mxu1 %v10572_v45  ;;  %v10826_v0 = vsub.f32 %v4912_v12, %v10809_v44 }
 0x6c8   :  { %7628 = vmatprep.subr.mxu0 %v7993_v27  ;;  %7671 = vmatprep.subr.mxu1 %v7993_v27 }
 0x6c9   :  { %7629 = vmatpush3.msra.mxu0 %v10544_v51  ;;  %7672 = vmatpush3.msra.mxu1 %v10579_v17 }
 0x6ca   :  { %7630 = vmatprep.subr.mxu0 %v7993_v27  ;;  %7673 = vmatprep.subr.mxu1 %v7993_v27 }
 0x6cb   :  { %7631 = vmatpush3.msra.mxu0 %v10556_v6  ;;  %7674 = vmatpush3.msra.mxu1 %v10592_v18 }
 0x6cc   :  { %7632 = vmatprep.subr.mxu0 %v7993_v27  ;;  %7675 = vmatprep.subr.mxu1 %v7993_v27 }
 0x6cd   :  { %7633 = vmatpush3.msra.mxu0 %v10568_v55  ;;  %7676 = vmatpush3.msra.mxu1 %v10602_v16 }
 0x6ce   :  { %7634 = vmatprep.subr.mxu0 %v7993_v27  ;;  %7678 = vmatmul.mubr.f32.vlgmr.msra.gmra.mxu1 %v4340_v43  ;;  %v4904_v43 = vld [vmem:[#allocation2 + $0x428] sm:$0xff] }
 0x6cf   :  { %7715 = vmatprep.subr.mxu1 %v7993_v27  ;;  %7635 = vmatpush3.msra.mxu0 %v10583_v41 }
 0x6d0   :  { %7716 = vmatpush3.msra.mxu1 %v10440_v9  ;;  %7636 = vmatprep.subr.mxu0 %v7993_v27  ;;  %v11419_v9 = vand.u32 4294901760, %v10544_v51 }
 0x6d1   :  { %7717 = vmatprep.subr.mxu1 %v7993_v27  ;;  %7637 = vmatpush3.msra.mxu0 %v10590_v61 }
 0x6d2   :  { %7718 = vmatpush3.msra.mxu1 %v10445_v2  ;;  %7638 = vmatprep.subr.mxu0 %v7993_v27  ;;  %v11421_v2 = vand.u32 4294901760, %v10568_v55 }
 0x6d3   :  { %7719 = vmatprep.subr.mxu1 %v7993_v27  ;;  %7639 = vmatpush3.msra.mxu0 %v10600_v15 }
 0x6d4   :  { %7720 = vmatpush3.msra.mxu1 %v10448_v10  ;;  %7640 = vmatprep.subr.mxu0 %v7993_v27  ;;  %v11422_v10 = vand.u32 4294901760, %v10583_v41 }
 0x6d5   :  { %7721 = vmatprep.subr.mxu1 %v7993_v27  ;;  %7641 = vmatpush3.msra.mxu0 %v10615_v34 }
 0x6d6   :  { %7642 = vmatprep.mubr.msk.f32.mxu0 %vm7994_vm0, %v7993_v27  ;;  %7722 = vmatpush3.msra.mxu1 %v10450_v4  ;;  %v11423_v4 = vand.u32 4294901760, %v10590_v61 }
 0x6d7   :  { %7643 = vmatmul.mubr.f32.vlgmr.msra.gmra.mxu0 %v10637_v60  ;;  %7680 = vmatprep.subr.mxu0 %v7993_v27  ;;  %v10898_v60 = vand.u32 4294901760, %v4905_v20 }
 0x6d8   :  { %7723 = vmatprep.subr.mxu1 %v7993_v27  ;;  %7681 = vmatpush3.msra.mxu0 %v4351_v19  ;;  %v11425_v19 = vand.u32 4294901760, %v10615_v34 }
 0x6d9   :  { %7724 = vmatpush3.msra.mxu1 %v10452_v57  ;;  %7682 = vmatprep.subr.mxu0 %v7993_v27  ;;  %v11424_v57 = vand.u32 4294901760, %v10600_v15 }
 0x6da   :  { %7725 = vmatprep.subr.mxu1 %v7993_v27  ;;  %7683 = vmatpush3.msra.mxu0 %v4358_v23  ;;  %v4910_v23 = vld [vmem:[#allocation2 + $0x458] sm:$0xff] }
 0x6db   :  { %7726 = vmatpush3.msra.mxu1 %v10460_v33  ;;  %7684 = vmatprep.subr.mxu0 %v7993_v27  ;;  %v10801_v33 = vand.u32 4294901760, %v4914_v54 }
 0x6dc   :  { %7727 = vmatprep.subr.mxu1 %v7993_v27  ;;  %7685 = vmatpush3.msra.mxu0 %v4365_v46  ;;  %v10813_v46 = vand.u32 4294901760, %v4910_v23 }
 0x6dd   :  { %7728 = vmatpush3.msra.mxu1 %v10462_v1  ;;  %7686 = vmatprep.subr.mxu0 %v7993_v27  ;;  %v4913_v1 = vld [vmem:[#allocation2 + $0x470] sm:$0xff]  ;;  %v10804_v24 = vsub.f32 %v4914_v54, %v10801_v33  ;;  %v4902_v54 = vld [vmem:[#allocation2 + $0x418] sm:$0xff] }
 0x6de   :  { %7729 = vmatprep.subr.mxu1 %v7993_v27  ;;  %7687 = vmatpush3.msra.mxu0 %v4372_v7  ;;  %v10806_v62 = vand.u32 4294901760, %v4913_v1  ;;  %v4909_v7 = vld [vmem:[#allocation2 + $0x450] sm:$0xff] }
 0x6df   :  { %7730 = vmatpush3.msra.mxu1 %v10474_v3  ;;  %7688 = vmatprep.subr.mxu0 %v7993_v27  ;;  %v4911_v3 = vld [vmem:[#allocation2 + $0x460] sm:$0xff]  ;;  %v5013_v47 = vand.u32 4294901760, %v10804_v24 }
 0x6e0   :  { %7731 = vmatprep.subr.mxu1 %v7993_v27  ;;  %7689 = vmatpush3.msra.mxu0 %v4379_v35  ;;  %v10811_v36 = vand.u32 4294901760, %v4911_v3  ;;  %v4908_v35 = vld [vmem:[#allocation2 + $0x448] sm:$0xff] }
 0x6e1   :  { %7732 = vmatpush3.msra.mxu1 %v10529_v11  ;;  %7690 = vmatprep.subr.mxu0 %v7993_v27  ;;  %v10823_v11 = vand.u32 4294901760, %v4908_v35 }
 0x6e2   :  { %7733 = vmatprep.subr.mxu1 %v7993_v27  ;;  %7691 = vmatpush3.msra.mxu0 %v4386_v39  ;;  %v4907_v39 = vld [vmem:[#allocation2 + $0x440] sm:$0xff] }
 0x6e3   :  { %7734 = vmatpush3.msra.mxu1 %v10537_v31  ;;  %7692 = vmatprep.subr.mxu0 %v7993_v27  ;;  %v10829_v31 = vsub.f32 %v4911_v3, %v10811_v36  ;;  %v10835_v51 = vand.u32 4294901760, %v4907_v39  ;;  %v10846_v55 = vsub.f32 %v4908_v35, %v10823_v11  ;;  %v4901_v35 = vld [vmem:[#allocation2 + $0x410] sm:$0xff] }
 0x6e4   :  { %7735 = vmatprep.subr.mxu1 %v7993_v27  ;;  %7693 = vmatpush3.msra.mxu0 %v4393_v22  ;;  %v10818_v22 = vsub.f32 %v4913_v1, %v10806_v62 }
 0x6e5   :  { %7736 = vmatpush3.msra.mxu1 %v10546_v63  ;;  %7694 = vmatprep.subr.mxu0 %v7993_v27  ;;  %v5014_v63 = vsub.f32 %v10804_v24, %v5013_v47  ;;  %v5034_v29 = vand.u32 4294901760, %v10829_v31  ;;  %v10858_v52 = vsub.f32 %v4907_v39, %v10835_v51  ;;  %v5055_v34 = vand.u32 4294901760, %v10846_v55 }
 0x6e6   :  { %7737 = vmatprep.subr.mxu1 %v7993_v27  ;;  %7695 = vmatpush3.msra.mxu0 %v4400_v38  ;;  %v10821_v38 = vand.u32 4294901760, %v4909_v7  ;;  %v5020_v6 = vand.u32 4294901760, %v10818_v22 }
 0x6e7   :  { %7738 = vmatpush3.msra.mxu1 %v10558_v48  ;;  %7696 = vmatprep.subr.mxu0 %v7993_v27  ;;  %v5015_v41 = vand.u32 4294901760, %v5014_v63  ;;  %v5035_v15 = vsub.f32 %v10829_v31, %v5034_v29  ;;  %v5062_v5 = vand.u32 4294901760, %v10858_v52  ;;  %v5056_v8 = vsub.f32 %v10846_v55, %v5055_v34 }
 0x6e8   :  { %7739 = vmatprep.subr.mxu1 %v7993_v27  ;;  %7697 = vmatpush3.msra.mxu0 %v4407_v49  ;;  %v10832_v49 = vsub.f32 %v4910_v23, %v10813_v46  ;;  %v10842_v48 = vsub.f32 %v4909_v7, %v10821_v38  ;;  %v5021_v61 = vsub.f32 %v10818_v22, %v5020_v6  ;;  %v10933_v7 = vand.u32 4294901760, %v4902_v54 }
 0x6e9   :  { %7740 = vmatpush3.msra.mxu1 %v10572_v45  ;;  %7698 = vmatprep.subr.mxu0 %v7993_v27  ;;  %v5027_v45 = vand.u32 4294901760, %v10826_v0  ;;  %v5036_v56 = vand.u32 4294901760, %v5035_v15  ;;  %v5063_v50 = vsub.f32 %v10858_v52, %v5062_v5  ;;  %v5057_v26 = vand.u32 4294901760, %v5056_v8  ;;  %v4900_v15 = vld [vmem:[#allocation2 + $0x408] sm:$0xff] }
 0x6ea   :  { %7741 = vmatprep.subr.mxu1 %v7993_v27  ;;  %7699 = vmatpush3.msra.mxu0 %v11419_v9  ;;  %v10905_v9 = vsub.f32 %v4905_v20, %v10898_v60 }
 0x6eb   :  { %7742 = vmatpush3.msra.mxu1 %v10579_v17  ;;  %7700 = vmatprep.subr.mxu0 %v7993_v27  ;;  %v5041_v17 = vand.u32 4294901760, %v10832_v49  ;;  %v5028_v21 = vsub.f32 %v10826_v0, %v5027_v45  ;;  %v5064_v37 = vand.u32 4294901760, %v5063_v50 }
 0x6ec   :  { %7743 = vmatprep.subr.mxu1 %v7993_v27  ;;  %7701 = vmatpush3.msra.mxu0 %v11420_v30  ;;  %v10907_v30 = vand.u32 4294901760, %v4904_v43 }
 0x6ed   :  { %7744 = vmatpush3.msra.mxu1 %v10592_v18  ;;  %7702 = vmatprep.subr.mxu0 %v7993_v27  ;;  %v5048_v18 = vand.u32 4294901760, %v10842_v48  ;;  %v5042_v59 = vsub.f32 %v10832_v49, %v5041_v17  ;;  %v5029_v25 = vand.u32 4294901760, %v5028_v21  ;;  %v10944_v21 = vsub.f32 %v4902_v54, %v10933_v7 }
 0x6ee   :  { %7745 = vmatprep.subr.mxu1 %v7993_v27  ;;  %7703 = vmatpush3.msra.mxu0 %v11421_v2  ;;  %v4903_v2 = vld [vmem:[#allocation2 + $0x420] sm:$0xff] }
 0x6ef   :  { %7746 = vmatpush3.msra.mxu1 %v10602_v16  ;;  %7747 = vmatprep.mubr.msk.f32.mxu1 %vm7994_vm0, %v7993_v27  ;;  %v5022_v16 = vand.u32 4294901760, %v5021_v61  ;;  %v5049_v53 = vsub.f32 %v10842_v48, %v5048_v18  ;;  %v5043_v40 = vand.u32 4294901760, %v5042_v59  ;;  %v10940_v61 = vand.u32 4294901760, %v4901_v35 }
 0x6f0   :  { %7704 = vmatprep.subr.mxu0 %v7993_v27  ;;  %7748 = vmatmul.mubr.f32.vlgmr.msra.gmra.mxu1 %v10634_v13 }
 0x6f1   :  { %7705 = vmatpush3.msra.mxu0 %v11422_v10  ;;  %7712 = vmatprep.mubr.msk.f32.mxu0 %vm7994_vm0, %v7993_v27  ;;  %v5050_v28 = vand.u32 4294901760, %v5049_v53  ;;  %v11283_v53 = vand.u32 4294901760, %v10944_v21 }
 0x6f2   :  { %7706 = vmatprep.subr.mxu0 %v7993_v27  ;;  %7785 = vmatprep.subr.mxu1 %v7993_v27 }
 0x6f3   :  { %7707 = vmatpush3.msra.mxu0 %v11423_v4  ;;  %7817 = vmatprep.mubr.msk.f32.mxu1 %vm7994_vm0, %v7993_v27  ;;  %v5076_v4 = vand.u32 4294901760, %v10905_v9  ;;  %v5098_v20 = vsub.f32 %v10944_v21, %v11283_v53 }
 0x6f4   :  { %7708 = vmatprep.subr.mxu0 %v7993_v27  ;;  %7786 = vmatpush3.msra.mxu1 %v5015_v41 }
 0x6f5   :  { %7709 = vmatpush3.msra.mxu0 %v11424_v57  ;;  %7787 = vmatprep.subr.mxu1 %v7993_v27  ;;  %v10917_v57 = vsub.f32 %v4904_v43, %v10907_v30  ;;  %v5077_v12 = vsub.f32 %v10905_v9, %v5076_v4 }
 0x6f6   :  { %7710 = vmatprep.subr.mxu0 %v7993_v27  ;;  %7788 = vmatpush3.msra.mxu1 %v5022_v16 }
 0x6f7   :  { %7711 = vmatpush3.msra.mxu0 %v11425_v19  ;;  %7789 = vmatprep.subr.mxu1 %v7993_v27  ;;  %v10919_v19 = vand.u32 4294901760, %v4903_v2  ;;  %v11285_v3 = vand.u32 4294901760, %v10917_v57  ;;  %v5078_v39 = vand.u32 4294901760, %v5077_v12 }
 0x6f8   :  { %7713 = vmatmul.mubr.f32.vlgmr.msra.gmra.mxu0 %v10634_v13  ;;  %7750 = vmatprep.subr.mxu0 %v7993_v27  ;;  %v10896_v13 = vsub.f32 %v4906_v58, %v10890_v32 }
 0x6f9   :  { %7782 = vmatprep.mubr.msk.f32.mxu0 %vm7994_vm0, %v7993_v27  ;;  %7751 = vmatpush3.msra.mxu0 %v10801_v33  ;;  %v10929_v23 = vsub.f32 %v4903_v2, %v10919_v19  ;;  %v5084_v63 = vsub.f32 %v10917_v57, %v11285_v3  ;;  %v5099_v2 = vand.u32 4294901760, %v5098_v20 }
 0x6fa   :  { %7752 = vmatprep.subr.mxu0 %v7993_v27  ;;  %7790 = vmatpush3.msra.mxu1 %v5029_v25  ;;  %v5069_v42 = vand.u32 4294901760, %v10896_v13  ;;  %v10951_v25 = vsub.f32 %v4901_v35, %v10940_v61 }
 0x6fb   :  { %7753 = vmatpush3.msra.mxu0 %v10806_v62  ;;  %7791 = vmatprep.subr.mxu1 %v7993_v27  ;;  %v11284_v41 = vand.u32 4294901760, %v10929_v23  ;;  %v5085_v16 = vand.u32 4294901760, %v5084_v63 }
 0x6fc   :  { %7754 = vmatprep.subr.mxu0 %v7993_v27  ;;  %7792 = vmatpush3.msra.mxu1 %v5036_v56  ;;  %v5070_v10 = vsub.f32 %v10896_v13, %v5069_v42  ;;  %v10953_v56 = vand.u32 4294901760, %v4900_v15  ;;  %v11282_v58 = vand.u32 4294901760, %v10951_v25 }
 0x6fd   :  { %7755 = vmatpush3.msra.mxu0 %v10809_v44  ;;  %7793 = vmatprep.subr.mxu1 %v7993_v27  ;;  %v5091_v59 = vsub.f32 %v10929_v23, %v11284_v41 }
 0x6fe   :  { %7756 = vmatprep.subr.mxu0 %v7993_v27  ;;  %7794 = vmatpush3.msra.mxu1 %v5043_v40  ;;  %v5071_v1 = vand.u32 4294901760, %v5070_v10  ;;  %v4899_v40 = vld [vmem:[#allocation2 + $0x400] sm:$0xff] }
 0x6ff   :  { %7757 = vmatpush3.msra.mxu0 %v10811_v36  ;;  %7795 = vmatprep.subr.mxu1 %v7993_v27  ;;  %v5092_v8 = vand.u32 4294901760, %v5091_v59  ;;  %v10963_v50 = vand.u32 4294901760, %v4899_v40 }
 0x700   :  { %7758 = vmatprep.subr.mxu0 %v7993_v27  ;;  %7796 = vmatpush3.msra.mxu1 %v5050_v28  ;;  %v10961_v28 = vsub.f32 %v4900_v15, %v10953_v56 }
 0x701   :  { %7759 = vmatpush3.msra.mxu0 %v10813_v46  ;;  %7797 = vmatprep.subr.mxu1 %v7993_v27 }
 0x702   :  { %7760 = vmatprep.subr.mxu0 %v7993_v27  ;;  %7798 = vmatpush3.msra.mxu1 %v5057_v26  ;;  %v5105_v26 = vsub.f32 %v10951_v25, %v11282_v58  ;;  %v11281_v43 = vand.u32 4294901760, %v10961_v28 }
 0x703   :  { %7761 = vmatpush3.msra.mxu0 %v10821_v38  ;;  %7799 = vmatprep.subr.mxu1 %v7993_v27 }
 0x704   :  { %7762 = vmatprep.subr.mxu0 %v7993_v27  ;;  %7800 = vmatpush3.msra.mxu1 %v5064_v37  ;;  %v10976_v37 = vsub.f32 %v4899_v40, %v10963_v50  ;;  %v5106_v10 = vand.u32 4294901760, %v5105_v26  ;;  %v5112_v54 = vsub.f32 %v10961_v28, %v11281_v43 }
 0x705   :  { %7763 = vmatpush3.msra.mxu0 %v10823_v11  ;;  %7801 = vmatprep.subr.mxu1 %v7993_v27 }
 0x706   :  { %7764 = vmatprep.subr.mxu0 %v7993_v27  ;;  %7802 = vmatpush3.msra.mxu1 %v5071_v1  ;;  %v11280_v1 = vand.u32 4294901760, %v10976_v37  ;;  %v5113_v12 = vand.u32 4294901760, %v5112_v54 }
 0x707   :  { %7765 = vmatpush3.msra.mxu0 %v10835_v51  ;;  %7803 = vmatprep.subr.mxu1 %v7993_v27 }
 0x708   :  { %7766 = vmatprep.subr.mxu0 %v7993_v27  ;;  %7804 = vmatpush3.msra.mxu1 %v5078_v39  ;;  %v5119_v35 = vsub.f32 %v10976_v37, %v11280_v1 }
 0x709   :  { %7767 = vmatpush3.msra.mxu0 %v10890_v32  ;;  %7805 = vmatprep.subr.mxu1 %v7993_v27 }
 0x70a   :  { %7768 = vmatprep.subr.mxu0 %v7993_v27  ;;  %7806 = vmatpush3.msra.mxu1 %v5085_v16  ;;  %v5120_v39 = vand.u32 4294901760, %v5119_v35 }
 0x70b   :  { %7769 = vmatpush3.msra.mxu0 %v10898_v60  ;;  %7807 = vmatprep.subr.mxu1 %v7993_v27 }
 0x70c   :  { %7770 = vmatprep.subr.mxu0 %v7993_v27  ;;  %7808 = vmatpush3.msra.mxu1 %v5092_v8 }
 0x70d   :  { %7771 = vmatpush3.msra.mxu0 %v10907_v30  ;;  %7809 = vmatprep.subr.mxu1 %v7993_v27 }
 0x70e   :  { %7772 = vmatprep.subr.mxu0 %v7993_v27  ;;  %7810 = vmatpush3.msra.mxu1 %v5099_v2  ;;  %v4255_v2 = vsub.s32 6, %v8819_v14 }
 0x70f   :  { %7773 = vmatpush3.msra.mxu0 %v10919_v19  ;;  %7811 = vmatprep.subr.mxu1 %v7993_v27 }
 0x710   :  { %7774 = vmatprep.subr.mxu0 %v7993_v27  ;;  %7812 = vmatpush3.msra.mxu1 %v5106_v10  ;;  %v10994_v10 = vld [vmem:[#allocation2 + $0x480] sm:$0xff] }
 0x711   :  { %7775 = vmatpush3.msra.mxu0 %v10933_v7  ;;  %7813 = vmatprep.subr.mxu1 %v7993_v27  ;;  %v4256_v54 = vrot.slane %v10994_v10, %v4255_v2 }
 0x712   :  { %7776 = vmatprep.subr.mxu0 %v7993_v27  ;;  %7814 = vmatpush3.msra.mxu1 %v5113_v12 }
 0x713   :  { %7777 = vmatpush3.msra.mxu0 %v10940_v61  ;;  %7815 = vmatprep.subr.mxu1 %v7993_v27 }
 0x714   :  { %7778 = vmatprep.subr.mxu0 %v7993_v27  ;;  %7816 = vmatpush3.msra.mxu1 %v5120_v39 }
 0x715   :  { %7779 = vmatpush3.msra.mxu0 %v10953_v56  ;;  %7855 = vmatprep.subr.mxu1 %v7993_v27 }
 0x716   :  { %7780 = vmatprep.subr.mxu0 %v7993_v27 }
 0x717   :  { %7781 = vmatpush3.msra.mxu0 %v10963_v50 }
 0x718   :  { %7820 = vmatprep.subr.mxu0 %v7993_v27 }
 0x76e   :  { %v4495_v63 = vpop.f32.mrf.mxu1 }
 0x770   :  { %v7609_v15 = vpop.f32.mrf.mxu1 }
 0x776   :  { %v4344_v16 = vpop.f32.mrf.mxu0 }
 0x777   :  { %v4345_v12 = vadd.f32 %v4344_v16, %v4256_v54 }
 0x778   :  { %v7574_v59 = vpop.f32.mrf.mxu0 }
 0x779   :  { %v4496_v1 = vadd.f32 %v4495_v63, %v4345_v12 }
 0x78e   :  { %v4688_v40 = vpop.f32.mrf.mxu1 }
 0x790   :  { %v7679_v8 = vpop.f32.mrf.mxu1 }
 0x797   :  { %v4599_v20 = vpop.f32.mrf.mxu0 }
 0x798   :  { %v4600_v43 = vadd.f32 %v4599_v20, %v4496_v1 }
 0x799   :  { %v7644_v26 = vpop.f32.mrf.mxu0 }
 0x79a   :  { %v4689_v58 = vadd.f32 %v4688_v40, %v4600_v43 }
 0x7b0   :  { %v4894_v35 = vpop.f32.mrf.mxu1 }
 0x7b2   :  { %v7749_v39 = vpop.f32.mrf.mxu1 }
 0x7b8   :  { %v4807_v53 = vpop.f32.mrf.mxu0 }
 0x7b9   :  { %v4808_v15 = vadd.f32 %v4807_v53, %v4689_v58 }
 0x7ba   :  { %v7714_v41 = vpop.f32.mrf.mxu0 }
 0x7bb   :  { %v4895_v59 = vadd.f32 %v4894_v35, %v4808_v15 }
 0x7bd   :  { %v4898_v3 = vmax.f32 %v4895_v59, 0.0 }
 0x7bf   :  { %v10997_v8 = vand.u32 4294901760, %v4898_v3 }
 0x7c1   :  { %v11000_v26 = vsub.f32 %v4898_v3, %v10997_v8  ;;  %7818 = vmatmul.mubr.f32.vlgmr.msra.gmra.mxu1 %v10997_v8 }
 0x7c2   :  { %7856 = vmatpush3.msra.mxu1 %v10801_v33  ;;  %7887 = vmatprep.mubr.msk.f32.mxu1 %vm7994_vm0, %v7993_v27 }
 0x7c3   :  { %v5002_v1 = vand.u32 4294901760, %v11000_v26  ;;  %7857 = vmatprep.subr.mxu1 %v7993_v27 }
 0x7c4   :  { %7858 = vmatpush3.msra.mxu1 %v10806_v62 }
 0x7c5   :  { %7859 = vmatprep.subr.mxu1 %v7993_v27  ;;  %v5003_v41 = vsub.f32 %v11000_v26, %v5002_v1 }
 0x7c6   :  { %7860 = vmatpush3.msra.mxu1 %v10809_v44 }
 0x7c7   :  { %7861 = vmatprep.subr.mxu1 %v7993_v27  ;;  %v5004_v3 = vand.u32 4294901760, %v5003_v41 }
 0x7c8   :  { %7862 = vmatpush3.msra.mxu1 %v10811_v36 }
 0x7c9   :  { %7863 = vmatprep.subr.mxu1 %v7993_v27  ;;  %7783 = vmatmul.mubr.f32.vlgmr.msra.gmra.mxu0 %v5004_v3 }
 0x7ca   :  { %7821 = vmatpush3.msra.mxu0 %v10804_v24  ;;  %7864 = vmatpush3.msra.mxu1 %v10813_v46  ;;  %v11427_v24 = vand.u32 4294901760, %v10929_v23 }
 0x7cb   :  { %7822 = vmatprep.subr.mxu0 %v7993_v27  ;;  %7865 = vmatprep.subr.mxu1 %v7993_v27 }
 0x7cc   :  { %7823 = vmatpush3.msra.mxu0 %v10818_v22  ;;  %7866 = vmatpush3.msra.mxu1 %v10821_v38 }
 0x7cd   :  { %7824 = vmatprep.subr.mxu0 %v7993_v27  ;;  %7867 = vmatprep.subr.mxu1 %v7993_v27 }
 0x7ce   :  { %7825 = vmatpush3.msra.mxu0 %v10826_v0  ;;  %7868 = vmatpush3.msra.mxu1 %v10823_v11 }
 0x7cf   :  { %7826 = vmatprep.subr.mxu0 %v7993_v27  ;;  %7869 = vmatprep.subr.mxu1 %v7993_v27 }
 0x7d0   :  { %7827 = vmatpush3.msra.mxu0 %v10829_v31  ;;  %7870 = vmatpush3.msra.mxu1 %v10835_v51 }
 0x7d1   :  { %7828 = vmatprep.subr.mxu0 %v7993_v27  ;;  %7871 = vmatprep.subr.mxu1 %v7993_v27 }
 0x7d2   :  { %7829 = vmatpush3.msra.mxu0 %v10832_v49  ;;  %7872 = vmatpush3.msra.mxu1 %v10890_v32 }
 0x7d3   :  { %7830 = vmatprep.subr.mxu0 %v7993_v27  ;;  %7873 = vmatprep.subr.mxu1 %v7993_v27 }
 0x7d4   :  { %7831 = vmatpush3.msra.mxu0 %v10842_v48  ;;  %7874 = vmatpush3.msra.mxu1 %v10898_v60 }
 0x7d5   :  { %7832 = vmatprep.subr.mxu0 %v7993_v27  ;;  %7875 = vmatprep.subr.mxu1 %v7993_v27 }
 0x7d6   :  { %7833 = vmatpush3.msra.mxu0 %v10846_v55  ;;  %7876 = vmatpush3.msra.mxu1 %v10907_v30 }
 0x7d7   :  { %7834 = vmatprep.subr.mxu0 %v7993_v27  ;;  %7877 = vmatprep.subr.mxu1 %v7993_v27 }
 0x7d8   :  { %7835 = vmatpush3.msra.mxu0 %v10858_v52  ;;  %7878 = vmatpush3.msra.mxu1 %v10919_v19 }
 0x7d9   :  { %7836 = vmatprep.subr.mxu0 %v7993_v27  ;;  %7879 = vmatprep.subr.mxu1 %v7993_v27 }
 0x7da   :  { %7837 = vmatpush3.msra.mxu0 %v10896_v13  ;;  %7880 = vmatpush3.msra.mxu1 %v10933_v7 }
 0x7db   :  { %7838 = vmatprep.subr.mxu0 %v7993_v27  ;;  %7881 = vmatprep.subr.mxu1 %v7993_v27 }
 0x7dc   :  { %7839 = vmatpush3.msra.mxu0 %v10905_v9  ;;  %7882 = vmatpush3.msra.mxu1 %v10940_v61 }
 0x7dd   :  { %7840 = vmatprep.subr.mxu0 %v7993_v27  ;;  %7883 = vmatprep.subr.mxu1 %v7993_v27 }
 0x7de   :  { %7841 = vmatpush3.msra.mxu0 %v10917_v57  ;;  %7884 = vmatpush3.msra.mxu1 %v10953_v56 }
 0x7df   :  { %7842 = vmatprep.subr.mxu0 %v7993_v27  ;;  %7885 = vmatprep.subr.mxu1 %v7993_v27 }
 0x7e0   :  { %7843 = vmatpush3.msra.mxu0 %v10929_v23  ;;  %7886 = vmatpush3.msra.mxu1 %v10963_v50 }
 0x7e1   :  { %7844 = vmatprep.subr.mxu0 %v7993_v27  ;;  %7888 = vmatmul.mubr.f32.vlgmr.msra.gmra.mxu1 %v5002_v1 }
 0x7e2   :  { %7925 = vmatprep.subr.mxu1 %v7993_v27  ;;  %7845 = vmatpush3.msra.mxu0 %v10944_v21 }
 0x7e3   :  { %7926 = vmatpush3.msra.mxu1 %v10801_v33  ;;  %7846 = vmatprep.subr.mxu0 %v7993_v27  ;;  %v11426_v33 = vand.u32 4294901760, %v10917_v57 }
 0x7e4   :  { %7927 = vmatprep.subr.mxu1 %v7993_v27  ;;  %7847 = vmatpush3.msra.mxu0 %v10951_v25 }
 0x7e5   :  { %7928 = vmatpush3.msra.mxu1 %v10806_v62  ;;  %7848 = vmatprep.subr.mxu0 %v7993_v27  ;;  %v11428_v62 = vand.u32 4294901760, %v10944_v21 }
 0x7e6   :  { %7929 = vmatprep.subr.mxu1 %v7993_v27  ;;  %7849 = vmatpush3.msra.mxu0 %v10961_v28 }
 0x7e7   :  { %7930 = vmatpush3.msra.mxu1 %v10809_v44  ;;  %7850 = vmatprep.subr.mxu0 %v7993_v27  ;;  %v11429_v44 = vand.u32 4294901760, %v10951_v25 }
 0x7e8   :  { %7931 = vmatprep.subr.mxu1 %v7993_v27  ;;  %7851 = vmatpush3.msra.mxu0 %v10976_v37 }
 0x7e9   :  { %7852 = vmatprep.mubr.msk.f32.mxu0 %vm7994_vm0, %v7993_v27  ;;  %7932 = vmatpush3.msra.mxu1 %v10811_v36  ;;  %v11430_v36 = vand.u32 4294901760, %v10961_v28 }
 0x7ea   :  { %7853 = vmatmul.mubr.f32.vlgmr.msra.gmra.mxu0 %v11000_v26  ;;  %7890 = vmatprep.subr.mxu0 %v7993_v27 }
 0x7eb   :  { %7933 = vmatprep.subr.mxu1 %v7993_v27  ;;  %7891 = vmatpush3.msra.mxu0 %v5013_v47 }
 0x7ec   :  { %7934 = vmatpush3.msra.mxu1 %v10813_v46  ;;  %7892 = vmatprep.subr.mxu0 %v7993_v27  ;;  %v11431_v46 = vand.u32 4294901760, %v10976_v37 }
 0x7ed   :  { %7935 = vmatprep.subr.mxu1 %v7993_v27  ;;  %7893 = vmatpush3.msra.mxu0 %v5020_v6  ;;  %v4917_v6 = vsub.s32 7, %v8819_v14 }
 0x7ee   :  { %7936 = vmatpush3.msra.mxu1 %v10821_v38  ;;  %7894 = vmatprep.subr.mxu0 %v7993_v27 }
 0x7ef   :  { %7937 = vmatprep.subr.mxu1 %v7993_v27  ;;  %7895 = vmatpush3.msra.mxu0 %v5027_v45  ;;  %v4918_v48 = vrot.slane %v10994_v10, %v4917_v6 }
 0x7f0   :  { %7938 = vmatpush3.msra.mxu1 %v10823_v11  ;;  %7896 = vmatprep.subr.mxu0 %v7993_v27 }
 0x7f1   :  { %7939 = vmatprep.subr.mxu1 %v7993_v27  ;;  %7897 = vmatpush3.msra.mxu0 %v5034_v29 }
 0x7f2   :  { %7940 = vmatpush3.msra.mxu1 %v10835_v51  ;;  %7898 = vmatprep.subr.mxu0 %v7993_v27 }
 0x7f3   :  { %7941 = vmatprep.subr.mxu1 %v7993_v27  ;;  %7899 = vmatpush3.msra.mxu0 %v5041_v17 }
 0x7f4   :  { %7942 = vmatpush3.msra.mxu1 %v10890_v32  ;;  %7900 = vmatprep.subr.mxu0 %v7993_v27 }
 0x7f5   :  { %7943 = vmatprep.subr.mxu1 %v7993_v27  ;;  %7901 = vmatpush3.msra.mxu0 %v5048_v18 }
 0x7f6   :  { %7944 = vmatpush3.msra.mxu1 %v10898_v60  ;;  %7902 = vmatprep.subr.mxu0 %v7993_v27 }
 0x7f7   :  { %7945 = vmatprep.subr.mxu1 %v7993_v27  ;;  %7903 = vmatpush3.msra.mxu0 %v5055_v34 }
 0x7f8   :  { %7946 = vmatpush3.msra.mxu1 %v10907_v30  ;;  %7904 = vmatprep.subr.mxu0 %v7993_v27 }
 0x7f9   :  { %7947 = vmatprep.subr.mxu1 %v7993_v27  ;;  %7905 = vmatpush3.msra.mxu0 %v5062_v5 }
 0x7fa   :  { %7948 = vmatpush3.msra.mxu1 %v10919_v19  ;;  %7906 = vmatprep.subr.mxu0 %v7993_v27 }
 0x7fb   :  { %7949 = vmatprep.subr.mxu1 %v7993_v27  ;;  %7907 = vmatpush3.msra.mxu0 %v5069_v42 }
 0x7fc   :  { %7950 = vmatpush3.msra.mxu1 %v10933_v7  ;;  %7908 = vmatprep.subr.mxu0 %v7993_v27 }
 0x7fd   :  { %7951 = vmatprep.subr.mxu1 %v7993_v27  ;;  %7909 = vmatpush3.msra.mxu0 %v5076_v4 }
 0x7fe   :  { %7952 = vmatpush3.msra.mxu1 %v10940_v61  ;;  %7910 = vmatprep.subr.mxu0 %v7993_v27 }
 0x7ff   :  { %7953 = vmatprep.subr.mxu1 %v7993_v27  ;;  %7911 = vmatpush3.msra.mxu0 %v11426_v33 }
 0x800   :  { %7954 = vmatpush3.msra.mxu1 %v10953_v56  ;;  %7912 = vmatprep.subr.mxu0 %v7993_v27 }
 0x801   :  { %7955 = vmatprep.subr.mxu1 %v7993_v27  ;;  %7913 = vmatpush3.msra.mxu0 %v11427_v24 }
 0x802   :  { %7956 = vmatpush3.msra.mxu1 %v10963_v50  ;;  %7957 = vmatprep.mubr.msk.f32.mxu1 %vm7994_vm0, %v7993_v27 }
 0x803   :  { %7914 = vmatprep.subr.mxu0 %v7993_v27  ;;  %7958 = vmatmul.mubr.f32.vlgmr.msra.gmra.mxu1 %v10997_v8 }
 0x804   :  { %7915 = vmatpush3.msra.mxu0 %v11428_v62  ;;  %7922 = vmatprep.mubr.msk.f32.mxu0 %vm7994_vm0, %v7993_v27 }
 0x805   :  { %7916 = vmatprep.subr.mxu0 %v7993_v27 }
 0x806   :  { %7917 = vmatpush3.msra.mxu0 %v11429_v44 }
 0x807   :  { %7918 = vmatprep.subr.mxu0 %v7993_v27 }
 0x808   :  { %7919 = vmatpush3.msra.mxu0 %v11430_v36 }
 0x809   :  { %7920 = vmatprep.subr.mxu0 %v7993_v27 }
 0x80a   :  { %7921 = vmatpush3.msra.mxu0 %v11431_v46 }
 0x80b   :  { %7923 = vmatmul.mubr.f32.vlgmr.msra.gmra.mxu0 %v10997_v8 }
 0x881   :  { %v5157_v47 = vpop.f32.mrf.mxu1 }
 0x883   :  { %v7819_v22 = vpop.f32.mrf.mxu1 }
 0x889   :  { %v5006_v38 = vpop.f32.mrf.mxu0 }
 0x88a   :  { %v5007_v55 = vadd.f32 %v5006_v38, %v4918_v48 }
 0x88b   :  { %v7784_v11 = vpop.f32.mrf.mxu0 }
 0x88c   :  { %v5158_v27 = vadd.f32 %v5157_v47, %v5007_v55 }
 0x8a1   :  { %v5350_v0 = vpop.f32.mrf.mxu1 }
 0x8a3   :  { %v7889_v31 = vpop.f32.mrf.mxu1 }
 0x8aa   :  { %v5261_v49 = vpop.f32.mrf.mxu0 }
 0x8ab   :  { %v5262_v17 = vadd.f32 %v5261_v49, %v5158_v27 }
 0x8ac   :  { %v7854_v51 = vpop.f32.mrf.mxu0 }
 0x8ad   :  { %v5351_v18 = vadd.f32 %v5350_v0, %v5262_v17 }
 0x8c3   :  { %v5556_v45 = vpop.f32.mrf.mxu1 }
 0x8c5   :  { %v7959_v29 = vpop.f32.mrf.mxu1 }
 0x8cb   :  { %v5469_v52 = vpop.f32.mrf.mxu0 }
 0x8cc   :  { %v5470_v34 = vadd.f32 %v5469_v52, %v5351_v18 }
 0x8cd   :  { %v7924_v5 = vpop.f32.mrf.mxu0 }
 0x8ce   :  { %v5557_v32 = vadd.f32 %v5556_v45, %v5470_v34 }
 0x8d0   :  { %5560 = vst [vmem:[%s11165_s2] sm:$0xff] %v5557_v32 }
 0x8d1   :  { %5565 = vsyncpa [#allocation3], 1 }

</bundles_post_ra>
